<compile_context>
chip_gen: v7x
topology: tpu7x:2x2x1
jax: 0.10.0
libtpu: 0.0.40
codegen_flags: <defaults>
</compile_context>

<pallas_src>
import functools

import numpy as np
import jax
import jax.numpy as jnp
from jax import lax
from jax.experimental import pallas as pl
from jax.experimental.pallas import tpu as pltpu


# ----------------------------------------------------------------------------
# Shared gate math (PyTorch gate order: i, f, g, o).  Used by kernel and ref.
# Full-tensor sigmoid/tanh (2 EUP pushes) then slice -- mathematically
# identical to slicing first.
# ----------------------------------------------------------------------------
def _gates_to_hc(gates, c, hidden):
    sg = jax.nn.sigmoid(gates)
    tg = jnp.tanh(gates)
    i = sg[:, 0 * hidden:1 * hidden]
    f = sg[:, 1 * hidden:2 * hidden]
    g = tg[:, 2 * hidden:3 * hidden]
    o = sg[:, 3 * hidden:4 * hidden]
    c_new = f * c + i * g
    h_new = o * jnp.tanh(c_new)
    return h_new, c_new


def _round8(n):
    return -(-n // 8) * 8


def _round128(n):
    return -(-n // 128) * 128


# ----------------------------------------------------------------------------
# Static placement of every (pre-transformed) weight/bias inside two packed
# VMEM buffers.  Row offsets are multiples of 8 and columns start at 0, so all
# in-kernel slices are tile-aligned.
# ----------------------------------------------------------------------------
def _build_layout(cfg):
    T, Din, O = cfg["seq_length"], cfg["input_dim"], cfg["output_dim"]
    H1, M, L = cfg["mid_dim_i"], cfg["mid_dim_o"], cfg["latent_dim"]
    VM, V = cfg["v_mid"], cfg["v_latent"]

    layout = {}
    offs = {"A": 0, "B": 0}
    width = {"A": 0, "B": 0}

    def add(name, buf, rows, cols):
        layout[name] = (buf, offs[buf], rows, cols)
        offs[buf] += _round8(rows)
        width[buf] = max(width[buf], cols)

    # Buffer A: narrow blocks (<= 128 lanes with the default small config).
    add("fc1_wih", "A", Din, 4 * H1)
    add("fc1_whh", "A", H1, 4 * H1)
    add("fc1_b", "A", 1, 4 * H1)
    add("fc21_wih", "A", H1, 4 * L)
    add("fc21_whh", "A", L, 4 * L)
    add("fc21_b", "A", 1, 4 * L)
    add("lin1_w", "A", T * L, VM)
    add("lin1_b", "A", 1, VM)
    add("lin2_w", "A", VM, V)
    add("lin2_b", "A", 1, V)
    add("w35", "A", O, 4 * V)          # lineardown2 folded into lstm3 Wih
    add("b35", "A", 1, 4 * V)
    add("l3_whh", "A", V, 4 * V)
    add("l5_wih", "A", M, 4 * O)
    add("l5_whh", "A", O, 4 * O)
    add("l5_b", "A", 1, 4 * O)
    # Buffer B: wide blocks (lstm4 gates, encoder->decoder handoff).
    add("e2d_w", "B", V, 5 * V)        # [d1_w@l3_wih + l3_whh | id_w]
    add("e2d_b", "B", 1, 5 * V)
    add("l4_wih", "B", V, 4 * M)
    add("l4_whh", "B", M, 4 * M)
    add("l4_b", "B", 1, 4 * M)

    shapes = {k: (offs[k], _round128(width[k])) for k in ("A", "B")}
    return layout, shapes


# ----------------------------------------------------------------------------
# Single fused kernel: encode (fc1 -> ReLU -> fc21 -> lin1 -> ReLU -> lin2 ->
# ReLU) then decode (3 LSTMCells with lineardown1/2 + idlinear folded in).
# ----------------------------------------------------------------------------
def _fused_forward_kernel(x_ref, packa_ref, packb_ref,
                          mu_theta_ref, mu_ref, flat_ref,
                          *, layout, T, B, H1, L, V, M, O):
    f32 = jnp.float32
    dot = functools.partial(jnp.dot, preferred_element_type=f32)
    refs = {"A": packa_ref, "B": packb_ref}

    def W(name):                                   # static tile-aligned view
        buf, off, rows, cols = layout[name]
        return refs[buf][off:off + rows, 0:cols]

    # ----------------------- encoder: fc1 (LSTM) + ReLU ----------------------
    wih1, whh1, b1 = W("fc1_wih"), W("fc1_whh"), W("fc1_b")
    wih2, whh2, b2 = W("fc21_wih"), W("fc21_whh"), W("fc21_b")

    # All T input->hidden matmuls of fc1 as ONE dot (x passed as (T*B, Din)).
    xg1 = dot(x_ref[...], wih1) + b1               # (T*B, 4*H1)

    h = jnp.zeros((B, H1), f32)
    c = jnp.zeros((B, H1), f32)
    xg2 = []
    for t in range(T):                             # fully unrolled, T = 8
        gates = xg1[t * B:(t + 1) * B, :] + dot(h, whh1)
        h, c = _gates_to_hc(gates, c, H1)
        h1r = jnp.maximum(h, 0.0)                  # fused ReLU
        # fc21's input matmul is independent of fc21's recurrence -> hoisted.
        xg2.append(dot(h1r, wih2) + b2)            # (B, 4*L)

    # --------------------- encoder: fc21 (LSTM) + lin1 -----------------------
    # Stage h_t lane-densely into (B, T*L); lin1 becomes one K = T*L dot.
    # (lin1's weight was re-ordered at init so row t*L+l == PyTorch row l*T+t.)
    h = jnp.zeros((B, L), f32)
    c = jnp.zeros((B, L), f32)
    for t in range(T):                             # fully unrolled
        gates = xg2[t] + dot(h, whh2)
        h, c = _gates_to_hc(gates, c, L)
        flat_ref[:, t * L:(t + 1) * L] = h         # off the h/c chain

    hm = jnp.maximum(dot(flat_ref[...], W("lin1_w")) + W("lin1_b"), 0.0)
    mu = jnp.maximum(dot(hm, W("lin2_w")) + W("lin2_b"), 0.0)
    mu_ref[...] = mu

    # --------------- decoder: 3 stacked LSTMCells (folded linears) -----------
    w3h = W("l3_whh")
    w35, b35 = W("w35"), W("b35")
    w4i, w4h, b4 = W("l4_wih"), W("l4_whh"), W("l4_b")
    w5i, w5h, b5 = W("l5_wih"), W("l5_whh"), W("l5_b")

    # t = 0: lineardown1, lstm3's Wih, lstm3's Whh and idlinear all collapse
    # into a single dot on mu at the encoder->decoder handoff.
    r = dot(mu, W("e2d_w")) + W("e2d_b")           # (B, 5V)
    h1d, c1d = _gates_to_hc(r[:, :4 * V], r[:, 4 * V:5 * V], V)
    g = dot(h1d, w4i) + b4                         # h2d == 0 at t == 0
    h2d, c2d = _gates_to_hc(g, jnp.zeros((B, M), f32), M)
    g = dot(h2d, w5i) + b5                         # h3d == 0 at t == 0
    h3d, c3d = _gates_to_hc(g, jnp.zeros((B, O), f32), O)
    mu_theta_ref[0] = h3d

    for t in range(1, T):                          # fully unrolled
        g = dot(h3d, w35) + dot(h1d, w3h) + b35    # lineardown2 folded in
        h1d, c1d = _gates_to_hc(g, c1d, V)
        g = dot(h1d, w4i) + dot(h2d, w4h) + b4
        h2d, c2d = _gates_to_hc(g, c2d, M)
        g = dot(h2d, w5i) + dot(h3d, w5h) + b5
        h3d, c3d = _gates_to_hc(g, c3d, O)
        mu_theta_ref[t] = h3d                      # static index store


# ----------------------------------------------------------------------------
# Wrapper: one pallas_call, no grid (whole problem fits in VMEM).
# ----------------------------------------------------------------------------
def forward(packed, x, *, cfg):
    packa, packb = packed
    T, B, Din = x.shape
    H1, L = cfg["mid_dim_i"], cfg["latent_dim"]
    V, M = cfg["v_latent"], cfg["mid_dim_o"]
    O = cfg["output_dim"]
    layout, _ = _build_layout(cfg)

    kernel = functools.partial(_fused_forward_kernel, layout=layout, T=T, B=B,
                               H1=H1, L=L, V=V, M=M, O=O)
    mu_theta, mu = pl.pallas_call(
        kernel,
        out_shape=(jax.ShapeDtypeStruct((T, B, O), jnp.float32),
                   jax.ShapeDtypeStruct((B, V), jnp.float32)),
        scratch_shapes=[pltpu.VMEM((B, T * L), jnp.float32)],
    )(x.reshape(T * B, Din), packa, packb)   # row-major reshape = free bitcast
    return mu_theta, mu


# ----------------------------------------------------------------------------
# One-time host-side weight transforms + packing (OUTSIDE the jitted path).
# ----------------------------------------------------------------------------
def prepare_params(p, cfg):
    T, L = cfg["seq_length"], cfg["latent_dim"]

    def n(name):
        return np.asarray(p[name], dtype=np.float64)   # fold in f64, store f32

    # Bake the PyTorch permute(1,2,0).view(B,-1) flatten into lin1's weight:
    # new row t*L + l  ==  reference row l*T + t.
    lin1_w = n("lin1_w").reshape(L, T, -1).transpose(1, 0, 2).reshape(T * L, -1)

    # Fold lineardown2 into lstm3's input weight (used for steps t >= 1).
    w35 = n("d2_w") @ n("l3_wih")
    b35 = n("d2_b") @ n("l3_wih") + n("l3_b")
    # Fold lineardown1 + lstm3 hidden weight + idlinear into one handoff dot
    # (step t == 0, where lstm3's hidden state is mu itself).
    w0 = n("d1_w") @ n("l3_wih") + n("l3_whh")
    b0 = n("d1_b") @ n("l3_wih") + n("l3_b")
    e2d_w = np.concatenate([w0, n("id_w")], axis=1)     # (V, 5V)
    e2d_b = np.concatenate([b0, n("id_b")], axis=1)     # (1, 5V)

    arrays = {
        "fc1_wih": n("fc1_wih"), "fc1_whh": n("fc1_whh"), "fc1_b": n("fc1_b"),
        "fc21_wih": n("fc21_wih"), "fc21_whh": n("fc21_whh"),
        "fc21_b": n("fc21_b"),
        "lin1_w": lin1_w, "lin1_b": n("lin1_b"),
        "lin2_w": n("lin2_w"), "lin2_b": n("lin2_b"),
        "w35": w35, "b35": b35, "l3_whh": n("l3_whh"),
        "l5_wih": n("l5_wih"), "l5_whh": n("l5_whh"), "l5_b": n("l5_b"),
        "e2d_w": e2d_w, "e2d_b": e2d_b,
        "l4_wih": n("l4_wih"), "l4_whh": n("l4_whh"), "l4_b": n("l4_b"),
    }

    layout, shapes = _build_layout(cfg)
    bufs = {k: np.zeros(shapes[k], np.float32) for k in shapes}
    for name, (buf, off, rows, cols) in layout.items():
        bufs[buf][off:off + rows, :cols] = np.asarray(arrays[name], np.float32)
    return jnp.asarray(bufs["A"]), jnp.asarray(bufs["B"])


# ----------------------------------------------------------------------------
# Deterministic parameter construction (PyTorch-style uniform init); weights
# pre-transposed to (in, out) / (in, 4*hidden) layouts, LSTM biases combined.
# ----------------------------------------------------------------------------
def init_params(key, cfg):
    Din, O, T = cfg["input_dim"], cfg["output_dim"], cfg["seq_length"]
    H1, M, L = cfg["mid_dim_i"], cfg["mid_dim_o"], cfg["latent_dim"]
    VM, V = cfg["v_mid"], cfg["v_latent"]

    keys = iter(jax.random.split(key, 64))

    def u(shape, fan):
        s = 1.0 / jnp.sqrt(jnp.float32(fan))
        return jax.random.uniform(next(keys), shape, jnp.float32, -s, s)

    def lstm(din, h):
        wih = u((4 * h, din), h)
        whh = u((4 * h, h), h)
        b = (u((4 * h,), h) + u((4 * h,), h)).reshape(1, 4 * h)
        return wih.T, whh.T, b

    def linear(din, dout):
        w = u((dout, din), din)
        b = u((dout,), din).reshape(1, dout)
        return w.T, b

    p = {}
    p["fc1_wih"], p["fc1_whh"], p["fc1_b"] = lstm(Din, H1)
    p["fc21_wih"], p["fc21_whh"], p["fc21_b"] = lstm(H1, L)
    p["l3_wih"], p["l3_whh"], p["l3_b"] = lstm(L, V)
    p["l4_wih"], p["l4_whh"], p["l4_b"] = lstm(V, M)
    p["l5_wih"], p["l5_whh"], p["l5_b"] = lstm(M, O)
    p["lin1_w"], p["lin1_b"] = linear(L * T, VM)
    p["lin2_w"], p["lin2_b"] = linear(VM, V)
    p["id_w"], p["id_b"] = linear(V, V)
    p["d1_w"], p["d1_b"] = linear(V, L)
    p["d2_w"], p["d2_b"] = linear(O, L)
    # lin3 / lin4 of the PyTorch module are unused in forward(); omitted.
    return p


# ----------------------------------------------------------------------------
# Pure-JAX reference (HIGHEST precision, unfolded weights) — validation only.
# ----------------------------------------------------------------------------
def _reference_forward(p, x, cfg):
    hi = lax.Precision.HIGHEST
    T, B, _ = x.shape
    L, V, M, O = (cfg["latent_dim"], cfg["v_latent"],
                  cfg["mid_dim_o"], cfg["output_dim"])

    def cell(xt, h, c, wih, whh, b, hd):
        gates = (jnp.dot(xt, wih, precision=hi)
                 + jnp.dot(h, whh, precision=hi) + b)
        return _gates_to_hc(gates, c, hd)

    def seq(xs, wih, whh, b, hd, relu):
        def step(carry, xt):
            h, c = carry
            h, c = cell(xt, h, c, wih, whh, b, hd)
            return (h, c), (jnp.maximum(h, 0.0) if relu else h)
        z0 = jnp.zeros((B, hd), jnp.float32)
        _, ys = lax.scan(step, (z0, z0), xs)
        return ys

    h1 = seq(x, p["fc1_wih"], p["fc1_whh"], p["fc1_b"], cfg["mid_dim_i"], True)
    o21 = seq(h1, p["fc21_wih"], p["fc21_whh"], p["fc21_b"], L, False)
    flat = jnp.transpose(o21, (1, 2, 0)).reshape(B, L * T)
    h = jnp.maximum(jnp.dot(flat, p["lin1_w"], precision=hi) + p["lin1_b"], 0.)
    mu = jnp.maximum(jnp.dot(h, p["lin2_w"], precision=hi) + p["lin2_b"], 0.)

    h1_, c1_ = mu, jnp.dot(mu, p["id_w"], precision=hi) + p["id_b"]
    inp = jnp.dot(mu, p["d1_w"], precision=hi) + p["d1_b"]
    h2_ = jnp.zeros((B, M), jnp.float32); c2_ = jnp.zeros((B, M), jnp.float32)
    h3_ = jnp.zeros((B, O), jnp.float32); c3_ = jnp.zeros((B, O), jnp.float32)
    outs = []
    for _ in range(T):
        h1_, c1_ = cell(inp, h1_, c1_, p["l3_wih"], p["l3_whh"], p["l3_b"], V)
        h2_, c2_ = cell(h1_, h2_, c2_, p["l4_wih"], p["l4_whh"], p["l4_b"], M)
        h3_, c3_ = cell(h2_, h3_, c3_, p["l5_wih"], p["l5_whh"], p["l5_b"], O)
        inp = jnp.dot(h3_, p["d2_w"], precision=hi) + p["d2_b"]
        outs.append(h3_)
    return jnp.stack(outs, 0), mu


# ----------------------------------------------------------------------------
if __name__ == "__main__":
    cfg = dict(input_dim=8, output_dim=16, seq_length=8,
               mid_dim_i=32, mid_dim_o=64, latent_dim=16,
               v_mid=64, v_latent=32)
    batch = 4

    key = jax.random.PRNGKey(0)
    k_param, k_x = jax.random.split(key)
    params = init_params(k_param, cfg)
    packed = prepare_params(params, cfg)          # one-time, outside jit
    x = jax.random.normal(
        k_x, (cfg["seq_length"], batch, cfg["input_dim"]), jnp.float32)

    fwd = jax.jit(functools.partial(forward, cfg=cfg))
    mu_theta, mu = fwd(packed, x)
    mu_theta = jax.block_until_ready(mu_theta)
    mu = jax.block_until_ready(mu)

    ref_theta, ref_mu = _reference_forward(params, x, cfg)
    assert mu_theta.shape == (cfg["seq_length"], batch, cfg["output_dim"])
    assert mu.shape == (batch, cfg["v_latent"])
    assert jnp.allclose(mu, ref_mu, atol=5e-3, rtol=5e-3), \
        float(jnp.max(jnp.abs(mu - ref_mu)))
    assert jnp.allclose(mu_theta, ref_theta, atol=5e-3, rtol=5e-3), \
        float(jnp.max(jnp.abs(mu_theta - ref_theta)))

    print("KERNEL_OK")
</pallas_src>

<mosaic_0001>
module attributes {stable_mosaic.version = 11 : i64} {
  func.func @_fused_forward_kernel(%arg0: memref<32x8xf32, #tpu.memory_space<vmem>>, %arg1: memref<456x128xf32, #tpu.memory_space<vmem>>, %arg2: memref<144x256xf32, #tpu.memory_space<vmem>>, %arg3: memref<8x4x16xf32, #tpu.memory_space<vmem>>, %arg4: memref<4x32xf32, #tpu.memory_space<vmem>>, %arg5: memref<4x128xf32, #tpu.memory_space<vmem>>) attributes {dimension_semantics = [], scalar_prefetch = 0 : i64, scratch_operands = 1 : i64, tpu.core_type = #tpu.core_type<tc>} {
    %c0 = arith.constant 0 : index
    %c0_0 = arith.constant 0 : index
    %0 = vector.load %arg1[%c0, %c0_0] : memref<456x128xf32, #tpu.memory_space<vmem>>, vector<8x128xf32>
    %c8 = arith.constant 8 : index
    %c0_1 = arith.constant 0 : index
    %1 = vector.load %arg1[%c8, %c0_1] : memref<456x128xf32, #tpu.memory_space<vmem>>, vector<32x128xf32>
    %c40 = arith.constant 40 : index
    %c0_2 = arith.constant 0 : index
    %2 = vector.load %arg1[%c40, %c0_2] : memref<456x128xf32, #tpu.memory_space<vmem>>, vector<1x128xf32>
    %c48 = arith.constant 48 : index
    %c0_3 = arith.constant 0 : index
    %3 = vector.load %arg1[%c48, %c0_3] : memref<456x128xf32, #tpu.memory_space<vmem>>, vector<32x64xf32>
    %c80 = arith.constant 80 : index
    %c0_4 = arith.constant 0 : index
    %4 = vector.load %arg1[%c80, %c0_4] : memref<456x128xf32, #tpu.memory_space<vmem>>, vector<16x64xf32>
    %c96 = arith.constant 96 : index
    %c0_5 = arith.constant 0 : index
    %5 = vector.load %arg1[%c96, %c0_5] : memref<456x128xf32, #tpu.memory_space<vmem>>, vector<1x64xf32>
    %c0_6 = arith.constant 0 : index
    %c0_7 = arith.constant 0 : index
    %6 = vector.load %arg0[%c0_6, %c0_7] : memref<32x8xf32, #tpu.memory_space<vmem>>, vector<32x8xf32>
    %cst = arith.constant dense<0.000000e+00> : vector<32x128xf32>
    %7 = tpu.matmul %6, %0, %cst {dimension_numbers = #tpu.dot_dimension_numbers<[1], [0], [0], [1], [0, 0, 1, 1], [], []>} : vector<32x8xf32>, vector<8x128xf32>, vector<32x128xf32> -> vector<32x128xf32>
    %8 = vector.broadcast %2 : vector<1x128xf32> to vector<32x128xf32>
    %9 = arith.addf %7, %8 : vector<32x128xf32>
    %cst_8 = arith.constant 0.000000e+00 : f32
    %10 = vector.broadcast %cst_8 : f32 to vector<4x32xf32>
    %cst_9 = arith.constant 0.000000e+00 : f32
    %11 = vector.broadcast %cst_9 : f32 to vector<4x32xf32>
    %12 = vector.extract_strided_slice %9 {offsets = [0, 0], sizes = [4, 128], strides = [1, 1]} : vector<32x128xf32> to vector<4x128xf32>
    %cst_10 = arith.constant dense<0.000000e+00> : vector<4x128xf32>
    %13 = tpu.matmul %10, %1, %cst_10 {dimension_numbers = #tpu.dot_dimension_numbers<[1], [0], [0], [1], [0, 0, 1, 1], [], []>} : vector<4x32xf32>, vector<32x128xf32>, vector<4x128xf32> -> vector<4x128xf32>
    %14 = arith.addf %12, %13 : vector<4x128xf32>
    %15 = arith.negf %14 : vector<4x128xf32>
    %16 = math.exp %15 : vector<4x128xf32>
    %cst_11 = arith.constant 1.000000e+00 : f32
    %17 = vector.broadcast %cst_11 : f32 to vector<4x128xf32>
    %18 = arith.addf %17, %16 : vector<4x128xf32>
    %19 = arith.divf %17, %18 : vector<4x128xf32>
    %20 = math.tanh %14 : vector<4x128xf32>
    %21 = vector.extract_strided_slice %19 {offsets = [0, 0], sizes = [4, 32], strides = [1, 1]} : vector<4x128xf32> to vector<4x32xf32>
    %22 = vector.extract_strided_slice %19 {offsets = [0, 32], sizes = [4, 32], strides = [1, 1]} : vector<4x128xf32> to vector<4x32xf32>
    %23 = vector.extract_strided_slice %20 {offsets = [0, 64], sizes = [4, 32], strides = [1, 1]} : vector<4x128xf32> to vector<4x32xf32>
    %24 = vector.extract_strided_slice %19 {offsets = [0, 96], sizes = [4, 32], strides = [1, 1]} : vector<4x128xf32> to vector<4x32xf32>
    %25 = arith.mulf %22, %11 : vector<4x32xf32>
    %26 = arith.mulf %21, %23 : vector<4x32xf32>
    %27 = arith.addf %25, %26 : vector<4x32xf32>
    %28 = math.tanh %27 : vector<4x32xf32>
    %29 = arith.mulf %24, %28 : vector<4x32xf32>
    %cst_12 = arith.constant 0.000000e+00 : f32
    %30 = vector.broadcast %cst_12 : f32 to vector<4x32xf32>
    %31 = arith.maximumf %29, %30 : vector<4x32xf32>
    %cst_13 = arith.constant dense<0.000000e+00> : vector<4x64xf32>
    %32 = tpu.matmul %31, %3, %cst_13 {dimension_numbers = #tpu.dot_dimension_numbers<[1], [0], [0], [1], [0, 0, 1, 1], [], []>} : vector<4x32xf32>, vector<32x64xf32>, vector<4x64xf32> -> vector<4x64xf32>
    %33 = vector.broadcast %5 : vector<1x64xf32> to vector<4x64xf32>
    %34 = arith.addf %32, %33 : vector<4x64xf32>
    %35 = vector.extract_strided_slice %9 {offsets = [4, 0], sizes = [4, 128], strides = [1, 1]} : vector<32x128xf32> to vector<4x128xf32>
    %cst_14 = arith.constant dense<0.000000e+00> : vector<4x128xf32>
    %36 = tpu.matmul %29, %1, %cst_14 {dimension_numbers = #tpu.dot_dimension_numbers<[1], [0], [0], [1], [0, 0, 1, 1], [], []>} : vector<4x32xf32>, vector<32x128xf32>, vector<4x128xf32> -> vector<4x128xf32>
    %37 = arith.addf %35, %36 : vector<4x128xf32>
    %38 = arith.negf %37 : vector<4x128xf32>
    %39 = math.exp %38 : vector<4x128xf32>
    %cst_15 = arith.constant 1.000000e+00 : f32
    %40 = vector.broadcast %cst_15 : f32 to vector<4x128xf32>
    %41 = arith.addf %40, %39 : vector<4x128xf32>
    %42 = arith.divf %40, %41 : vector<4x128xf32>
    %43 = math.tanh %37 : vector<4x128xf32>
    %44 = vector.extract_strided_slice %42 {offsets = [0, 0], sizes = [4, 32], strides = [1, 1]} : vector<4x128xf32> to vector<4x32xf32>
    %45 = vector.extract_strided_slice %42 {offsets = [0, 32], sizes = [4, 32], strides = [1, 1]} : vector<4x128xf32> to vector<4x32xf32>
    %46 = vector.extract_strided_slice %43 {offsets = [0, 64], sizes = [4, 32], strides = [1, 1]} : vector<4x128xf32> to vector<4x32xf32>
    %47 = vector.extract_strided_slice %42 {offsets = [0, 96], sizes = [4, 32], strides = [1, 1]} : vector<4x128xf32> to vector<4x32xf32>
    %48 = arith.mulf %45, %27 : vector<4x32xf32>
    %49 = arith.mulf %44, %46 : vector<4x32xf32>
    %50 = arith.addf %48, %49 : vector<4x32xf32>
    %51 = math.tanh %50 : vector<4x32xf32>
    %52 = arith.mulf %47, %51 : vector<4x32xf32>
    %cst_16 = arith.constant 0.000000e+00 : f32
    %53 = vector.broadcast %cst_16 : f32 to vector<4x32xf32>
    %54 = arith.maximumf %52, %53 : vector<4x32xf32>
    %cst_17 = arith.constant dense<0.000000e+00> : vector<4x64xf32>
    %55 = tpu.matmul %54, %3, %cst_17 {dimension_numbers = #tpu.dot_dimension_numbers<[1], [0], [0], [1], [0, 0, 1, 1], [], []>} : vector<4x32xf32>, vector<32x64xf32>, vector<4x64xf32> -> vector<4x64xf32>
    %56 = vector.broadcast %5 : vector<1x64xf32> to vector<4x64xf32>
    %57 = arith.addf %55, %56 : vector<4x64xf32>
    %58 = vector.extract_strided_slice %9 {offsets = [8, 0], sizes = [4, 128], strides = [1, 1]} : vector<32x128xf32> to vector<4x128xf32>
    %cst_18 = arith.constant dense<0.000000e+00> : vector<4x128xf32>
    %59 = tpu.matmul %52, %1, %cst_18 {dimension_numbers = #tpu.dot_dimension_numbers<[1], [0], [0], [1], [0, 0, 1, 1], [], []>} : vector<4x32xf32>, vector<32x128xf32>, vector<4x128xf32> -> vector<4x128xf32>
    %60 = arith.addf %58, %59 : vector<4x128xf32>
    %61 = arith.negf %60 : vector<4x128xf32>
    %62 = math.exp %61 : vector<4x128xf32>
    %cst_19 = arith.constant 1.000000e+00 : f32
    %63 = vector.broadcast %cst_19 : f32 to vector<4x128xf32>
    %64 = arith.addf %63, %62 : vector<4x128xf32>
    %65 = arith.divf %63, %64 : vector<4x128xf32>
    %66 = math.tanh %60 : vector<4x128xf32>
    %67 = vector.extract_strided_slice %65 {offsets = [0, 0], sizes = [4, 32], strides = [1, 1]} : vector<4x128xf32> to vector<4x32xf32>
    %68 = vector.extract_strided_slice %65 {offsets = [0, 32], sizes = [4, 32], strides = [1, 1]} : vector<4x128xf32> to vector<4x32xf32>
    %69 = vector.extract_strided_slice %66 {offsets = [0, 64], sizes = [4, 32], strides = [1, 1]} : vector<4x128xf32> to vector<4x32xf32>
    %70 = vector.extract_strided_slice %65 {offsets = [0, 96], sizes = [4, 32], strides = [1, 1]} : vector<4x128xf32> to vector<4x32xf32>
    %71 = arith.mulf %68, %50 : vector<4x32xf32>
    %72 = arith.mulf %67, %69 : vector<4x32xf32>
    %73 = arith.addf %71, %72 : vector<4x32xf32>
    %74 = math.tanh %73 : vector<4x32xf32>
    %75 = arith.mulf %70, %74 : vector<4x32xf32>
    %cst_20 = arith.constant 0.000000e+00 : f32
    %76 = vector.broadcast %cst_20 : f32 to vector<4x32xf32>
    %77 = arith.maximumf %75, %76 : vector<4x32xf32>
    %cst_21 = arith.constant dense<0.000000e+00> : vector<4x64xf32>
    %78 = tpu.matmul %77, %3, %cst_21 {dimension_numbers = #tpu.dot_dimension_numbers<[1], [0], [0], [1], [0, 0, 1, 1], [], []>} : vector<4x32xf32>, vector<32x64xf32>, vector<4x64xf32> -> vector<4x64xf32>
    %79 = vector.broadcast %5 : vector<1x64xf32> to vector<4x64xf32>
    %80 = arith.addf %78, %79 : vector<4x64xf32>
    %81 = vector.extract_strided_slice %9 {offsets = [12, 0], sizes = [4, 128], strides = [1, 1]} : vector<32x128xf32> to vector<4x128xf32>
    %cst_22 = arith.constant dense<0.000000e+00> : vector<4x128xf32>
    %82 = tpu.matmul %75, %1, %cst_22 {dimension_numbers = #tpu.dot_dimension_numbers<[1], [0], [0], [1], [0, 0, 1, 1], [], []>} : vector<4x32xf32>, vector<32x128xf32>, vector<4x128xf32> -> vector<4x128xf32>
    %83 = arith.addf %81, %82 : vector<4x128xf32>
    %84 = arith.negf %83 : vector<4x128xf32>
    %85 = math.exp %84 : vector<4x128xf32>
    %cst_23 = arith.constant 1.000000e+00 : f32
    %86 = vector.broadcast %cst_23 : f32 to vector<4x128xf32>
    %87 = arith.addf %86, %85 : vector<4x128xf32>
    %88 = arith.divf %86, %87 : vector<4x128xf32>
    %89 = math.tanh %83 : vector<4x128xf32>
    %90 = vector.extract_strided_slice %88 {offsets = [0, 0], sizes = [4, 32], strides = [1, 1]} : vector<4x128xf32> to vector<4x32xf32>
    %91 = vector.extract_strided_slice %88 {offsets = [0, 32], sizes = [4, 32], strides = [1, 1]} : vector<4x128xf32> to vector<4x32xf32>
    %92 = vector.extract_strided_slice %89 {offsets = [0, 64], sizes = [4, 32], strides = [1, 1]} : vector<4x128xf32> to vector<4x32xf32>
    %93 = vector.extract_strided_slice %88 {offsets = [0, 96], sizes = [4, 32], strides = [1, 1]} : vector<4x128xf32> to vector<4x32xf32>
    %94 = arith.mulf %91, %73 : vector<4x32xf32>
    %95 = arith.mulf %90, %92 : vector<4x32xf32>
    %96 = arith.addf %94, %95 : vector<4x32xf32>
    %97 = math.tanh %96 : vector<4x32xf32>
    %98 = arith.mulf %93, %97 : vector<4x32xf32>
    %cst_24 = arith.constant 0.000000e+00 : f32
    %99 = vector.broadcast %cst_24 : f32 to vector<4x32xf32>
    %100 = arith.maximumf %98, %99 : vector<4x32xf32>
    %cst_25 = arith.constant dense<0.000000e+00> : vector<4x64xf32>
    %101 = tpu.matmul %100, %3, %cst_25 {dimension_numbers = #tpu.dot_dimension_numbers<[1], [0], [0], [1], [0, 0, 1, 1], [], []>} : vector<4x32xf32>, vector<32x64xf32>, vector<4x64xf32> -> vector<4x64xf32>
    %102 = vector.broadcast %5 : vector<1x64xf32> to vector<4x64xf32>
    %103 = arith.addf %101, %102 : vector<4x64xf32>
    %104 = vector.extract_strided_slice %9 {offsets = [16, 0], sizes = [4, 128], strides = [1, 1]} : vector<32x128xf32> to vector<4x128xf32>
    %cst_26 = arith.constant dense<0.000000e+00> : vector<4x128xf32>
    %105 = tpu.matmul %98, %1, %cst_26 {dimension_numbers = #tpu.dot_dimension_numbers<[1], [0], [0], [1], [0, 0, 1, 1], [], []>} : vector<4x32xf32>, vector<32x128xf32>, vector<4x128xf32> -> vector<4x128xf32>
    %106 = arith.addf %104, %105 : vector<4x128xf32>
    %107 = arith.negf %106 : vector<4x128xf32>
    %108 = math.exp %107 : vector<4x128xf32>
    %cst_27 = arith.constant 1.000000e+00 : f32
    %109 = vector.broadcast %cst_27 : f32 to vector<4x128xf32>
    %110 = arith.addf %109, %108 : vector<4x128xf32>
    %111 = arith.divf %109, %110 : vector<4x128xf32>
    %112 = math.tanh %106 : vector<4x128xf32>
    %113 = vector.extract_strided_slice %111 {offsets = [0, 0], sizes = [4, 32], strides = [1, 1]} : vector<4x128xf32> to vector<4x32xf32>
    %114 = vector.extract_strided_slice %111 {offsets = [0, 32], sizes = [4, 32], strides = [1, 1]} : vector<4x128xf32> to vector<4x32xf32>
    %115 = vector.extract_strided_slice %112 {offsets = [0, 64], sizes = [4, 32], strides = [1, 1]} : vector<4x128xf32> to vector<4x32xf32>
    %116 = vector.extract_strided_slice %111 {offsets = [0, 96], sizes = [4, 32], strides = [1, 1]} : vector<4x128xf32> to vector<4x32xf32>
    %117 = arith.mulf %114, %96 : vector<4x32xf32>
    %118 = arith.mulf %113, %115 : vector<4x32xf32>
    %119 = arith.addf %117, %118 : vector<4x32xf32>
    %120 = math.tanh %119 : vector<4x32xf32>
    %121 = arith.mulf %116, %120 : vector<4x32xf32>
    %cst_28 = arith.constant 0.000000e+00 : f32
    %122 = vector.broadcast %cst_28 : f32 to vector<4x32xf32>
    %123 = arith.maximumf %121, %122 : vector<4x32xf32>
    %cst_29 = arith.constant dense<0.000000e+00> : vector<4x64xf32>
    %124 = tpu.matmul %123, %3, %cst_29 {dimension_numbers = #tpu.dot_dimension_numbers<[1], [0], [0], [1], [0, 0, 1, 1], [], []>} : vector<4x32xf32>, vector<32x64xf32>, vector<4x64xf32> -> vector<4x64xf32>
    %125 = vector.broadcast %5 : vector<1x64xf32> to vector<4x64xf32>
    %126 = arith.addf %124, %125 : vector<4x64xf32>
    %127 = vector.extract_strided_slice %9 {offsets = [20, 0], sizes = [4, 128], strides = [1, 1]} : vector<32x128xf32> to vector<4x128xf32>
    %cst_30 = arith.constant dense<0.000000e+00> : vector<4x128xf32>
    %128 = tpu.matmul %121, %1, %cst_30 {dimension_numbers = #tpu.dot_dimension_numbers<[1], [0], [0], [1], [0, 0, 1, 1], [], []>} : vector<4x32xf32>, vector<32x128xf32>, vector<4x128xf32> -> vector<4x128xf32>
    %129 = arith.addf %127, %128 : vector<4x128xf32>
    %130 = arith.negf %129 : vector<4x128xf32>
    %131 = math.exp %130 : vector<4x128xf32>
    %cst_31 = arith.constant 1.000000e+00 : f32
    %132 = vector.broadcast %cst_31 : f32 to vector<4x128xf32>
    %133 = arith.addf %132, %131 : vector<4x128xf32>
    %134 = arith.divf %132, %133 : vector<4x128xf32>
    %135 = math.tanh %129 : vector<4x128xf32>
    %136 = vector.extract_strided_slice %134 {offsets = [0, 0], sizes = [4, 32], strides = [1, 1]} : vector<4x128xf32> to vector<4x32xf32>
    %137 = vector.extract_strided_slice %134 {offsets = [0, 32], sizes = [4, 32], strides = [1, 1]} : vector<4x128xf32> to vector<4x32xf32>
    %138 = vector.extract_strided_slice %135 {offsets = [0, 64], sizes = [4, 32], strides = [1, 1]} : vector<4x128xf32> to vector<4x32xf32>
    %139 = vector.extract_strided_slice %134 {offsets = [0, 96], sizes = [4, 32], strides = [1, 1]} : vector<4x128xf32> to vector<4x32xf32>
    %140 = arith.mulf %137, %119 : vector<4x32xf32>
    %141 = arith.mulf %136, %138 : vector<4x32xf32>
    %142 = arith.addf %140, %141 : vector<4x32xf32>
    %143 = math.tanh %142 : vector<4x32xf32>
    %144 = arith.mulf %139, %143 : vector<4x32xf32>
    %cst_32 = arith.constant 0.000000e+00 : f32
    %145 = vector.broadcast %cst_32 : f32 to vector<4x32xf32>
    %146 = arith.maximumf %144, %145 : vector<4x32xf32>
    %cst_33 = arith.constant dense<0.000000e+00> : vector<4x64xf32>
    %147 = tpu.matmul %146, %3, %cst_33 {dimension_numbers = #tpu.dot_dimension_numbers<[1], [0], [0], [1], [0, 0, 1, 1], [], []>} : vector<4x32xf32>, vector<32x64xf32>, vector<4x64xf32> -> vector<4x64xf32>
    %148 = vector.broadcast %5 : vector<1x64xf32> to vector<4x64xf32>
    %149 = arith.addf %147, %148 : vector<4x64xf32>
    %150 = vector.extract_strided_slice %9 {offsets = [24, 0], sizes = [4, 128], strides = [1, 1]} : vector<32x128xf32> to vector<4x128xf32>
    %cst_34 = arith.constant dense<0.000000e+00> : vector<4x128xf32>
    %151 = tpu.matmul %144, %1, %cst_34 {dimension_numbers = #tpu.dot_dimension_numbers<[1], [0], [0], [1], [0, 0, 1, 1], [], []>} : vector<4x32xf32>, vector<32x128xf32>, vector<4x128xf32> -> vector<4x128xf32>
    %152 = arith.addf %150, %151 : vector<4x128xf32>
    %153 = arith.negf %152 : vector<4x128xf32>
    %154 = math.exp %153 : vector<4x128xf32>
    %cst_35 = arith.constant 1.000000e+00 : f32
    %155 = vector.broadcast %cst_35 : f32 to vector<4x128xf32>
    %156 = arith.addf %155, %154 : vector<4x128xf32>
    %157 = arith.divf %155, %156 : vector<4x128xf32>
    %158 = math.tanh %152 : vector<4x128xf32>
    %159 = vector.extract_strided_slice %157 {offsets = [0, 0], sizes = [4, 32], strides = [1, 1]} : vector<4x128xf32> to vector<4x32xf32>
    %160 = vector.extract_strided_slice %157 {offsets = [0, 32], sizes = [4, 32], strides = [1, 1]} : vector<4x128xf32> to vector<4x32xf32>
    %161 = vector.extract_strided_slice %158 {offsets = [0, 64], sizes = [4, 32], strides = [1, 1]} : vector<4x128xf32> to vector<4x32xf32>
    %162 = vector.extract_strided_slice %157 {offsets = [0, 96], sizes = [4, 32], strides = [1, 1]} : vector<4x128xf32> to vector<4x32xf32>
    %163 = arith.mulf %160, %142 : vector<4x32xf32>
    %164 = arith.mulf %159, %161 : vector<4x32xf32>
    %165 = arith.addf %163, %164 : vector<4x32xf32>
    %166 = math.tanh %165 : vector<4x32xf32>
    %167 = arith.mulf %162, %166 : vector<4x32xf32>
    %cst_36 = arith.constant 0.000000e+00 : f32
    %168 = vector.broadcast %cst_36 : f32 to vector<4x32xf32>
    %169 = arith.maximumf %167, %168 : vector<4x32xf32>
    %cst_37 = arith.constant dense<0.000000e+00> : vector<4x64xf32>
    %170 = tpu.matmul %169, %3, %cst_37 {dimension_numbers = #tpu.dot_dimension_numbers<[1], [0], [0], [1], [0, 0, 1, 1], [], []>} : vector<4x32xf32>, vector<32x64xf32>, vector<4x64xf32> -> vector<4x64xf32>
    %171 = vector.broadcast %5 : vector<1x64xf32> to vector<4x64xf32>
    %172 = arith.addf %170, %171 : vector<4x64xf32>
    %173 = vector.extract_strided_slice %9 {offsets = [28, 0], sizes = [4, 128], strides = [1, 1]} : vector<32x128xf32> to vector<4x128xf32>
    %cst_38 = arith.constant dense<0.000000e+00> : vector<4x128xf32>
    %174 = tpu.matmul %167, %1, %cst_38 {dimension_numbers = #tpu.dot_dimension_numbers<[1], [0], [0], [1], [0, 0, 1, 1], [], []>} : vector<4x32xf32>, vector<32x128xf32>, vector<4x128xf32> -> vector<4x128xf32>
    %175 = arith.addf %173, %174 : vector<4x128xf32>
    %176 = arith.negf %175 : vector<4x128xf32>
    %177 = math.exp %176 : vector<4x128xf32>
    %cst_39 = arith.constant 1.000000e+00 : f32
    %178 = vector.broadcast %cst_39 : f32 to vector<4x128xf32>
    %179 = arith.addf %178, %177 : vector<4x128xf32>
    %180 = arith.divf %178, %179 : vector<4x128xf32>
    %181 = math.tanh %175 : vector<4x128xf32>
    %182 = vector.extract_strided_slice %180 {offsets = [0, 0], sizes = [4, 32], strides = [1, 1]} : vector<4x128xf32> to vector<4x32xf32>
    %183 = vector.extract_strided_slice %180 {offsets = [0, 32], sizes = [4, 32], strides = [1, 1]} : vector<4x128xf32> to vector<4x32xf32>
    %184 = vector.extract_strided_slice %181 {offsets = [0, 64], sizes = [4, 32], strides = [1, 1]} : vector<4x128xf32> to vector<4x32xf32>
    %185 = vector.extract_strided_slice %180 {offsets = [0, 96], sizes = [4, 32], strides = [1, 1]} : vector<4x128xf32> to vector<4x32xf32>
    %186 = arith.mulf %183, %165 : vector<4x32xf32>
    %187 = arith.mulf %182, %184 : vector<4x32xf32>
    %188 = arith.addf %186, %187 : vector<4x32xf32>
    %189 = math.tanh %188 : vector<4x32xf32>
    %190 = arith.mulf %185, %189 : vector<4x32xf32>
    %cst_40 = arith.constant 0.000000e+00 : f32
    %191 = vector.broadcast %cst_40 : f32 to vector<4x32xf32>
    %192 = arith.maximumf %190, %191 : vector<4x32xf32>
    %cst_41 = arith.constant dense<0.000000e+00> : vector<4x64xf32>
    %193 = tpu.matmul %192, %3, %cst_41 {dimension_numbers = #tpu.dot_dimension_numbers<[1], [0], [0], [1], [0, 0, 1, 1], [], []>} : vector<4x32xf32>, vector<32x64xf32>, vector<4x64xf32> -> vector<4x64xf32>
    %194 = vector.broadcast %5 : vector<1x64xf32> to vector<4x64xf32>
    %195 = arith.addf %193, %194 : vector<4x64xf32>
    %cst_42 = arith.constant 0.000000e+00 : f32
    %196 = vector.broadcast %cst_42 : f32 to vector<4x16xf32>
    %cst_43 = arith.constant 0.000000e+00 : f32
    %197 = vector.broadcast %cst_43 : f32 to vector<4x16xf32>
    %cst_44 = arith.constant dense<0.000000e+00> : vector<4x64xf32>
    %198 = tpu.matmul %196, %4, %cst_44 {dimension_numbers = #tpu.dot_dimension_numbers<[1], [0], [0], [1], [0, 0, 1, 1], [], []>} : vector<4x16xf32>, vector<16x64xf32>, vector<4x64xf32> -> vector<4x64xf32>
    %199 = arith.addf %34, %198 : vector<4x64xf32>
    %200 = arith.negf %199 : vector<4x64xf32>
    %201 = math.exp %200 : vector<4x64xf32>
    %cst_45 = arith.constant 1.000000e+00 : f32
    %202 = vector.broadcast %cst_45 : f32 to vector<4x64xf32>
    %203 = arith.addf %202, %201 : vector<4x64xf32>
    %204 = arith.divf %202, %203 : vector<4x64xf32>
    %205 = math.tanh %199 : vector<4x64xf32>
    %206 = vector.extract_strided_slice %204 {offsets = [0, 0], sizes = [4, 16], strides = [1, 1]} : vector<4x64xf32> to vector<4x16xf32>
    %207 = vector.extract_strided_slice %204 {offsets = [0, 16], sizes = [4, 16], strides = [1, 1]} : vector<4x64xf32> to vector<4x16xf32>
    %208 = vector.extract_strided_slice %205 {offsets = [0, 32], sizes = [4, 16], strides = [1, 1]} : vector<4x64xf32> to vector<4x16xf32>
    %209 = vector.extract_strided_slice %204 {offsets = [0, 48], sizes = [4, 16], strides = [1, 1]} : vector<4x64xf32> to vector<4x16xf32>
    %210 = arith.mulf %207, %197 : vector<4x16xf32>
    %211 = arith.mulf %206, %208 : vector<4x16xf32>
    %212 = arith.addf %210, %211 : vector<4x16xf32>
    %213 = math.tanh %212 : vector<4x16xf32>
    %214 = arith.mulf %209, %213 : vector<4x16xf32>
    %c0_46 = arith.constant 0 : index
    %c0_47 = arith.constant 0 : index
    %215 = vector.load %arg5[%c0_46, %c0_47] : memref<4x128xf32, #tpu.memory_space<vmem>>, vector<4x16xf32>
    tpu.vector_store %arg5[%c0_46, %c0_47], %214 {strides = array<i32>} : memref<4x128xf32, #tpu.memory_space<vmem>>, vector<4x16xf32>,
    %cst_48 = arith.constant dense<0.000000e+00> : vector<4x64xf32>
    %216 = tpu.matmul %214, %4, %cst_48 {dimension_numbers = #tpu.dot_dimension_numbers<[1], [0], [0], [1], [0, 0, 1, 1], [], []>} : vector<4x16xf32>, vector<16x64xf32>, vector<4x64xf32> -> vector<4x64xf32>
    %217 = arith.addf %57, %216 : vector<4x64xf32>
    %218 = arith.negf %217 : vector<4x64xf32>
    %219 = math.exp %218 : vector<4x64xf32>
    %cst_49 = arith.constant 1.000000e+00 : f32
    %220 = vector.broadcast %cst_49 : f32 to vector<4x64xf32>
    %221 = arith.addf %220, %219 : vector<4x64xf32>
    %222 = arith.divf %220, %221 : vector<4x64xf32>
    %223 = math.tanh %217 : vector<4x64xf32>
    %224 = vector.extract_strided_slice %222 {offsets = [0, 0], sizes = [4, 16], strides = [1, 1]} : vector<4x64xf32> to vector<4x16xf32>
    %225 = vector.extract_strided_slice %222 {offsets = [0, 16], sizes = [4, 16], strides = [1, 1]} : vector<4x64xf32> to vector<4x16xf32>
    %226 = vector.extract_strided_slice %223 {offsets = [0, 32], sizes = [4, 16], strides = [1, 1]} : vector<4x64xf32> to vector<4x16xf32>
    %227 = vector.extract_strided_slice %222 {offsets = [0, 48], sizes = [4, 16], strides = [1, 1]} : vector<4x64xf32> to vector<4x16xf32>
    %228 = arith.mulf %225, %212 : vector<4x16xf32>
    %229 = arith.mulf %224, %226 : vector<4x16xf32>
    %230 = arith.addf %228, %229 : vector<4x16xf32>
    %231 = math.tanh %230 : vector<4x16xf32>
    %232 = arith.mulf %227, %231 : vector<4x16xf32>
    %c0_50 = arith.constant 0 : index
    %c16 = arith.constant 16 : index
    %233 = vector.load %arg5[%c0_50, %c16] : memref<4x128xf32, #tpu.memory_space<vmem>>, vector<4x16xf32>
    tpu.vector_store %arg5[%c0_50, %c16], %232 {strides = array<i32>} : memref<4x128xf32, #tpu.memory_space<vmem>>, vector<4x16xf32>,
    %cst_51 = arith.constant dense<0.000000e+00> : vector<4x64xf32>
    %234 = tpu.matmul %232, %4, %cst_51 {dimension_numbers = #tpu.dot_dimension_numbers<[1], [0], [0], [1], [0, 0, 1, 1], [], []>} : vector<4x16xf32>, vector<16x64xf32>, vector<4x64xf32> -> vector<4x64xf32>
    %235 = arith.addf %80, %234 : vector<4x64xf32>
    %236 = arith.negf %235 : vector<4x64xf32>
    %237 = math.exp %236 : vector<4x64xf32>
    %cst_52 = arith.constant 1.000000e+00 : f32
    %238 = vector.broadcast %cst_52 : f32 to vector<4x64xf32>
    %239 = arith.addf %238, %237 : vector<4x64xf32>
    %240 = arith.divf %238, %239 : vector<4x64xf32>
    %241 = math.tanh %235 : vector<4x64xf32>
    %242 = vector.extract_strided_slice %240 {offsets = [0, 0], sizes = [4, 16], strides = [1, 1]} : vector<4x64xf32> to vector<4x16xf32>
    %243 = vector.extract_strided_slice %240 {offsets = [0, 16], sizes = [4, 16], strides = [1, 1]} : vector<4x64xf32> to vector<4x16xf32>
    %244 = vector.extract_strided_slice %241 {offsets = [0, 32], sizes = [4, 16], strides = [1, 1]} : vector<4x64xf32> to vector<4x16xf32>
    %245 = vector.extract_strided_slice %240 {offsets = [0, 48], sizes = [4, 16], strides = [1, 1]} : vector<4x64xf32> to vector<4x16xf32>
    %246 = arith.mulf %243, %230 : vector<4x16xf32>
    %247 = arith.mulf %242, %244 : vector<4x16xf32>
    %248 = arith.addf %246, %247 : vector<4x16xf32>
    %249 = math.tanh %248 : vector<4x16xf32>
    %250 = arith.mulf %245, %249 : vector<4x16xf32>
    %c0_53 = arith.constant 0 : index
    %c32 = arith.constant 32 : index
    %251 = vector.load %arg5[%c0_53, %c32] : memref<4x128xf32, #tpu.memory_space<vmem>>, vector<4x16xf32>
    tpu.vector_store %arg5[%c0_53, %c32], %250 {strides = array<i32>} : memref<4x128xf32, #tpu.memory_space<vmem>>, vector<4x16xf32>,
    %cst_54 = arith.constant dense<0.000000e+00> : vector<4x64xf32>
    %252 = tpu.matmul %250, %4, %cst_54 {dimension_numbers = #tpu.dot_dimension_numbers<[1], [0], [0], [1], [0, 0, 1, 1], [], []>} : vector<4x16xf32>, vector<16x64xf32>, vector<4x64xf32> -> vector<4x64xf32>
    %253 = arith.addf %103, %252 : vector<4x64xf32>
    %254 = arith.negf %253 : vector<4x64xf32>
    %255 = math.exp %254 : vector<4x64xf32>
    %cst_55 = arith.constant 1.000000e+00 : f32
    %256 = vector.broadcast %cst_55 : f32 to vector<4x64xf32>
    %257 = arith.addf %256, %255 : vector<4x64xf32>
    %258 = arith.divf %256, %257 : vector<4x64xf32>
    %259 = math.tanh %253 : vector<4x64xf32>
    %260 = vector.extract_strided_slice %258 {offsets = [0, 0], sizes = [4, 16], strides = [1, 1]} : vector<4x64xf32> to vector<4x16xf32>
    %261 = vector.extract_strided_slice %258 {offsets = [0, 16], sizes = [4, 16], strides = [1, 1]} : vector<4x64xf32> to vector<4x16xf32>
    %262 = vector.extract_strided_slice %259 {offsets = [0, 32], sizes = [4, 16], strides = [1, 1]} : vector<4x64xf32> to vector<4x16xf32>
    %263 = vector.extract_strided_slice %258 {offsets = [0, 48], sizes = [4, 16], strides = [1, 1]} : vector<4x64xf32> to vector<4x16xf32>
    %264 = arith.mulf %261, %248 : vector<4x16xf32>
    %265 = arith.mulf %260, %262 : vector<4x16xf32>
    %266 = arith.addf %264, %265 : vector<4x16xf32>
    %267 = math.tanh %266 : vector<4x16xf32>
    %268 = arith.mulf %263, %267 : vector<4x16xf32>
    %c0_56 = arith.constant 0 : index
    %c48_57 = arith.constant 48 : index
    %269 = vector.load %arg5[%c0_56, %c48_57] : memref<4x128xf32, #tpu.memory_space<vmem>>, vector<4x16xf32>
    tpu.vector_store %arg5[%c0_56, %c48_57], %268 {strides = array<i32>} : memref<4x128xf32, #tpu.memory_space<vmem>>, vector<4x16xf32>,
    %cst_58 = arith.constant dense<0.000000e+00> : vector<4x64xf32>
    %270 = tpu.matmul %268, %4, %cst_58 {dimension_numbers = #tpu.dot_dimension_numbers<[1], [0], [0], [1], [0, 0, 1, 1], [], []>} : vector<4x16xf32>, vector<16x64xf32>, vector<4x64xf32> -> vector<4x64xf32>
    %271 = arith.addf %126, %270 : vector<4x64xf32>
    %272 = arith.negf %271 : vector<4x64xf32>
    %273 = math.exp %272 : vector<4x64xf32>
    %cst_59 = arith.constant 1.000000e+00 : f32
    %274 = vector.broadcast %cst_59 : f32 to vector<4x64xf32>
    %275 = arith.addf %274, %273 : vector<4x64xf32>
    %276 = arith.divf %274, %275 : vector<4x64xf32>
    %277 = math.tanh %271 : vector<4x64xf32>
    %278 = vector.extract_strided_slice %276 {offsets = [0, 0], sizes = [4, 16], strides = [1, 1]} : vector<4x64xf32> to vector<4x16xf32>
    %279 = vector.extract_strided_slice %276 {offsets = [0, 16], sizes = [4, 16], strides = [1, 1]} : vector<4x64xf32> to vector<4x16xf32>
    %280 = vector.extract_strided_slice %277 {offsets = [0, 32], sizes = [4, 16], strides = [1, 1]} : vector<4x64xf32> to vector<4x16xf32>
    %281 = vector.extract_strided_slice %276 {offsets = [0, 48], sizes = [4, 16], strides = [1, 1]} : vector<4x64xf32> to vector<4x16xf32>
    %282 = arith.mulf %279, %266 : vector<4x16xf32>
    %283 = arith.mulf %278, %280 : vector<4x16xf32>
    %284 = arith.addf %282, %283 : vector<4x16xf32>
    %285 = math.tanh %284 : vector<4x16xf32>
    %286 = arith.mulf %281, %285 : vector<4x16xf32>
    %c0_60 = arith.constant 0 : index
    %c64 = arith.constant 64 : index
    %287 = vector.load %arg5[%c0_60, %c64] : memref<4x128xf32, #tpu.memory_space<vmem>>, vector<4x16xf32>
    tpu.vector_store %arg5[%c0_60, %c64], %286 {strides = array<i32>} : memref<4x128xf32, #tpu.memory_space<vmem>>, vector<4x16xf32>,
    %cst_61 = arith.constant dense<0.000000e+00> : vector<4x64xf32>
    %288 = tpu.matmul %286, %4, %cst_61 {dimension_numbers = #tpu.dot_dimension_numbers<[1], [0], [0], [1], [0, 0, 1, 1], [], []>} : vector<4x16xf32>, vector<16x64xf32>, vector<4x64xf32> -> vector<4x64xf32>
    %289 = arith.addf %149, %288 : vector<4x64xf32>
    %290 = arith.negf %289 : vector<4x64xf32>
    %291 = math.exp %290 : vector<4x64xf32>
    %cst_62 = arith.constant 1.000000e+00 : f32
    %292 = vector.broadcast %cst_62 : f32 to vector<4x64xf32>
    %293 = arith.addf %292, %291 : vector<4x64xf32>
    %294 = arith.divf %292, %293 : vector<4x64xf32>
    %295 = math.tanh %289 : vector<4x64xf32>
    %296 = vector.extract_strided_slice %294 {offsets = [0, 0], sizes = [4, 16], strides = [1, 1]} : vector<4x64xf32> to vector<4x16xf32>
    %297 = vector.extract_strided_slice %294 {offsets = [0, 16], sizes = [4, 16], strides = [1, 1]} : vector<4x64xf32> to vector<4x16xf32>
    %298 = vector.extract_strided_slice %295 {offsets = [0, 32], sizes = [4, 16], strides = [1, 1]} : vector<4x64xf32> to vector<4x16xf32>
    %299 = vector.extract_strided_slice %294 {offsets = [0, 48], sizes = [4, 16], strides = [1, 1]} : vector<4x64xf32> to vector<4x16xf32>
    %300 = arith.mulf %297, %284 : vector<4x16xf32>
    %301 = arith.mulf %296, %298 : vector<4x16xf32>
    %302 = arith.addf %300, %301 : vector<4x16xf32>
    %303 = math.tanh %302 : vector<4x16xf32>
    %304 = arith.mulf %299, %303 : vector<4x16xf32>
    %c0_63 = arith.constant 0 : index
    %c80_64 = arith.constant 80 : index
    %305 = vector.load %arg5[%c0_63, %c80_64] : memref<4x128xf32, #tpu.memory_space<vmem>>, vector<4x16xf32>
    tpu.vector_store %arg5[%c0_63, %c80_64], %304 {strides = array<i32>} : memref<4x128xf32, #tpu.memory_space<vmem>>, vector<4x16xf32>,
    %cst_65 = arith.constant dense<0.000000e+00> : vector<4x64xf32>
    %306 = tpu.matmul %304, %4, %cst_65 {dimension_numbers = #tpu.dot_dimension_numbers<[1], [0], [0], [1], [0, 0, 1, 1], [], []>} : vector<4x16xf32>, vector<16x64xf32>, vector<4x64xf32> -> vector<4x64xf32>
    %307 = arith.addf %172, %306 : vector<4x64xf32>
    %308 = arith.negf %307 : vector<4x64xf32>
    %309 = math.exp %308 : vector<4x64xf32>
    %cst_66 = arith.constant 1.000000e+00 : f32
    %310 = vector.broadcast %cst_66 : f32 to vector<4x64xf32>
    %311 = arith.addf %310, %309 : vector<4x64xf32>
    %312 = arith.divf %310, %311 : vector<4x64xf32>
    %313 = math.tanh %307 : vector<4x64xf32>
    %314 = vector.extract_strided_slice %312 {offsets = [0, 0], sizes = [4, 16], strides = [1, 1]} : vector<4x64xf32> to vector<4x16xf32>
    %315 = vector.extract_strided_slice %312 {offsets = [0, 16], sizes = [4, 16], strides = [1, 1]} : vector<4x64xf32> to vector<4x16xf32>
    %316 = vector.extract_strided_slice %313 {offsets = [0, 32], sizes = [4, 16], strides = [1, 1]} : vector<4x64xf32> to vector<4x16xf32>
    %317 = vector.extract_strided_slice %312 {offsets = [0, 48], sizes = [4, 16], strides = [1, 1]} : vector<4x64xf32> to vector<4x16xf32>
    %318 = arith.mulf %315, %302 : vector<4x16xf32>
    %319 = arith.mulf %314, %316 : vector<4x16xf32>
    %320 = arith.addf %318, %319 : vector<4x16xf32>
    %321 = math.tanh %320 : vector<4x16xf32>
    %322 = arith.mulf %317, %321 : vector<4x16xf32>
    %c0_67 = arith.constant 0 : index
    %c96_68 = arith.constant 96 : index
    %323 = vector.load %arg5[%c0_67, %c96_68] : memref<4x128xf32, #tpu.memory_space<vmem>>, vector<4x16xf32>
    tpu.vector_store %arg5[%c0_67, %c96_68], %322 {strides = array<i32>} : memref<4x128xf32, #tpu.memory_space<vmem>>, vector<4x16xf32>,
    %cst_69 = arith.constant dense<0.000000e+00> : vector<4x64xf32>
    %324 = tpu.matmul %322, %4, %cst_69 {dimension_numbers = #tpu.dot_dimension_numbers<[1], [0], [0], [1], [0, 0, 1, 1], [], []>} : vector<4x16xf32>, vector<16x64xf32>, vector<4x64xf32> -> vector<4x64xf32>
    %325 = arith.addf %195, %324 : vector<4x64xf32>
    %326 = arith.negf %325 : vector<4x64xf32>
    %327 = math.exp %326 : vector<4x64xf32>
    %cst_70 = arith.constant 1.000000e+00 : f32
    %328 = vector.broadcast %cst_70 : f32 to vector<4x64xf32>
    %329 = arith.addf %328, %327 : vector<4x64xf32>
    %330 = arith.divf %328, %329 : vector<4x64xf32>
    %331 = math.tanh %325 : vector<4x64xf32>
    %332 = vector.extract_strided_slice %330 {offsets = [0, 0], sizes = [4, 16], strides = [1, 1]} : vector<4x64xf32> to vector<4x16xf32>
    %333 = vector.extract_strided_slice %330 {offsets = [0, 16], sizes = [4, 16], strides = [1, 1]} : vector<4x64xf32> to vector<4x16xf32>
    %334 = vector.extract_strided_slice %331 {offsets = [0, 32], sizes = [4, 16], strides = [1, 1]} : vector<4x64xf32> to vector<4x16xf32>
    %335 = vector.extract_strided_slice %330 {offsets = [0, 48], sizes = [4, 16], strides = [1, 1]} : vector<4x64xf32> to vector<4x16xf32>
    %336 = arith.mulf %333, %320 : vector<4x16xf32>
    %337 = arith.mulf %332, %334 : vector<4x16xf32>
    %338 = arith.addf %336, %337 : vector<4x16xf32>
    %339 = math.tanh %338 : vector<4x16xf32>
    %340 = arith.mulf %335, %339 : vector<4x16xf32>
    %c0_71 = arith.constant 0 : index
    %c112 = arith.constant 112 : index
    %341 = vector.load %arg5[%c0_71, %c112] : memref<4x128xf32, #tpu.memory_space<vmem>>, vector<4x16xf32>
    tpu.vector_store %arg5[%c0_71, %c112], %340 {strides = array<i32>} : memref<4x128xf32, #tpu.memory_space<vmem>>, vector<4x16xf32>,
    %c0_72 = arith.constant 0 : index
    %c0_73 = arith.constant 0 : index
    %342 = vector.load %arg5[%c0_72, %c0_73] : memref<4x128xf32, #tpu.memory_space<vmem>>, vector<4x128xf32>
    %c104 = arith.constant 104 : index
    %c0_74 = arith.constant 0 : index
    %343 = vector.load %arg1[%c104, %c0_74] : memref<456x128xf32, #tpu.memory_space<vmem>>, vector<128x64xf32>
    %cst_75 = arith.constant dense<0.000000e+00> : vector<4x64xf32>
    %344 = tpu.matmul %342, %343, %cst_75 {dimension_numbers = #tpu.dot_dimension_numbers<[1], [0], [0], [1], [0, 0, 1, 1], [], []>} : vector<4x128xf32>, vector<128x64xf32>, vector<4x64xf32> -> vector<4x64xf32>
    %c232 = arith.constant 232 : index
    %c0_76 = arith.constant 0 : index
    %345 = vector.load %arg1[%c232, %c0_76] : memref<456x128xf32, #tpu.memory_space<vmem>>, vector<1x64xf32>
    %346 = vector.broadcast %345 : vector<1x64xf32> to vector<4x64xf32>
    %347 = arith.addf %344, %346 : vector<4x64xf32>
    %cst_77 = arith.constant 0.000000e+00 : f32
    %348 = vector.broadcast %cst_77 : f32 to vector<4x64xf32>
    %349 = arith.maximumf %347, %348 : vector<4x64xf32>
    %c240 = arith.constant 240 : index
    %c0_78 = arith.constant 0 : index
    %350 = vector.load %arg1[%c240, %c0_78] : memref<456x128xf32, #tpu.memory_space<vmem>>, vector<64x32xf32>
    %cst_79 = arith.constant dense<0.000000e+00> : vector<4x32xf32>
    %351 = tpu.matmul %349, %350, %cst_79 {dimension_numbers = #tpu.dot_dimension_numbers<[1], [0], [0], [1], [0, 0, 1, 1], [], []>} : vector<4x64xf32>, vector<64x32xf32>, vector<4x32xf32> -> vector<4x32xf32>
    %c304 = arith.constant 304 : index
    %c0_80 = arith.constant 0 : index
    %352 = vector.load %arg1[%c304, %c0_80] : memref<456x128xf32, #tpu.memory_space<vmem>>, vector<1x32xf32>
    %353 = vector.broadcast %352 : vector<1x32xf32> to vector<4x32xf32>
    %354 = arith.addf %351, %353 : vector<4x32xf32>
    %cst_81 = arith.constant 0.000000e+00 : f32
    %355 = vector.broadcast %cst_81 : f32 to vector<4x32xf32>
    %356 = arith.maximumf %354, %355 : vector<4x32xf32>
    %c0_82 = arith.constant 0 : index
    %c0_83 = arith.constant 0 : index
    %357 = vector.load %arg4[%c0_82, %c0_83] : memref<4x32xf32, #tpu.memory_space<vmem>>, vector<4x32xf32>
    tpu.vector_store %arg4[%c0_82, %c0_83], %356 {strides = array<i32>} : memref<4x32xf32, #tpu.memory_space<vmem>>, vector<4x32xf32>,
    %c336 = arith.constant 336 : index
    %c0_84 = arith.constant 0 : index
    %358 = vector.load %arg1[%c336, %c0_84] : memref<456x128xf32, #tpu.memory_space<vmem>>, vector<32x128xf32>
    %c312 = arith.constant 312 : index
    %c0_85 = arith.constant 0 : index
    %359 = vector.load %arg1[%c312, %c0_85] : memref<456x128xf32, #tpu.memory_space<vmem>>, vector<16x128xf32>
    %c328 = arith.constant 328 : index
    %c0_86 = arith.constant 0 : index
    %360 = vector.load %arg1[%c328, %c0_86] : memref<456x128xf32, #tpu.memory_space<vmem>>, vector<1x128xf32>
    %c40_87 = arith.constant 40 : index
    %c0_88 = arith.constant 0 : index
    %361 = vector.load %arg2[%c40_87, %c0_88] : memref<144x256xf32, #tpu.memory_space<vmem>>, vector<32x256xf32>
    %c72 = arith.constant 72 : index
    %c0_89 = arith.constant 0 : index
    %362 = vector.load %arg2[%c72, %c0_89] : memref<144x256xf32, #tpu.memory_space<vmem>>, vector<64x256xf32>
    %c136 = arith.constant 136 : index
    %c0_90 = arith.constant 0 : index
    %363 = vector.load %arg2[%c136, %c0_90] : memref<144x256xf32, #tpu.memory_space<vmem>>, vector<1x256xf32>
    %c368 = arith.constant 368 : index
    %c0_91 = arith.constant 0 : index
    %364 = vector.load %arg1[%c368, %c0_91] : memref<456x128xf32, #tpu.memory_space<vmem>>, vector<64x64xf32>
    %c432 = arith.constant 432 : index
    %c0_92 = arith.constant 0 : index
    %365 = vector.load %arg1[%c432, %c0_92] : memref<456x128xf32, #tpu.memory_space<vmem>>, vector<16x64xf32>
    %c448 = arith.constant 448 : index
    %c0_93 = arith.constant 0 : index
    %366 = vector.load %arg1[%c448, %c0_93] : memref<456x128xf32, #tpu.memory_space<vmem>>, vector<1x64xf32>
    %c0_94 = arith.constant 0 : index
    %c0_95 = arith.constant 0 : index
    %367 = vector.load %arg2[%c0_94, %c0_95] : memref<144x256xf32, #tpu.memory_space<vmem>>, vector<32x160xf32>
    %cst_96 = arith.constant dense<0.000000e+00> : vector<4x160xf32>
    %368 = tpu.matmul %356, %367, %cst_96 {dimension_numbers = #tpu.dot_dimension_numbers<[1], [0], [0], [1], [0, 0, 1, 1], [], []>} : vector<4x32xf32>, vector<32x160xf32>, vector<4x160xf32> -> vector<4x160xf32>
    %c32_97 = arith.constant 32 : index
    %c0_98 = arith.constant 0 : index
    %369 = vector.load %arg2[%c32_97, %c0_98] : memref<144x256xf32, #tpu.memory_space<vmem>>, vector<1x160xf32>
    %370 = vector.broadcast %369 : vector<1x160xf32> to vector<4x160xf32>
    %371 = arith.addf %368, %370 : vector<4x160xf32>
    %372 = vector.extract_strided_slice %371 {offsets = [0, 0], sizes = [4, 128], strides = [1, 1]} : vector<4x160xf32> to vector<4x128xf32>
    %373 = vector.extract_strided_slice %371 {offsets = [0, 128], sizes = [4, 32], strides = [1, 1]} : vector<4x160xf32> to vector<4x32xf32>
    %374 = arith.negf %372 : vector<4x128xf32>
    %375 = math.exp %374 : vector<4x128xf32>
    %cst_99 = arith.constant 1.000000e+00 : f32
    %376 = vector.broadcast %cst_99 : f32 to vector<4x128xf32>
    %377 = arith.addf %376, %375 : vector<4x128xf32>
    %378 = arith.divf %376, %377 : vector<4x128xf32>
    %379 = math.tanh %372 : vector<4x128xf32>
    %380 = vector.extract_strided_slice %378 {offsets = [0, 0], sizes = [4, 32], strides = [1, 1]} : vector<4x128xf32> to vector<4x32xf32>
    %381 = vector.extract_strided_slice %378 {offsets = [0, 32], sizes = [4, 32], strides = [1, 1]} : vector<4x128xf32> to vector<4x32xf32>
    %382 = vector.extract_strided_slice %379 {offsets = [0, 64], sizes = [4, 32], strides = [1, 1]} : vector<4x128xf32> to vector<4x32xf32>
    %383 = vector.extract_strided_slice %378 {offsets = [0, 96], sizes = [4, 32], strides = [1, 1]} : vector<4x128xf32> to vector<4x32xf32>
    %384 = arith.mulf %381, %373 : vector<4x32xf32>
    %385 = arith.mulf %380, %382 : vector<4x32xf32>
    %386 = arith.addf %384, %385 : vector<4x32xf32>
    %387 = math.tanh %386 : vector<4x32xf32>
    %388 = arith.mulf %383, %387 : vector<4x32xf32>
    %cst_100 = arith.constant dense<0.000000e+00> : vector<4x256xf32>
    %389 = tpu.matmul %388, %361, %cst_100 {dimension_numbers = #tpu.dot_dimension_numbers<[1], [0], [0], [1], [0, 0, 1, 1], [], []>} : vector<4x32xf32>, vector<32x256xf32>, vector<4x256xf32> -> vector<4x256xf32>
    %390 = vector.broadcast %363 : vector<1x256xf32> to vector<4x256xf32>
    %391 = arith.addf %389, %390 : vector<4x256xf32>
    %cst_101 = arith.constant 0.000000e+00 : f32
    %392 = vector.broadcast %cst_101 : f32 to vector<4x64xf32>
    %393 = arith.negf %391 : vector<4x256xf32>
    %394 = math.exp %393 : vector<4x256xf32>
    %cst_102 = arith.constant 1.000000e+00 : f32
    %395 = vector.broadcast %cst_102 : f32 to vector<4x256xf32>
    %396 = arith.addf %395, %394 : vector<4x256xf32>
    %397 = arith.divf %395, %396 : vector<4x256xf32>
    %398 = math.tanh %391 : vector<4x256xf32>
    %399 = vector.extract_strided_slice %397 {offsets = [0, 0], sizes = [4, 64], strides = [1, 1]} : vector<4x256xf32> to vector<4x64xf32>
    %400 = vector.extract_strided_slice %397 {offsets = [0, 64], sizes = [4, 64], strides = [1, 1]} : vector<4x256xf32> to vector<4x64xf32>
    %401 = vector.extract_strided_slice %398 {offsets = [0, 128], sizes = [4, 64], strides = [1, 1]} : vector<4x256xf32> to vector<4x64xf32>
    %402 = vector.extract_strided_slice %397 {offsets = [0, 192], sizes = [4, 64], strides = [1, 1]} : vector<4x256xf32> to vector<4x64xf32>
    %403 = arith.mulf %400, %392 : vector<4x64xf32>
    %404 = arith.mulf %399, %401 : vector<4x64xf32>
    %405 = arith.addf %403, %404 : vector<4x64xf32>
    %406 = math.tanh %405 : vector<4x64xf32>
    %407 = arith.mulf %402, %406 : vector<4x64xf32>
    %cst_103 = arith.constant dense<0.000000e+00> : vector<4x64xf32>
    %408 = tpu.matmul %407, %364, %cst_103 {dimension_numbers = #tpu.dot_dimension_numbers<[1], [0], [0], [1], [0, 0, 1, 1], [], []>} : vector<4x64xf32>, vector<64x64xf32>, vector<4x64xf32> -> vector<4x64xf32>
    %409 = vector.broadcast %366 : vector<1x64xf32> to vector<4x64xf32>
    %410 = arith.addf %408, %409 : vector<4x64xf32>
    %cst_104 = arith.constant 0.000000e+00 : f32
    %411 = vector.broadcast %cst_104 : f32 to vector<4x16xf32>
    %412 = arith.negf %410 : vector<4x64xf32>
    %413 = math.exp %412 : vector<4x64xf32>
    %cst_105 = arith.constant 1.000000e+00 : f32
    %414 = vector.broadcast %cst_105 : f32 to vector<4x64xf32>
    %415 = arith.addf %414, %413 : vector<4x64xf32>
    %416 = arith.divf %414, %415 : vector<4x64xf32>
    %417 = math.tanh %410 : vector<4x64xf32>
    %418 = vector.extract_strided_slice %416 {offsets = [0, 0], sizes = [4, 16], strides = [1, 1]} : vector<4x64xf32> to vector<4x16xf32>
    %419 = vector.extract_strided_slice %416 {offsets = [0, 16], sizes = [4, 16], strides = [1, 1]} : vector<4x64xf32> to vector<4x16xf32>
    %420 = vector.extract_strided_slice %417 {offsets = [0, 32], sizes = [4, 16], strides = [1, 1]} : vector<4x64xf32> to vector<4x16xf32>
    %421 = vector.extract_strided_slice %416 {offsets = [0, 48], sizes = [4, 16], strides = [1, 1]} : vector<4x64xf32> to vector<4x16xf32>
    %422 = arith.mulf %419, %411 : vector<4x16xf32>
    %423 = arith.mulf %418, %420 : vector<4x16xf32>
    %424 = arith.addf %422, %423 : vector<4x16xf32>
    %425 = math.tanh %424 : vector<4x16xf32>
    %426 = arith.mulf %421, %425 : vector<4x16xf32>
    %c0_106 = arith.constant 0 : index
    %c0_107 = arith.constant 0 : index
    %c0_108 = arith.constant 0 : index
    %427 = vector.load %arg3[%c0_106, %c0_107, %c0_108] : memref<8x4x16xf32, #tpu.memory_space<vmem>>, vector<1x4x16xf32>
    %428 = vector.shape_cast %427 : vector<1x4x16xf32> to vector<4x16xf32>
    %429 = vector.shape_cast %426 : vector<4x16xf32> to vector<1x4x16xf32>
    tpu.vector_store %arg3[%c0_106, %c0_107, %c0_108], %429 {strides = array<i32>} : memref<8x4x16xf32, #tpu.memory_space<vmem>>, vector<1x4x16xf32>,
    %cst_109 = arith.constant dense<0.000000e+00> : vector<4x128xf32>
    %430 = tpu.matmul %426, %359, %cst_109 {dimension_numbers = #tpu.dot_dimension_numbers<[1], [0], [0], [1], [0, 0, 1, 1], [], []>} : vector<4x16xf32>, vector<16x128xf32>, vector<4x128xf32> -> vector<4x128xf32>
    %cst_110 = arith.constant dense<0.000000e+00> : vector<4x128xf32>
    %431 = tpu.matmul %388, %358, %cst_110 {dimension_numbers = #tpu.dot_dimension_numbers<[1], [0], [0], [1], [0, 0, 1, 1], [], []>} : vector<4x32xf32>, vector<32x128xf32>, vector<4x128xf32> -> vector<4x128xf32>
    %432 = arith.addf %430, %431 : vector<4x128xf32>
    %433 = vector.broadcast %360 : vector<1x128xf32> to vector<4x128xf32>
    %434 = arith.addf %432, %433 : vector<4x128xf32>
    %435 = arith.negf %434 : vector<4x128xf32>
    %436 = math.exp %435 : vector<4x128xf32>
    %cst_111 = arith.constant 1.000000e+00 : f32
    %437 = vector.broadcast %cst_111 : f32 to vector<4x128xf32>
    %438 = arith.addf %437, %436 : vector<4x128xf32>
    %439 = arith.divf %437, %438 : vector<4x128xf32>
    %440 = math.tanh %434 : vector<4x128xf32>
    %441 = vector.extract_strided_slice %439 {offsets = [0, 0], sizes = [4, 32], strides = [1, 1]} : vector<4x128xf32> to vector<4x32xf32>
    %442 = vector.extract_strided_slice %439 {offsets = [0, 32], sizes = [4, 32], strides = [1, 1]} : vector<4x128xf32> to vector<4x32xf32>
    %443 = vector.extract_strided_slice %440 {offsets = [0, 64], sizes = [4, 32], strides = [1, 1]} : vector<4x128xf32> to vector<4x32xf32>
    %444 = vector.extract_strided_slice %439 {offsets = [0, 96], sizes = [4, 32], strides = [1, 1]} : vector<4x128xf32> to vector<4x32xf32>
    %445 = arith.mulf %442, %386 : vector<4x32xf32>
    %446 = arith.mulf %441, %443 : vector<4x32xf32>
    %447 = arith.addf %445, %446 : vector<4x32xf32>
    %448 = math.tanh %447 : vector<4x32xf32>
    %449 = arith.mulf %444, %448 : vector<4x32xf32>
    %cst_112 = arith.constant dense<0.000000e+00> : vector<4x256xf32>
    %450 = tpu.matmul %449, %361, %cst_112 {dimension_numbers = #tpu.dot_dimension_numbers<[1], [0], [0], [1], [0, 0, 1, 1], [], []>} : vector<4x32xf32>, vector<32x256xf32>, vector<4x256xf32> -> vector<4x256xf32>
    %cst_113 = arith.constant dense<0.000000e+00> : vector<4x256xf32>
    %451 = tpu.matmul %407, %362, %cst_113 {dimension_numbers = #tpu.dot_dimension_numbers<[1], [0], [0], [1], [0, 0, 1, 1], [], []>} : vector<4x64xf32>, vector<64x256xf32>, vector<4x256xf32> -> vector<4x256xf32>
    %452 = arith.addf %450, %451 : vector<4x256xf32>
    %453 = vector.broadcast %363 : vector<1x256xf32> to vector<4x256xf32>
    %454 = arith.addf %452, %453 : vector<4x256xf32>
    %455 = arith.negf %454 : vector<4x256xf32>
    %456 = math.exp %455 : vector<4x256xf32>
    %cst_114 = arith.constant 1.000000e+00 : f32
    %457 = vector.broadcast %cst_114 : f32 to vector<4x256xf32>
    %458 = arith.addf %457, %456 : vector<4x256xf32>
    %459 = arith.divf %457, %458 : vector<4x256xf32>
    %460 = math.tanh %454 : vector<4x256xf32>
    %461 = vector.extract_strided_slice %459 {offsets = [0, 0], sizes = [4, 64], strides = [1, 1]} : vector<4x256xf32> to vector<4x64xf32>
    %462 = vector.extract_strided_slice %459 {offsets = [0, 64], sizes = [4, 64], strides = [1, 1]} : vector<4x256xf32> to vector<4x64xf32>
    %463 = vector.extract_strided_slice %460 {offsets = [0, 128], sizes = [4, 64], strides = [1, 1]} : vector<4x256xf32> to vector<4x64xf32>
    %464 = vector.extract_strided_slice %459 {offsets = [0, 192], sizes = [4, 64], strides = [1, 1]} : vector<4x256xf32> to vector<4x64xf32>
    %465 = arith.mulf %462, %405 : vector<4x64xf32>
    %466 = arith.mulf %461, %463 : vector<4x64xf32>
    %467 = arith.addf %465, %466 : vector<4x64xf32>
    %468 = math.tanh %467 : vector<4x64xf32>
    %469 = arith.mulf %464, %468 : vector<4x64xf32>
    %cst_115 = arith.constant dense<0.000000e+00> : vector<4x64xf32>
    %470 = tpu.matmul %469, %364, %cst_115 {dimension_numbers = #tpu.dot_dimension_numbers<[1], [0], [0], [1], [0, 0, 1, 1], [], []>} : vector<4x64xf32>, vector<64x64xf32>, vector<4x64xf32> -> vector<4x64xf32>
    %cst_116 = arith.constant dense<0.000000e+00> : vector<4x64xf32>
    %471 = tpu.matmul %426, %365, %cst_116 {dimension_numbers = #tpu.dot_dimension_numbers<[1], [0], [0], [1], [0, 0, 1, 1], [], []>} : vector<4x16xf32>, vector<16x64xf32>, vector<4x64xf32> -> vector<4x64xf32>
    %472 = arith.addf %470, %471 : vector<4x64xf32>
    %473 = vector.broadcast %366 : vector<1x64xf32> to vector<4x64xf32>
    %474 = arith.addf %472, %473 : vector<4x64xf32>
    %475 = arith.negf %474 : vector<4x64xf32>
    %476 = math.exp %475 : vector<4x64xf32>
    %cst_117 = arith.constant 1.000000e+00 : f32
    %477 = vector.broadcast %cst_117 : f32 to vector<4x64xf32>
    %478 = arith.addf %477, %476 : vector<4x64xf32>
    %479 = arith.divf %477, %478 : vector<4x64xf32>
    %480 = math.tanh %474 : vector<4x64xf32>
    %481 = vector.extract_strided_slice %479 {offsets = [0, 0], sizes = [4, 16], strides = [1, 1]} : vector<4x64xf32> to vector<4x16xf32>
    %482 = vector.extract_strided_slice %479 {offsets = [0, 16], sizes = [4, 16], strides = [1, 1]} : vector<4x64xf32> to vector<4x16xf32>
    %483 = vector.extract_strided_slice %480 {offsets = [0, 32], sizes = [4, 16], strides = [1, 1]} : vector<4x64xf32> to vector<4x16xf32>
    %484 = vector.extract_strided_slice %479 {offsets = [0, 48], sizes = [4, 16], strides = [1, 1]} : vector<4x64xf32> to vector<4x16xf32>
    %485 = arith.mulf %482, %424 : vector<4x16xf32>
    %486 = arith.mulf %481, %483 : vector<4x16xf32>
    %487 = arith.addf %485, %486 : vector<4x16xf32>
    %488 = math.tanh %487 : vector<4x16xf32>
    %489 = arith.mulf %484, %488 : vector<4x16xf32>
    %c1 = arith.constant 1 : index
    %c0_118 = arith.constant 0 : index
    %c0_119 = arith.constant 0 : index
    %490 = vector.load %arg3[%c1, %c0_118, %c0_119] : memref<8x4x16xf32, #tpu.memory_space<vmem>>, vector<1x4x16xf32>
    %491 = vector.shape_cast %490 : vector<1x4x16xf32> to vector<4x16xf32>
    %492 = vector.shape_cast %489 : vector<4x16xf32> to vector<1x4x16xf32>
    tpu.vector_store %arg3[%c1, %c0_118, %c0_119], %492 {strides = array<i32>} : memref<8x4x16xf32, #tpu.memory_space<vmem>>, vector<1x4x16xf32>,
    %cst_120 = arith.constant dense<0.000000e+00> : vector<4x128xf32>
    %493 = tpu.matmul %489, %359, %cst_120 {dimension_numbers = #tpu.dot_dimension_numbers<[1], [0], [0], [1], [0, 0, 1, 1], [], []>} : vector<4x16xf32>, vector<16x128xf32>, vector<4x128xf32> -> vector<4x128xf32>
    %cst_121 = arith.constant dense<0.000000e+00> : vector<4x128xf32>
    %494 = tpu.matmul %449, %358, %cst_121 {dimension_numbers = #tpu.dot_dimension_numbers<[1], [0], [0], [1], [0, 0, 1, 1], [], []>} : vector<4x32xf32>, vector<32x128xf32>, vector<4x128xf32> -> vector<4x128xf32>
    %495 = arith.addf %493, %494 : vector<4x128xf32>
    %496 = vector.broadcast %360 : vector<1x128xf32> to vector<4x128xf32>
    %497 = arith.addf %495, %496 : vector<4x128xf32>
    %498 = arith.negf %497 : vector<4x128xf32>
    %499 = math.exp %498 : vector<4x128xf32>
    %cst_122 = arith.constant 1.000000e+00 : f32
    %500 = vector.broadcast %cst_122 : f32 to vector<4x128xf32>
    %501 = arith.addf %500, %499 : vector<4x128xf32>
    %502 = arith.divf %500, %501 : vector<4x128xf32>
    %503 = math.tanh %497 : vector<4x128xf32>
    %504 = vector.extract_strided_slice %502 {offsets = [0, 0], sizes = [4, 32], strides = [1, 1]} : vector<4x128xf32> to vector<4x32xf32>
    %505 = vector.extract_strided_slice %502 {offsets = [0, 32], sizes = [4, 32], strides = [1, 1]} : vector<4x128xf32> to vector<4x32xf32>
    %506 = vector.extract_strided_slice %503 {offsets = [0, 64], sizes = [4, 32], strides = [1, 1]} : vector<4x128xf32> to vector<4x32xf32>
    %507 = vector.extract_strided_slice %502 {offsets = [0, 96], sizes = [4, 32], strides = [1, 1]} : vector<4x128xf32> to vector<4x32xf32>
    %508 = arith.mulf %505, %447 : vector<4x32xf32>
    %509 = arith.mulf %504, %506 : vector<4x32xf32>
    %510 = arith.addf %508, %509 : vector<4x32xf32>
    %511 = math.tanh %510 : vector<4x32xf32>
    %512 = arith.mulf %507, %511 : vector<4x32xf32>
    %cst_123 = arith.constant dense<0.000000e+00> : vector<4x256xf32>
    %513 = tpu.matmul %512, %361, %cst_123 {dimension_numbers = #tpu.dot_dimension_numbers<[1], [0], [0], [1], [0, 0, 1, 1], [], []>} : vector<4x32xf32>, vector<32x256xf32>, vector<4x256xf32> -> vector<4x256xf32>
    %cst_124 = arith.constant dense<0.000000e+00> : vector<4x256xf32>
    %514 = tpu.matmul %469, %362, %cst_124 {dimension_numbers = #tpu.dot_dimension_numbers<[1], [0], [0], [1], [0, 0, 1, 1], [], []>} : vector<4x64xf32>, vector<64x256xf32>, vector<4x256xf32> -> vector<4x256xf32>
    %515 = arith.addf %513, %514 : vector<4x256xf32>
    %516 = vector.broadcast %363 : vector<1x256xf32> to vector<4x256xf32>
    %517 = arith.addf %515, %516 : vector<4x256xf32>
    %518 = arith.negf %517 : vector<4x256xf32>
    %519 = math.exp %518 : vector<4x256xf32>
    %cst_125 = arith.constant 1.000000e+00 : f32
    %520 = vector.broadcast %cst_125 : f32 to vector<4x256xf32>
    %521 = arith.addf %520, %519 : vector<4x256xf32>
    %522 = arith.divf %520, %521 : vector<4x256xf32>
    %523 = math.tanh %517 : vector<4x256xf32>
    %524 = vector.extract_strided_slice %522 {offsets = [0, 0], sizes = [4, 64], strides = [1, 1]} : vector<4x256xf32> to vector<4x64xf32>
    %525 = vector.extract_strided_slice %522 {offsets = [0, 64], sizes = [4, 64], strides = [1, 1]} : vector<4x256xf32> to vector<4x64xf32>
    %526 = vector.extract_strided_slice %523 {offsets = [0, 128], sizes = [4, 64], strides = [1, 1]} : vector<4x256xf32> to vector<4x64xf32>
    %527 = vector.extract_strided_slice %522 {offsets = [0, 192], sizes = [4, 64], strides = [1, 1]} : vector<4x256xf32> to vector<4x64xf32>
    %528 = arith.mulf %525, %467 : vector<4x64xf32>
    %529 = arith.mulf %524, %526 : vector<4x64xf32>
    %530 = arith.addf %528, %529 : vector<4x64xf32>
    %531 = math.tanh %530 : vector<4x64xf32>
    %532 = arith.mulf %527, %531 : vector<4x64xf32>
    %cst_126 = arith.constant dense<0.000000e+00> : vector<4x64xf32>
    %533 = tpu.matmul %532, %364, %cst_126 {dimension_numbers = #tpu.dot_dimension_numbers<[1], [0], [0], [1], [0, 0, 1, 1], [], []>} : vector<4x64xf32>, vector<64x64xf32>, vector<4x64xf32> -> vector<4x64xf32>
    %cst_127 = arith.constant dense<0.000000e+00> : vector<4x64xf32>
    %534 = tpu.matmul %489, %365, %cst_127 {dimension_numbers = #tpu.dot_dimension_numbers<[1], [0], [0], [1], [0, 0, 1, 1], [], []>} : vector<4x16xf32>, vector<16x64xf32>, vector<4x64xf32> -> vector<4x64xf32>
    %535 = arith.addf %533, %534 : vector<4x64xf32>
    %536 = vector.broadcast %366 : vector<1x64xf32> to vector<4x64xf32>
    %537 = arith.addf %535, %536 : vector<4x64xf32>
    %538 = arith.negf %537 : vector<4x64xf32>
    %539 = math.exp %538 : vector<4x64xf32>
    %cst_128 = arith.constant 1.000000e+00 : f32
    %540 = vector.broadcast %cst_128 : f32 to vector<4x64xf32>
    %541 = arith.addf %540, %539 : vector<4x64xf32>
    %542 = arith.divf %540, %541 : vector<4x64xf32>
    %543 = math.tanh %537 : vector<4x64xf32>
    %544 = vector.extract_strided_slice %542 {offsets = [0, 0], sizes = [4, 16], strides = [1, 1]} : vector<4x64xf32> to vector<4x16xf32>
    %545 = vector.extract_strided_slice %542 {offsets = [0, 16], sizes = [4, 16], strides = [1, 1]} : vector<4x64xf32> to vector<4x16xf32>
    %546 = vector.extract_strided_slice %543 {offsets = [0, 32], sizes = [4, 16], strides = [1, 1]} : vector<4x64xf32> to vector<4x16xf32>
    %547 = vector.extract_strided_slice %542 {offsets = [0, 48], sizes = [4, 16], strides = [1, 1]} : vector<4x64xf32> to vector<4x16xf32>
    %548 = arith.mulf %545, %487 : vector<4x16xf32>
    %549 = arith.mulf %544, %546 : vector<4x16xf32>
    %550 = arith.addf %548, %549 : vector<4x16xf32>
    %551 = math.tanh %550 : vector<4x16xf32>
    %552 = arith.mulf %547, %551 : vector<4x16xf32>
    %c2 = arith.constant 2 : index
    %c0_129 = arith.constant 0 : index
    %c0_130 = arith.constant 0 : index
    %553 = vector.load %arg3[%c2, %c0_129, %c0_130] : memref<8x4x16xf32, #tpu.memory_space<vmem>>, vector<1x4x16xf32>
    %554 = vector.shape_cast %553 : vector<1x4x16xf32> to vector<4x16xf32>
    %555 = vector.shape_cast %552 : vector<4x16xf32> to vector<1x4x16xf32>
    tpu.vector_store %arg3[%c2, %c0_129, %c0_130], %555 {strides = array<i32>} : memref<8x4x16xf32, #tpu.memory_space<vmem>>, vector<1x4x16xf32>,
    %cst_131 = arith.constant dense<0.000000e+00> : vector<4x128xf32>
    %556 = tpu.matmul %552, %359, %cst_131 {dimension_numbers = #tpu.dot_dimension_numbers<[1], [0], [0], [1], [0, 0, 1, 1], [], []>} : vector<4x16xf32>, vector<16x128xf32>, vector<4x128xf32> -> vector<4x128xf32>
    %cst_132 = arith.constant dense<0.000000e+00> : vector<4x128xf32>
    %557 = tpu.matmul %512, %358, %cst_132 {dimension_numbers = #tpu.dot_dimension_numbers<[1], [0], [0], [1], [0, 0, 1, 1], [], []>} : vector<4x32xf32>, vector<32x128xf32>, vector<4x128xf32> -> vector<4x128xf32>
    %558 = arith.addf %556, %557 : vector<4x128xf32>
    %559 = vector.broadcast %360 : vector<1x128xf32> to vector<4x128xf32>
    %560 = arith.addf %558, %559 : vector<4x128xf32>
    %561 = arith.negf %560 : vector<4x128xf32>
    %562 = math.exp %561 : vector<4x128xf32>
    %cst_133 = arith.constant 1.000000e+00 : f32
    %563 = vector.broadcast %cst_133 : f32 to vector<4x128xf32>
    %564 = arith.addf %563, %562 : vector<4x128xf32>
    %565 = arith.divf %563, %564 : vector<4x128xf32>
    %566 = math.tanh %560 : vector<4x128xf32>
    %567 = vector.extract_strided_slice %565 {offsets = [0, 0], sizes = [4, 32], strides = [1, 1]} : vector<4x128xf32> to vector<4x32xf32>
    %568 = vector.extract_strided_slice %565 {offsets = [0, 32], sizes = [4, 32], strides = [1, 1]} : vector<4x128xf32> to vector<4x32xf32>
    %569 = vector.extract_strided_slice %566 {offsets = [0, 64], sizes = [4, 32], strides = [1, 1]} : vector<4x128xf32> to vector<4x32xf32>
    %570 = vector.extract_strided_slice %565 {offsets = [0, 96], sizes = [4, 32], strides = [1, 1]} : vector<4x128xf32> to vector<4x32xf32>
    %571 = arith.mulf %568, %510 : vector<4x32xf32>
    %572 = arith.mulf %567, %569 : vector<4x32xf32>
    %573 = arith.addf %571, %572 : vector<4x32xf32>
    %574 = math.tanh %573 : vector<4x32xf32>
    %575 = arith.mulf %570, %574 : vector<4x32xf32>
    %cst_134 = arith.constant dense<0.000000e+00> : vector<4x256xf32>
    %576 = tpu.matmul %575, %361, %cst_134 {dimension_numbers = #tpu.dot_dimension_numbers<[1], [0], [0], [1], [0, 0, 1, 1], [], []>} : vector<4x32xf32>, vector<32x256xf32>, vector<4x256xf32> -> vector<4x256xf32>
    %cst_135 = arith.constant dense<0.000000e+00> : vector<4x256xf32>
    %577 = tpu.matmul %532, %362, %cst_135 {dimension_numbers = #tpu.dot_dimension_numbers<[1], [0], [0], [1], [0, 0, 1, 1], [], []>} : vector<4x64xf32>, vector<64x256xf32>, vector<4x256xf32> -> vector<4x256xf32>
    %578 = arith.addf %576, %577 : vector<4x256xf32>
    %579 = vector.broadcast %363 : vector<1x256xf32> to vector<4x256xf32>
    %580 = arith.addf %578, %579 : vector<4x256xf32>
    %581 = arith.negf %580 : vector<4x256xf32>
    %582 = math.exp %581 : vector<4x256xf32>
    %cst_136 = arith.constant 1.000000e+00 : f32
    %583 = vector.broadcast %cst_136 : f32 to vector<4x256xf32>
    %584 = arith.addf %583, %582 : vector<4x256xf32>
    %585 = arith.divf %583, %584 : vector<4x256xf32>
    %586 = math.tanh %580 : vector<4x256xf32>
    %587 = vector.extract_strided_slice %585 {offsets = [0, 0], sizes = [4, 64], strides = [1, 1]} : vector<4x256xf32> to vector<4x64xf32>
    %588 = vector.extract_strided_slice %585 {offsets = [0, 64], sizes = [4, 64], strides = [1, 1]} : vector<4x256xf32> to vector<4x64xf32>
    %589 = vector.extract_strided_slice %586 {offsets = [0, 128], sizes = [4, 64], strides = [1, 1]} : vector<4x256xf32> to vector<4x64xf32>
    %590 = vector.extract_strided_slice %585 {offsets = [0, 192], sizes = [4, 64], strides = [1, 1]} : vector<4x256xf32> to vector<4x64xf32>
    %591 = arith.mulf %588, %530 : vector<4x64xf32>
    %592 = arith.mulf %587, %589 : vector<4x64xf32>
    %593 = arith.addf %591, %592 : vector<4x64xf32>
    %594 = math.tanh %593 : vector<4x64xf32>
    %595 = arith.mulf %590, %594 : vector<4x64xf32>
    %cst_137 = arith.constant dense<0.000000e+00> : vector<4x64xf32>
    %596 = tpu.matmul %595, %364, %cst_137 {dimension_numbers = #tpu.dot_dimension_numbers<[1], [0], [0], [1], [0, 0, 1, 1], [], []>} : vector<4x64xf32>, vector<64x64xf32>, vector<4x64xf32> -> vector<4x64xf32>
    %cst_138 = arith.constant dense<0.000000e+00> : vector<4x64xf32>
    %597 = tpu.matmul %552, %365, %cst_138 {dimension_numbers = #tpu.dot_dimension_numbers<[1], [0], [0], [1], [0, 0, 1, 1], [], []>} : vector<4x16xf32>, vector<16x64xf32>, vector<4x64xf32> -> vector<4x64xf32>
    %598 = arith.addf %596, %597 : vector<4x64xf32>
    %599 = vector.broadcast %366 : vector<1x64xf32> to vector<4x64xf32>
    %600 = arith.addf %598, %599 : vector<4x64xf32>
    %601 = arith.negf %600 : vector<4x64xf32>
    %602 = math.exp %601 : vector<4x64xf32>
    %cst_139 = arith.constant 1.000000e+00 : f32
    %603 = vector.broadcast %cst_139 : f32 to vector<4x64xf32>
    %604 = arith.addf %603, %602 : vector<4x64xf32>
    %605 = arith.divf %603, %604 : vector<4x64xf32>
    %606 = math.tanh %600 : vector<4x64xf32>
    %607 = vector.extract_strided_slice %605 {offsets = [0, 0], sizes = [4, 16], strides = [1, 1]} : vector<4x64xf32> to vector<4x16xf32>
    %608 = vector.extract_strided_slice %605 {offsets = [0, 16], sizes = [4, 16], strides = [1, 1]} : vector<4x64xf32> to vector<4x16xf32>
    %609 = vector.extract_strided_slice %606 {offsets = [0, 32], sizes = [4, 16], strides = [1, 1]} : vector<4x64xf32> to vector<4x16xf32>
    %610 = vector.extract_strided_slice %605 {offsets = [0, 48], sizes = [4, 16], strides = [1, 1]} : vector<4x64xf32> to vector<4x16xf32>
    %611 = arith.mulf %608, %550 : vector<4x16xf32>
    %612 = arith.mulf %607, %609 : vector<4x16xf32>
    %613 = arith.addf %611, %612 : vector<4x16xf32>
    %614 = math.tanh %613 : vector<4x16xf32>
    %615 = arith.mulf %610, %614 : vector<4x16xf32>
    %c3 = arith.constant 3 : index
    %c0_140 = arith.constant 0 : index
    %c0_141 = arith.constant 0 : index
    %616 = vector.load %arg3[%c3, %c0_140, %c0_141] : memref<8x4x16xf32, #tpu.memory_space<vmem>>, vector<1x4x16xf32>
    %617 = vector.shape_cast %616 : vector<1x4x16xf32> to vector<4x16xf32>
    %618 = vector.shape_cast %615 : vector<4x16xf32> to vector<1x4x16xf32>
    tpu.vector_store %arg3[%c3, %c0_140, %c0_141], %618 {strides = array<i32>} : memref<8x4x16xf32, #tpu.memory_space<vmem>>, vector<1x4x16xf32>,
    %cst_142 = arith.constant dense<0.000000e+00> : vector<4x128xf32>
    %619 = tpu.matmul %615, %359, %cst_142 {dimension_numbers = #tpu.dot_dimension_numbers<[1], [0], [0], [1], [0, 0, 1, 1], [], []>} : vector<4x16xf32>, vector<16x128xf32>, vector<4x128xf32> -> vector<4x128xf32>
    %cst_143 = arith.constant dense<0.000000e+00> : vector<4x128xf32>
    %620 = tpu.matmul %575, %358, %cst_143 {dimension_numbers = #tpu.dot_dimension_numbers<[1], [0], [0], [1], [0, 0, 1, 1], [], []>} : vector<4x32xf32>, vector<32x128xf32>, vector<4x128xf32> -> vector<4x128xf32>
    %621 = arith.addf %619, %620 : vector<4x128xf32>
    %622 = vector.broadcast %360 : vector<1x128xf32> to vector<4x128xf32>
    %623 = arith.addf %621, %622 : vector<4x128xf32>
    %624 = arith.negf %623 : vector<4x128xf32>
    %625 = math.exp %624 : vector<4x128xf32>
    %cst_144 = arith.constant 1.000000e+00 : f32
    %626 = vector.broadcast %cst_144 : f32 to vector<4x128xf32>
    %627 = arith.addf %626, %625 : vector<4x128xf32>
    %628 = arith.divf %626, %627 : vector<4x128xf32>
    %629 = math.tanh %623 : vector<4x128xf32>
    %630 = vector.extract_strided_slice %628 {offsets = [0, 0], sizes = [4, 32], strides = [1, 1]} : vector<4x128xf32> to vector<4x32xf32>
    %631 = vector.extract_strided_slice %628 {offsets = [0, 32], sizes = [4, 32], strides = [1, 1]} : vector<4x128xf32> to vector<4x32xf32>
    %632 = vector.extract_strided_slice %629 {offsets = [0, 64], sizes = [4, 32], strides = [1, 1]} : vector<4x128xf32> to vector<4x32xf32>
    %633 = vector.extract_strided_slice %628 {offsets = [0, 96], sizes = [4, 32], strides = [1, 1]} : vector<4x128xf32> to vector<4x32xf32>
    %634 = arith.mulf %631, %573 : vector<4x32xf32>
    %635 = arith.mulf %630, %632 : vector<4x32xf32>
    %636 = arith.addf %634, %635 : vector<4x32xf32>
    %637 = math.tanh %636 : vector<4x32xf32>
    %638 = arith.mulf %633, %637 : vector<4x32xf32>
    %cst_145 = arith.constant dense<0.000000e+00> : vector<4x256xf32>
    %639 = tpu.matmul %638, %361, %cst_145 {dimension_numbers = #tpu.dot_dimension_numbers<[1], [0], [0], [1], [0, 0, 1, 1], [], []>} : vector<4x32xf32>, vector<32x256xf32>, vector<4x256xf32> -> vector<4x256xf32>
    %cst_146 = arith.constant dense<0.000000e+00> : vector<4x256xf32>
    %640 = tpu.matmul %595, %362, %cst_146 {dimension_numbers = #tpu.dot_dimension_numbers<[1], [0], [0], [1], [0, 0, 1, 1], [], []>} : vector<4x64xf32>, vector<64x256xf32>, vector<4x256xf32> -> vector<4x256xf32>
    %641 = arith.addf %639, %640 : vector<4x256xf32>
    %642 = vector.broadcast %363 : vector<1x256xf32> to vector<4x256xf32>
    %643 = arith.addf %641, %642 : vector<4x256xf32>
    %644 = arith.negf %643 : vector<4x256xf32>
    %645 = math.exp %644 : vector<4x256xf32>
    %cst_147 = arith.constant 1.000000e+00 : f32
    %646 = vector.broadcast %cst_147 : f32 to vector<4x256xf32>
    %647 = arith.addf %646, %645 : vector<4x256xf32>
    %648 = arith.divf %646, %647 : vector<4x256xf32>
    %649 = math.tanh %643 : vector<4x256xf32>
    %650 = vector.extract_strided_slice %648 {offsets = [0, 0], sizes = [4, 64], strides = [1, 1]} : vector<4x256xf32> to vector<4x64xf32>
    %651 = vector.extract_strided_slice %648 {offsets = [0, 64], sizes = [4, 64], strides = [1, 1]} : vector<4x256xf32> to vector<4x64xf32>
    %652 = vector.extract_strided_slice %649 {offsets = [0, 128], sizes = [4, 64], strides = [1, 1]} : vector<4x256xf32> to vector<4x64xf32>
    %653 = vector.extract_strided_slice %648 {offsets = [0, 192], sizes = [4, 64], strides = [1, 1]} : vector<4x256xf32> to vector<4x64xf32>
    %654 = arith.mulf %651, %593 : vector<4x64xf32>
    %655 = arith.mulf %650, %652 : vector<4x64xf32>
    %656 = arith.addf %654, %655 : vector<4x64xf32>
    %657 = math.tanh %656 : vector<4x64xf32>
    %658 = arith.mulf %653, %657 : vector<4x64xf32>
    %cst_148 = arith.constant dense<0.000000e+00> : vector<4x64xf32>
    %659 = tpu.matmul %658, %364, %cst_148 {dimension_numbers = #tpu.dot_dimension_numbers<[1], [0], [0], [1], [0, 0, 1, 1], [], []>} : vector<4x64xf32>, vector<64x64xf32>, vector<4x64xf32> -> vector<4x64xf32>
    %cst_149 = arith.constant dense<0.000000e+00> : vector<4x64xf32>
    %660 = tpu.matmul %615, %365, %cst_149 {dimension_numbers = #tpu.dot_dimension_numbers<[1], [0], [0], [1], [0, 0, 1, 1], [], []>} : vector<4x16xf32>, vector<16x64xf32>, vector<4x64xf32> -> vector<4x64xf32>
    %661 = arith.addf %659, %660 : vector<4x64xf32>
    %662 = vector.broadcast %366 : vector<1x64xf32> to vector<4x64xf32>
    %663 = arith.addf %661, %662 : vector<4x64xf32>
    %664 = arith.negf %663 : vector<4x64xf32>
    %665 = math.exp %664 : vector<4x64xf32>
    %cst_150 = arith.constant 1.000000e+00 : f32
    %666 = vector.broadcast %cst_150 : f32 to vector<4x64xf32>
    %667 = arith.addf %666, %665 : vector<4x64xf32>
    %668 = arith.divf %666, %667 : vector<4x64xf32>
    %669 = math.tanh %663 : vector<4x64xf32>
    %670 = vector.extract_strided_slice %668 {offsets = [0, 0], sizes = [4, 16], strides = [1, 1]} : vector<4x64xf32> to vector<4x16xf32>
    %671 = vector.extract_strided_slice %668 {offsets = [0, 16], sizes = [4, 16], strides = [1, 1]} : vector<4x64xf32> to vector<4x16xf32>
    %672 = vector.extract_strided_slice %669 {offsets = [0, 32], sizes = [4, 16], strides = [1, 1]} : vector<4x64xf32> to vector<4x16xf32>
    %673 = vector.extract_strided_slice %668 {offsets = [0, 48], sizes = [4, 16], strides = [1, 1]} : vector<4x64xf32> to vector<4x16xf32>
    %674 = arith.mulf %671, %613 : vector<4x16xf32>
    %675 = arith.mulf %670, %672 : vector<4x16xf32>
    %676 = arith.addf %674, %675 : vector<4x16xf32>
    %677 = math.tanh %676 : vector<4x16xf32>
    %678 = arith.mulf %673, %677 : vector<4x16xf32>
    %c4 = arith.constant 4 : index
    %c0_151 = arith.constant 0 : index
    %c0_152 = arith.constant 0 : index
    %679 = vector.load %arg3[%c4, %c0_151, %c0_152] : memref<8x4x16xf32, #tpu.memory_space<vmem>>, vector<1x4x16xf32>
    %680 = vector.shape_cast %679 : vector<1x4x16xf32> to vector<4x16xf32>
    %681 = vector.shape_cast %678 : vector<4x16xf32> to vector<1x4x16xf32>
    tpu.vector_store %arg3[%c4, %c0_151, %c0_152], %681 {strides = array<i32>} : memref<8x4x16xf32, #tpu.memory_space<vmem>>, vector<1x4x16xf32>,
    %cst_153 = arith.constant dense<0.000000e+00> : vector<4x128xf32>
    %682 = tpu.matmul %678, %359, %cst_153 {dimension_numbers = #tpu.dot_dimension_numbers<[1], [0], [0], [1], [0, 0, 1, 1], [], []>} : vector<4x16xf32>, vector<16x128xf32>, vector<4x128xf32> -> vector<4x128xf32>
    %cst_154 = arith.constant dense<0.000000e+00> : vector<4x128xf32>
    %683 = tpu.matmul %638, %358, %cst_154 {dimension_numbers = #tpu.dot_dimension_numbers<[1], [0], [0], [1], [0, 0, 1, 1], [], []>} : vector<4x32xf32>, vector<32x128xf32>, vector<4x128xf32> -> vector<4x128xf32>
    %684 = arith.addf %682, %683 : vector<4x128xf32>
    %685 = vector.broadcast %360 : vector<1x128xf32> to vector<4x128xf32>
    %686 = arith.addf %684, %685 : vector<4x128xf32>
    %687 = arith.negf %686 : vector<4x128xf32>
    %688 = math.exp %687 : vector<4x128xf32>
    %cst_155 = arith.constant 1.000000e+00 : f32
    %689 = vector.broadcast %cst_155 : f32 to vector<4x128xf32>
    %690 = arith.addf %689, %688 : vector<4x128xf32>
    %691 = arith.divf %689, %690 : vector<4x128xf32>
    %692 = math.tanh %686 : vector<4x128xf32>
    %693 = vector.extract_strided_slice %691 {offsets = [0, 0], sizes = [4, 32], strides = [1, 1]} : vector<4x128xf32> to vector<4x32xf32>
    %694 = vector.extract_strided_slice %691 {offsets = [0, 32], sizes = [4, 32], strides = [1, 1]} : vector<4x128xf32> to vector<4x32xf32>
    %695 = vector.extract_strided_slice %692 {offsets = [0, 64], sizes = [4, 32], strides = [1, 1]} : vector<4x128xf32> to vector<4x32xf32>
    %696 = vector.extract_strided_slice %691 {offsets = [0, 96], sizes = [4, 32], strides = [1, 1]} : vector<4x128xf32> to vector<4x32xf32>
    %697 = arith.mulf %694, %636 : vector<4x32xf32>
    %698 = arith.mulf %693, %695 : vector<4x32xf32>
    %699 = arith.addf %697, %698 : vector<4x32xf32>
    %700 = math.tanh %699 : vector<4x32xf32>
    %701 = arith.mulf %696, %700 : vector<4x32xf32>
    %cst_156 = arith.constant dense<0.000000e+00> : vector<4x256xf32>
    %702 = tpu.matmul %701, %361, %cst_156 {dimension_numbers = #tpu.dot_dimension_numbers<[1], [0], [0], [1], [0, 0, 1, 1], [], []>} : vector<4x32xf32>, vector<32x256xf32>, vector<4x256xf32> -> vector<4x256xf32>
    %cst_157 = arith.constant dense<0.000000e+00> : vector<4x256xf32>
    %703 = tpu.matmul %658, %362, %cst_157 {dimension_numbers = #tpu.dot_dimension_numbers<[1], [0], [0], [1], [0, 0, 1, 1], [], []>} : vector<4x64xf32>, vector<64x256xf32>, vector<4x256xf32> -> vector<4x256xf32>
    %704 = arith.addf %702, %703 : vector<4x256xf32>
    %705 = vector.broadcast %363 : vector<1x256xf32> to vector<4x256xf32>
    %706 = arith.addf %704, %705 : vector<4x256xf32>
    %707 = arith.negf %706 : vector<4x256xf32>
    %708 = math.exp %707 : vector<4x256xf32>
    %cst_158 = arith.constant 1.000000e+00 : f32
    %709 = vector.broadcast %cst_158 : f32 to vector<4x256xf32>
    %710 = arith.addf %709, %708 : vector<4x256xf32>
    %711 = arith.divf %709, %710 : vector<4x256xf32>
    %712 = math.tanh %706 : vector<4x256xf32>
    %713 = vector.extract_strided_slice %711 {offsets = [0, 0], sizes = [4, 64], strides = [1, 1]} : vector<4x256xf32> to vector<4x64xf32>
    %714 = vector.extract_strided_slice %711 {offsets = [0, 64], sizes = [4, 64], strides = [1, 1]} : vector<4x256xf32> to vector<4x64xf32>
    %715 = vector.extract_strided_slice %712 {offsets = [0, 128], sizes = [4, 64], strides = [1, 1]} : vector<4x256xf32> to vector<4x64xf32>
    %716 = vector.extract_strided_slice %711 {offsets = [0, 192], sizes = [4, 64], strides = [1, 1]} : vector<4x256xf32> to vector<4x64xf32>
    %717 = arith.mulf %714, %656 : vector<4x64xf32>
    %718 = arith.mulf %713, %715 : vector<4x64xf32>
    %719 = arith.addf %717, %718 : vector<4x64xf32>
    %720 = math.tanh %719 : vector<4x64xf32>
    %721 = arith.mulf %716, %720 : vector<4x64xf32>
    %cst_159 = arith.constant dense<0.000000e+00> : vector<4x64xf32>
    %722 = tpu.matmul %721, %364, %cst_159 {dimension_numbers = #tpu.dot_dimension_numbers<[1], [0], [0], [1], [0, 0, 1, 1], [], []>} : vector<4x64xf32>, vector<64x64xf32>, vector<4x64xf32> -> vector<4x64xf32>
    %cst_160 = arith.constant dense<0.000000e+00> : vector<4x64xf32>
    %723 = tpu.matmul %678, %365, %cst_160 {dimension_numbers = #tpu.dot_dimension_numbers<[1], [0], [0], [1], [0, 0, 1, 1], [], []>} : vector<4x16xf32>, vector<16x64xf32>, vector<4x64xf32> -> vector<4x64xf32>
    %724 = arith.addf %722, %723 : vector<4x64xf32>
    %725 = vector.broadcast %366 : vector<1x64xf32> to vector<4x64xf32>
    %726 = arith.addf %724, %725 : vector<4x64xf32>
    %727 = arith.negf %726 : vector<4x64xf32>
    %728 = math.exp %727 : vector<4x64xf32>
    %cst_161 = arith.constant 1.000000e+00 : f32
    %729 = vector.broadcast %cst_161 : f32 to vector<4x64xf32>
    %730 = arith.addf %729, %728 : vector<4x64xf32>
    %731 = arith.divf %729, %730 : vector<4x64xf32>
    %732 = math.tanh %726 : vector<4x64xf32>
    %733 = vector.extract_strided_slice %731 {offsets = [0, 0], sizes = [4, 16], strides = [1, 1]} : vector<4x64xf32> to vector<4x16xf32>
    %734 = vector.extract_strided_slice %731 {offsets = [0, 16], sizes = [4, 16], strides = [1, 1]} : vector<4x64xf32> to vector<4x16xf32>
    %735 = vector.extract_strided_slice %732 {offsets = [0, 32], sizes = [4, 16], strides = [1, 1]} : vector<4x64xf32> to vector<4x16xf32>
    %736 = vector.extract_strided_slice %731 {offsets = [0, 48], sizes = [4, 16], strides = [1, 1]} : vector<4x64xf32> to vector<4x16xf32>
    %737 = arith.mulf %734, %676 : vector<4x16xf32>
    %738 = arith.mulf %733, %735 : vector<4x16xf32>
    %739 = arith.addf %737, %738 : vector<4x16xf32>
    %740 = math.tanh %739 : vector<4x16xf32>
    %741 = arith.mulf %736, %740 : vector<4x16xf32>
    %c5 = arith.constant 5 : index
    %c0_162 = arith.constant 0 : index
    %c0_163 = arith.constant 0 : index
    %742 = vector.load %arg3[%c5, %c0_162, %c0_163] : memref<8x4x16xf32, #tpu.memory_space<vmem>>, vector<1x4x16xf32>
    %743 = vector.shape_cast %742 : vector<1x4x16xf32> to vector<4x16xf32>
    %744 = vector.shape_cast %741 : vector<4x16xf32> to vector<1x4x16xf32>
    tpu.vector_store %arg3[%c5, %c0_162, %c0_163], %744 {strides = array<i32>} : memref<8x4x16xf32, #tpu.memory_space<vmem>>, vector<1x4x16xf32>,
    %cst_164 = arith.constant dense<0.000000e+00> : vector<4x128xf32>
    %745 = tpu.matmul %741, %359, %cst_164 {dimension_numbers = #tpu.dot_dimension_numbers<[1], [0], [0], [1], [0, 0, 1, 1], [], []>} : vector<4x16xf32>, vector<16x128xf32>, vector<4x128xf32> -> vector<4x128xf32>
    %cst_165 = arith.constant dense<0.000000e+00> : vector<4x128xf32>
    %746 = tpu.matmul %701, %358, %cst_165 {dimension_numbers = #tpu.dot_dimension_numbers<[1], [0], [0], [1], [0, 0, 1, 1], [], []>} : vector<4x32xf32>, vector<32x128xf32>, vector<4x128xf32> -> vector<4x128xf32>
    %747 = arith.addf %745, %746 : vector<4x128xf32>
    %748 = vector.broadcast %360 : vector<1x128xf32> to vector<4x128xf32>
    %749 = arith.addf %747, %748 : vector<4x128xf32>
    %750 = arith.negf %749 : vector<4x128xf32>
    %751 = math.exp %750 : vector<4x128xf32>
    %cst_166 = arith.constant 1.000000e+00 : f32
    %752 = vector.broadcast %cst_166 : f32 to vector<4x128xf32>
    %753 = arith.addf %752, %751 : vector<4x128xf32>
    %754 = arith.divf %752, %753 : vector<4x128xf32>
    %755 = math.tanh %749 : vector<4x128xf32>
    %756 = vector.extract_strided_slice %754 {offsets = [0, 0], sizes = [4, 32], strides = [1, 1]} : vector<4x128xf32> to vector<4x32xf32>
    %757 = vector.extract_strided_slice %754 {offsets = [0, 32], sizes = [4, 32], strides = [1, 1]} : vector<4x128xf32> to vector<4x32xf32>
    %758 = vector.extract_strided_slice %755 {offsets = [0, 64], sizes = [4, 32], strides = [1, 1]} : vector<4x128xf32> to vector<4x32xf32>
    %759 = vector.extract_strided_slice %754 {offsets = [0, 96], sizes = [4, 32], strides = [1, 1]} : vector<4x128xf32> to vector<4x32xf32>
    %760 = arith.mulf %757, %699 : vector<4x32xf32>
    %761 = arith.mulf %756, %758 : vector<4x32xf32>
    %762 = arith.addf %760, %761 : vector<4x32xf32>
    %763 = math.tanh %762 : vector<4x32xf32>
    %764 = arith.mulf %759, %763 : vector<4x32xf32>
    %cst_167 = arith.constant dense<0.000000e+00> : vector<4x256xf32>
    %765 = tpu.matmul %764, %361, %cst_167 {dimension_numbers = #tpu.dot_dimension_numbers<[1], [0], [0], [1], [0, 0, 1, 1], [], []>} : vector<4x32xf32>, vector<32x256xf32>, vector<4x256xf32> -> vector<4x256xf32>
    %cst_168 = arith.constant dense<0.000000e+00> : vector<4x256xf32>
    %766 = tpu.matmul %721, %362, %cst_168 {dimension_numbers = #tpu.dot_dimension_numbers<[1], [0], [0], [1], [0, 0, 1, 1], [], []>} : vector<4x64xf32>, vector<64x256xf32>, vector<4x256xf32> -> vector<4x256xf32>
    %767 = arith.addf %765, %766 : vector<4x256xf32>
    %768 = vector.broadcast %363 : vector<1x256xf32> to vector<4x256xf32>
    %769 = arith.addf %767, %768 : vector<4x256xf32>
    %770 = arith.negf %769 : vector<4x256xf32>
    %771 = math.exp %770 : vector<4x256xf32>
    %cst_169 = arith.constant 1.000000e+00 : f32
    %772 = vector.broadcast %cst_169 : f32 to vector<4x256xf32>
    %773 = arith.addf %772, %771 : vector<4x256xf32>
    %774 = arith.divf %772, %773 : vector<4x256xf32>
    %775 = math.tanh %769 : vector<4x256xf32>
    %776 = vector.extract_strided_slice %774 {offsets = [0, 0], sizes = [4, 64], strides = [1, 1]} : vector<4x256xf32> to vector<4x64xf32>
    %777 = vector.extract_strided_slice %774 {offsets = [0, 64], sizes = [4, 64], strides = [1, 1]} : vector<4x256xf32> to vector<4x64xf32>
    %778 = vector.extract_strided_slice %775 {offsets = [0, 128], sizes = [4, 64], strides = [1, 1]} : vector<4x256xf32> to vector<4x64xf32>
    %779 = vector.extract_strided_slice %774 {offsets = [0, 192], sizes = [4, 64], strides = [1, 1]} : vector<4x256xf32> to vector<4x64xf32>
    %780 = arith.mulf %777, %719 : vector<4x64xf32>
    %781 = arith.mulf %776, %778 : vector<4x64xf32>
    %782 = arith.addf %780, %781 : vector<4x64xf32>
    %783 = math.tanh %782 : vector<4x64xf32>
    %784 = arith.mulf %779, %783 : vector<4x64xf32>
    %cst_170 = arith.constant dense<0.000000e+00> : vector<4x64xf32>
    %785 = tpu.matmul %784, %364, %cst_170 {dimension_numbers = #tpu.dot_dimension_numbers<[1], [0], [0], [1], [0, 0, 1, 1], [], []>} : vector<4x64xf32>, vector<64x64xf32>, vector<4x64xf32> -> vector<4x64xf32>
    %cst_171 = arith.constant dense<0.000000e+00> : vector<4x64xf32>
    %786 = tpu.matmul %741, %365, %cst_171 {dimension_numbers = #tpu.dot_dimension_numbers<[1], [0], [0], [1], [0, 0, 1, 1], [], []>} : vector<4x16xf32>, vector<16x64xf32>, vector<4x64xf32> -> vector<4x64xf32>
    %787 = arith.addf %785, %786 : vector<4x64xf32>
    %788 = vector.broadcast %366 : vector<1x64xf32> to vector<4x64xf32>
    %789 = arith.addf %787, %788 : vector<4x64xf32>
    %790 = arith.negf %789 : vector<4x64xf32>
    %791 = math.exp %790 : vector<4x64xf32>
    %cst_172 = arith.constant 1.000000e+00 : f32
    %792 = vector.broadcast %cst_172 : f32 to vector<4x64xf32>
    %793 = arith.addf %792, %791 : vector<4x64xf32>
    %794 = arith.divf %792, %793 : vector<4x64xf32>
    %795 = math.tanh %789 : vector<4x64xf32>
    %796 = vector.extract_strided_slice %794 {offsets = [0, 0], sizes = [4, 16], strides = [1, 1]} : vector<4x64xf32> to vector<4x16xf32>
    %797 = vector.extract_strided_slice %794 {offsets = [0, 16], sizes = [4, 16], strides = [1, 1]} : vector<4x64xf32> to vector<4x16xf32>
    %798 = vector.extract_strided_slice %795 {offsets = [0, 32], sizes = [4, 16], strides = [1, 1]} : vector<4x64xf32> to vector<4x16xf32>
    %799 = vector.extract_strided_slice %794 {offsets = [0, 48], sizes = [4, 16], strides = [1, 1]} : vector<4x64xf32> to vector<4x16xf32>
    %800 = arith.mulf %797, %739 : vector<4x16xf32>
    %801 = arith.mulf %796, %798 : vector<4x16xf32>
    %802 = arith.addf %800, %801 : vector<4x16xf32>
    %803 = math.tanh %802 : vector<4x16xf32>
    %804 = arith.mulf %799, %803 : vector<4x16xf32>
    %c6 = arith.constant 6 : index
    %c0_173 = arith.constant 0 : index
    %c0_174 = arith.constant 0 : index
    %805 = vector.load %arg3[%c6, %c0_173, %c0_174] : memref<8x4x16xf32, #tpu.memory_space<vmem>>, vector<1x4x16xf32>
    %806 = vector.shape_cast %805 : vector<1x4x16xf32> to vector<4x16xf32>
    %807 = vector.shape_cast %804 : vector<4x16xf32> to vector<1x4x16xf32>
    tpu.vector_store %arg3[%c6, %c0_173, %c0_174], %807 {strides = array<i32>} : memref<8x4x16xf32, #tpu.memory_space<vmem>>, vector<1x4x16xf32>,
    %cst_175 = arith.constant dense<0.000000e+00> : vector<4x128xf32>
    %808 = tpu.matmul %804, %359, %cst_175 {dimension_numbers = #tpu.dot_dimension_numbers<[1], [0], [0], [1], [0, 0, 1, 1], [], []>} : vector<4x16xf32>, vector<16x128xf32>, vector<4x128xf32> -> vector<4x128xf32>
    %cst_176 = arith.constant dense<0.000000e+00> : vector<4x128xf32>
    %809 = tpu.matmul %764, %358, %cst_176 {dimension_numbers = #tpu.dot_dimension_numbers<[1], [0], [0], [1], [0, 0, 1, 1], [], []>} : vector<4x32xf32>, vector<32x128xf32>, vector<4x128xf32> -> vector<4x128xf32>
    %810 = arith.addf %808, %809 : vector<4x128xf32>
    %811 = vector.broadcast %360 : vector<1x128xf32> to vector<4x128xf32>
    %812 = arith.addf %810, %811 : vector<4x128xf32>
    %813 = arith.negf %812 : vector<4x128xf32>
    %814 = math.exp %813 : vector<4x128xf32>
    %cst_177 = arith.constant 1.000000e+00 : f32
    %815 = vector.broadcast %cst_177 : f32 to vector<4x128xf32>
    %816 = arith.addf %815, %814 : vector<4x128xf32>
    %817 = arith.divf %815, %816 : vector<4x128xf32>
    %818 = math.tanh %812 : vector<4x128xf32>
    %819 = vector.extract_strided_slice %817 {offsets = [0, 0], sizes = [4, 32], strides = [1, 1]} : vector<4x128xf32> to vector<4x32xf32>
    %820 = vector.extract_strided_slice %817 {offsets = [0, 32], sizes = [4, 32], strides = [1, 1]} : vector<4x128xf32> to vector<4x32xf32>
    %821 = vector.extract_strided_slice %818 {offsets = [0, 64], sizes = [4, 32], strides = [1, 1]} : vector<4x128xf32> to vector<4x32xf32>
    %822 = vector.extract_strided_slice %817 {offsets = [0, 96], sizes = [4, 32], strides = [1, 1]} : vector<4x128xf32> to vector<4x32xf32>
    %823 = arith.mulf %820, %762 : vector<4x32xf32>
    %824 = arith.mulf %819, %821 : vector<4x32xf32>
    %825 = arith.addf %823, %824 : vector<4x32xf32>
    %826 = math.tanh %825 : vector<4x32xf32>
    %827 = arith.mulf %822, %826 : vector<4x32xf32>
    %cst_178 = arith.constant dense<0.000000e+00> : vector<4x256xf32>
    %828 = tpu.matmul %827, %361, %cst_178 {dimension_numbers = #tpu.dot_dimension_numbers<[1], [0], [0], [1], [0, 0, 1, 1], [], []>} : vector<4x32xf32>, vector<32x256xf32>, vector<4x256xf32> -> vector<4x256xf32>
    %cst_179 = arith.constant dense<0.000000e+00> : vector<4x256xf32>
    %829 = tpu.matmul %784, %362, %cst_179 {dimension_numbers = #tpu.dot_dimension_numbers<[1], [0], [0], [1], [0, 0, 1, 1], [], []>} : vector<4x64xf32>, vector<64x256xf32>, vector<4x256xf32> -> vector<4x256xf32>
    %830 = arith.addf %828, %829 : vector<4x256xf32>
    %831 = vector.broadcast %363 : vector<1x256xf32> to vector<4x256xf32>
    %832 = arith.addf %830, %831 : vector<4x256xf32>
    %833 = arith.negf %832 : vector<4x256xf32>
    %834 = math.exp %833 : vector<4x256xf32>
    %cst_180 = arith.constant 1.000000e+00 : f32
    %835 = vector.broadcast %cst_180 : f32 to vector<4x256xf32>
    %836 = arith.addf %835, %834 : vector<4x256xf32>
    %837 = arith.divf %835, %836 : vector<4x256xf32>
    %838 = math.tanh %832 : vector<4x256xf32>
    %839 = vector.extract_strided_slice %837 {offsets = [0, 0], sizes = [4, 64], strides = [1, 1]} : vector<4x256xf32> to vector<4x64xf32>
    %840 = vector.extract_strided_slice %837 {offsets = [0, 64], sizes = [4, 64], strides = [1, 1]} : vector<4x256xf32> to vector<4x64xf32>
    %841 = vector.extract_strided_slice %838 {offsets = [0, 128], sizes = [4, 64], strides = [1, 1]} : vector<4x256xf32> to vector<4x64xf32>
    %842 = vector.extract_strided_slice %837 {offsets = [0, 192], sizes = [4, 64], strides = [1, 1]} : vector<4x256xf32> to vector<4x64xf32>
    %843 = arith.mulf %840, %782 : vector<4x64xf32>
    %844 = arith.mulf %839, %841 : vector<4x64xf32>
    %845 = arith.addf %843, %844 : vector<4x64xf32>
    %846 = math.tanh %845 : vector<4x64xf32>
    %847 = arith.mulf %842, %846 : vector<4x64xf32>
    %cst_181 = arith.constant dense<0.000000e+00> : vector<4x64xf32>
    %848 = tpu.matmul %847, %364, %cst_181 {dimension_numbers = #tpu.dot_dimension_numbers<[1], [0], [0], [1], [0, 0, 1, 1], [], []>} : vector<4x64xf32>, vector<64x64xf32>, vector<4x64xf32> -> vector<4x64xf32>
    %cst_182 = arith.constant dense<0.000000e+00> : vector<4x64xf32>
    %849 = tpu.matmul %804, %365, %cst_182 {dimension_numbers = #tpu.dot_dimension_numbers<[1], [0], [0], [1], [0, 0, 1, 1], [], []>} : vector<4x16xf32>, vector<16x64xf32>, vector<4x64xf32> -> vector<4x64xf32>
    %850 = arith.addf %848, %849 : vector<4x64xf32>
    %851 = vector.broadcast %366 : vector<1x64xf32> to vector<4x64xf32>
    %852 = arith.addf %850, %851 : vector<4x64xf32>
    %853 = arith.negf %852 : vector<4x64xf32>
    %854 = math.exp %853 : vector<4x64xf32>
    %cst_183 = arith.constant 1.000000e+00 : f32
    %855 = vector.broadcast %cst_183 : f32 to vector<4x64xf32>
    %856 = arith.addf %855, %854 : vector<4x64xf32>
    %857 = arith.divf %855, %856 : vector<4x64xf32>
    %858 = math.tanh %852 : vector<4x64xf32>
    %859 = vector.extract_strided_slice %857 {offsets = [0, 0], sizes = [4, 16], strides = [1, 1]} : vector<4x64xf32> to vector<4x16xf32>
    %860 = vector.extract_strided_slice %857 {offsets = [0, 16], sizes = [4, 16], strides = [1, 1]} : vector<4x64xf32> to vector<4x16xf32>
    %861 = vector.extract_strided_slice %858 {offsets = [0, 32], sizes = [4, 16], strides = [1, 1]} : vector<4x64xf32> to vector<4x16xf32>
    %862 = vector.extract_strided_slice %857 {offsets = [0, 48], sizes = [4, 16], strides = [1, 1]} : vector<4x64xf32> to vector<4x16xf32>
    %863 = arith.mulf %860, %802 : vector<4x16xf32>
    %864 = arith.mulf %859, %861 : vector<4x16xf32>
    %865 = arith.addf %863, %864 : vector<4x16xf32>
    %866 = math.tanh %865 : vector<4x16xf32>
    %867 = arith.mulf %862, %866 : vector<4x16xf32>
    %c7 = arith.constant 7 : index
    %c0_184 = arith.constant 0 : index
    %c0_185 = arith.constant 0 : index
    %868 = vector.load %arg3[%c7, %c0_184, %c0_185] : memref<8x4x16xf32, #tpu.memory_space<vmem>>, vector<1x4x16xf32>
    %869 = vector.shape_cast %868 : vector<1x4x16xf32> to vector<4x16xf32>
    %870 = vector.shape_cast %867 : vector<4x16xf32> to vector<1x4x16xf32>
    tpu.vector_store %arg3[%c7, %c0_184, %c0_185], %870 {strides = array<i32>} : memref<8x4x16xf32, #tpu.memory_space<vmem>>, vector<1x4x16xf32>,
    return
  }
}

</mosaic_0001>

<bundles_post_ra>
// kernel: forward.1
= control target key start
LH: loop header
LB: loop body
LE: loop exit
PB: predicated region body
PF: predicated region fallthrough
CT: control target
= control target key end

     0   :  { %10 = vsyncpa [#allocation4], 0  ;;  %s9802_s0 = inlined_call_operand.hbm [shape: f32[32,8], index: 0, kind: input, shape index: {}]   ;;  %s9803_s1 = inlined_call_operand.hbm [shape: f32[456,128], index: 1, kind: input, shape index: {}]   ;;  %s9804_s2 = inlined_call_operand.hbm [shape: f32[144,256], index: 2, kind: input, shape index: {}]   ;;  %s9805_s3 = inlined_call_operand.hbm [shape: f32[8,4,16], index: 3, kind: output, shape index: {0}]   ;;  %s9806_s4 = inlined_call_operand.hbm [shape: f32[4,32], index: 4, kind: output, shape index: {1}]  }
   0x1   :  { %11 = vsyncpa [#allocation7], 0 }
   0x2   :  { %12 = vsyncpa [#allocation5], 0 }
   0x3   :  { %13 = vsyncpa [#allocation11], 0  ;;  %s8744_s15 = smov [#allocation6]   ;;  %s8745_s17 = smov [#allocation3]  }
   0x4   :  { %s31_s16 = sshll.u32 %s8744_s15, 4  ;;  %s19_s18 = sshll.u32 %s8745_s17, 4  ;;  %s32_s16 = int_to_ptr.vmem [resolvable:$true] %s31_s16  ;;  %s8788_s18 = int_to_ptr.vmem [resolvable:$true] %s19_s18 }
   0x5   :  { %s8626_s21 = scalar_lea.hbm %s9803_s1, 7296 }
   0x6   :  { %p8627_p0 = scmp.ne.s32.totalorder %s9803_s1, %s8626_s21  ;;  %p8630_p1 = scmp.lt.u32.totalorder %s8626_s21, %s9803_s1 }
   0x8   :  { %p8632_p2 = pnand %p8630_p1, %p8627_p0 }
   0xa   :  { %8635 = shalt.err (!%p8632_p2)
}
   0xb   :  { %s8636_s26 = scalar_lea.vmem %s32_s16, 7296  ;;  %p8641_p4 = scmp.lt.s32.totalorder %s32_s16, %s32_s16 }
   0xc   :  { %p8637_p3 = scmp.ne.s32.totalorder %s32_s16, %s8636_s26  ;;  %p8642_p5 = scmp.lt.s32.totalorder %s8636_s26, %s8636_s26 }
   0xe   :  { %p8643_p6 = por %p8642_p5, %p8641_p4 }
  0x10   :  { %p8644_p7 = pnand %p8643_p6, %p8637_p3 }
  0x12   :  { %8647 = shalt.err (!%p8644_p7)
}
  0x13   :  { %s8746_s27 = smov 128   ;;  %s8747_s28 = smov 8  }
  0x14   :  { %37 = dma.hbm_to_vmem [thread:$0]  %s9803_s1, 7296, %s32_s16, [#allocation7], %s8746_s27, %s8746_s27, %s8747_s28  }
  0x15   :  { %s8648_s7 = scalar_lea.hbm %s9802_s0, 512 }
  0x16   :  { %p8649_p8 = scmp.ne.s32.totalorder %s9802_s0, %s8648_s7  ;;  %p8652_p9 = scmp.lt.u32.totalorder %s8648_s7, %s9802_s0 }
  0x18   :  { %p8654_p10 = pnand %p8652_p9, %p8649_p8 }
  0x1a   :  { %8657 = shalt.err (!%p8654_p10)
}
  0x1b   :  { %s8658_s12 = scalar_lea.vmem %s8788_s18, 512  ;;  %p8663_p12 = scmp.lt.s32.totalorder %s8788_s18, %s8788_s18 }
  0x1c   :  { %p8659_p11 = scmp.ne.s32.totalorder %s8788_s18, %s8658_s12  ;;  %p8664_p13 = scmp.lt.s32.totalorder %s8658_s12, %s8658_s12 }
  0x1e   :  { %p8665_p0 = por %p8664_p13, %p8663_p12 }
  0x20   :  { %p8666_p1 = pnand %p8665_p0, %p8659_p11 }
  0x22   :  { %8669 = shalt.err (!%p8666_p1)
}
  0x23   :  { %25 = dma.hbm_to_vmem [thread:$0]  %s9802_s0, 512, %s8788_s18, [#allocation4], %s8746_s27, %s8746_s27, %s8747_s28  }
  0x24   :  { %s8748_s14 = smov [#allocation8]   ;;  %s8670_s19 = scalar_lea.hbm %s9804_s2, 4608 }
  0x25   :  { %s43_s15 = sshll.u32 %s8748_s14, 4  ;;  %p8671_p2 = scmp.ne.s32.totalorder %s9804_s2, %s8670_s19  ;;  %s44_s15 = int_to_ptr.vmem [resolvable:$true] %s43_s15 }
  0x26   :  { %p8674_p3 = scmp.lt.u32.totalorder %s8670_s19, %s9804_s2 }
  0x28   :  { %p8676_p4 = pnand %p8674_p3, %p8671_p2 }
  0x2a   :  { %8679 = shalt.err (!%p8676_p4)
}
  0x2b   :  { %s8680_s24 = scalar_lea.vmem %s44_s15, 4608  ;;  %p8685_p6 = scmp.lt.s32.totalorder %s44_s15, %s44_s15 }
  0x2c   :  { %p8681_p5 = scmp.ne.s32.totalorder %s44_s15, %s8680_s24  ;;  %p8686_p7 = scmp.lt.s32.totalorder %s8680_s24, %s8680_s24 }
  0x2e   :  { %p8687_p8 = por %p8686_p7, %p8685_p6 }
  0x30   :  { %p8688_p9 = pnand %p8687_p8, %p8681_p5 }
  0x32   :  { %8691 = shalt.err (!%p8688_p9)
}
  0x33   :  { %s8749_s0 = smov 256   ;;  %s8750_s18 = smov 16  }
  0x34   :  { %49 = dma.hbm_to_vmem [thread:$0]  %s9804_s2, 4608, %s44_s15, [#allocation7], %s8749_s0, %s8749_s0, %s8750_s18  }
  0x35   :  { %8736 = dma.done.wait [#allocation4], 512  }
  0x36   :  { %8737 = vsyncadd [#allocation4], 4294966784 }
  0x37   :  { %8738 = dma.done.wait [#allocation7], 11904  }
  0x38   :  { %8739 = vsyncadd [#allocation7], 4294955392  ;;  %v8751_v0 = vmov 0.0|0.0   ;;  %vm8752_vm0 = vmmov 0   ;;  %v8753_v1 = vmov 0.0   ;;  %vm80_vm1 = vcmask 64512  }
  0x39   :  { %7695 = vmatprep.subr.bf16.mxu1 %v8751_v0  ;;  %7090 = vmatprep.mubr.msk.f32.mxu1 %vm8752_vm0, %v8753_v1  ;;  %v60_v2 = vld [vmem:[#allocation6 + $0x8] sm:$0xff]  ;;  %v61_v3 = vld [vmem:[#allocation6 + $0x10] sm:$0xff]  ;;  %v59_v4 = vld [vmem:[#allocation6] sm:$0xff]  ;;  %s8754_s2 = smov 64   ;;  %s8755_s27 = smov 32   ;;  %vm178_vm2 = vcmask 261120  }
  0x3a   :  { %v8835_v5 = vpack.c.bf16 %v61_v3, %v60_v2  ;;  %7074 = vmatprep.subr.mxu0 %v59_v4  ;;  %v72_v6 = vld [vmem:[#allocation3] sm:$0xff]  ;;  %v73_v7 = vld [vmem:[#allocation3 + $0x8] sm:$0xff]  ;;  %v62_v8 = vld [vmem:[#allocation6 + $0x18] sm:$0xff]  ;;  %s8756_s28 = smov 96   ;;  %s8757_s29 = smov 80   ;;  %vm1731_vm3 = vcmask 125952  }
  0x3b   :  { %7075 = vmatpush3.msra.mxu0 %v59_v4  ;;  %7076 = vmatprep.mubr.msk.f32.mxu0 %vm80_vm1, %v72_v6  ;;  %v63_v9 = vld [vmem:[#allocation6 + $0x20] sm:$0xff]  ;;  %v8855_v12 = vld [vmem:[#allocation6 + $0x28] ss:$0 sm:$0xff]  ;;  %vm1629_vm4 = vcmask 130048   ;;  %s8758_s30 = smov 48   ;;  %vm1834_vm5 = vcmask 257152  }
  0x3c   :  { %7697 = vmatpush3.bf16.msra.mxu1 %v8835_v5  ;;  %7077 = vmatmul.mubr.msk.f32.vlgmr.msra.gmra.mrb[0].mxu0 %vm80_vm1, %v73_v7  ;;  %v8840_v10 = vpack.c.bf16 %v63_v9, %v62_v8  ;;  %s8759_s5 = smov 112   ;;  %vm1939_vm6 = vcmask 388352   ;;  %vm2040_vm7 = vcmask 519552   ;;  %vm2146_vm8 = vcmask 650752   ;;  %s8760_s6 = smov [#allocation10]  }
  0x3d   :  { %7698 = vmatprep.subr.bf16.mxu1 %v8751_v0  ;;  %7701 = vmatprep.subr.bf16.mxu0 %v8751_v0  ;;  %vm2251_vm9 = vcmask 781952   ;;  %vm2356_vm10 = vcmask 913152   ;;  %vm2461_vm11 = vcmask 1044352   ;;  %vm2569_vm12 = vcmask 523264   ;;  %s6650_s7 = sshll.u32 %s8760_s6, 4  ;;  %s6651_s7 = int_to_ptr.vmem [resolvable:$true] %s6650_s7 }
  0x3e   :  { %vm2644_vm13 = vcmask 257024   ;;  %s8692_s8 = scalar_lea.vmem %s6651_s7, 64  ;;  %p8697_p11 = scmp.lt.s32.totalorder %s6651_s7, %s6651_s7 }
  0x3f   :  { %p8693_p10 = scmp.ne.s32.totalorder %s6651_s7, %s8692_s8  ;;  %p8698_p12 = scmp.lt.s32.totalorder %s8692_s8, %s8692_s8 }
  0x40   :  { %7700 = vmatpush3.bf16.msra.mxu1 %v8840_v10 }
  0x41   :  { %7707 = vmatprep.subr.bf16.mxu1 %v8751_v0  ;;  %p8699_p13 = por %p8698_p12, %p8697_p11 }
  0x43   :  { %7091 = vmatmul.mubr.f32.vlgmr.msra.gmra.mrb[0].mxu1 %v8753_v1  ;;  %p8700_p0 = pnand %p8699_p13, %p8693_p10 }
  0x44   :  { %7709 = vmatpush3.bf16.msra.mxu1 %v8835_v5  ;;  %7112 = vmatprep.mubr.msk.f32.mxu1 %vm8752_vm0, %v8753_v1 }
  0x45   :  { %7710 = vmatprep.subr.bf16.mxu1 %v8751_v0 }
  0x48   :  { %7712 = vmatpush3.bf16.msra.mxu1 %v8840_v10 }
  0x49   :  { %7719 = vmatprep.subr.bf16.mxu1 %v8751_v0 }
 0x10f   :  { %v8853_v11 = vpop.f32.mrb[0].mxu0 }
 0x110   :  { %v159_v13 = vpop.f32.mrb[1].mxu0  ;;  %v165_v52 = vadd.f32 %v8853_v11, %v8855_v12 }
 0x111   :  { %v160_v14 = vadd.f32 %v8855_v12, %v159_v13 }
 0x116   :  { %v248_v15 = vpop.f32.mrb[0].mxu1 }
 0x117   :  { %v252_v16 = vadd.f32 %v248_v15, %v160_v14  ;;  %v7092_v17 = vpop.f32.mrb[1].mxu1 }
 0x119   :  { %8272 = vtanh.f32 %v252_v16  ;;  %v6669_v19 = vmul.f32 -1.442695, %v252_v16 }
 0x11b   :  { %8274 = vpow2.f32 %v6669_v19 }
 0x123   :  { %v8273_v18 = vpop.eup %8272 }
 0x124   :  { %262 = vrot.lane.b32.xlu0 %v8273_v18, %s8754_s2 }
 0x125   :  { %v8275_v20 = vpop.eup %8274 }
 0x126   :  { %v256_v21 = vadd.f32 1.0, %v8275_v20 }
 0x128   :  { %8276 = vrcp.f32 %v256_v21 }
 0x132   :  { %v8277_v22 = vpop.eup %8276 }
 0x133   :  { %v260_v25 = vmul.f32 0.0, %v8277_v22 }
 0x196   :  { %v263_v23 = vpop.permute.xlu0 %262 }
 0x197   :  { %v265_v24 = vmul.f32 %v8277_v22, %v263_v23 }
 0x199   :  { %267 = vrot.lane.b32.xlu0 %v265_v24, %s8755_s27 }
 0x20b   :  { %v268_v26 = vpop.permute.xlu0 %267 }
 0x20c   :  { %v270_v27 = vadd.f32 %v268_v26, %v260_v25 }
 0x20e   :  { %8278 = vtanh.f32 %v270_v27  ;;  %v444_v43 = vrot.slane %v270_v27, 4  ;;  %v74_v27 = vld [vmem:[#allocation3 + $0x10] sm:$0xff] }
 0x20f   :  { %7079 = vmatprep.mubr.msk.f32.mxu0 %vm80_vm1, %v74_v27 }
 0x218   :  { %v8279_v28 = vpop.eup %8278 }
 0x219   :  { %273 = vrot.lane.b32.xlu1 %v8279_v28, %s8754_s2  ;;  %v75_v28 = vld [vmem:[#allocation3 + $0x18] sm:$0xff] }
 0x21a   :  { %7080 = vmatmul.mubr.msk.f32.gmra.mrb[2].mxu0 %vm80_vm1, %v75_v28 }
 0x21b   :  { %7101 = vmatprep.mubr.msk.f32.mxu0 %vm8752_vm0, %v8753_v1 }
 0x28b   :  { %v274_v29 = vpop.permute.xlu1 %273 }
 0x28c   :  { %v8861_v30 = vmul.f32 %v8277_v22, %v274_v29 }
 0x28e   :  { %358 = vrot.lane.b32.xlu1 %v8861_v30, %s8755_s27 }
 0x300   :  { %v359_v31 = vpop.permute.xlu1 %358 }
 0x301   :  { %7113 = vmatmul.mubr.msk.f32.vlgmr.msra.gmra.mrb[2].mxu1 %vm178_vm2, %v359_v31 }
 0x302   :  { %7721 = vmatpush3.bf16.msra.mxu1 %v8835_v5  ;;  %7134 = vmatprep.mubr.msk.f32.mxu1 %vm8752_vm0, %v8753_v1 }
 0x303   :  { %7722 = vmatprep.subr.bf16.mxu1 %v8751_v0 }
 0x306   :  { %7724 = vmatpush3.bf16.msra.mxu1 %v8840_v10 }
 0x307   :  { %7731 = vmatprep.subr.bf16.mxu1 %v8751_v0 }
 0x3d4   :  { %v428_v32 = vpop.f32.mrb[2].mxu1 }
 0x3d5   :  { %v433_v33 = vrot.slane %v428_v32, 4  ;;  %v7114_v34 = vpop.f32.mrb[3].mxu1 }
 0x3d6   :  { %v8913_v34 = vpop.f32.mrb[2].mxu0 }
 0x3d7   :  { %v435_v35 = vadd.f32 %v433_v33, %v160_v14 }
 0x3d9   :  { %8280 = vtanh.f32 %v435_v35  ;;  %v6673_v37 = vmul.f32 -1.442695, %v435_v35  ;;  %v169_v35 = vpop.f32.mrb[3].mxu0 }
 0x3db   :  { %8282 = vpow2.f32 %v6673_v37  ;;  %v170_v37 = vadd.f32 %v8855_v12, %v169_v35 }
 0x3e3   :  { %v8281_v36 = vpop.eup %8280 }
 0x3e4   :  { %448 = vrot.lane.b32.xlu0 %v8281_v36, %s8754_s2 }
 0x3e5   :  { %v8283_v38 = vpop.eup %8282 }
 0x3e6   :  { %v439_v39 = vadd.f32 1.0, %v8283_v38 }
 0x3e8   :  { %8284 = vrcp.f32 %v439_v39 }
 0x3f2   :  { %v8285_v40 = vpop.eup %8284 }
 0x3f3   :  { %v446_v44 = vmul.f32 %v8285_v40, %v444_v43 }
 0x456   :  { %v449_v41 = vpop.permute.xlu0 %448 }
 0x457   :  { %v451_v42 = vmul.f32 %v8285_v40, %v449_v41 }
 0x459   :  { %453 = vrot.lane.b32.xlu1 %v451_v42, %s8755_s27 }
 0x4cb   :  { %v454_v45 = vpop.permute.xlu1 %453 }
 0x4cc   :  { %v456_v46 = vadd.f32 %v454_v45, %v446_v44 }
 0x4ce   :  { %8286 = vtanh.f32 %v456_v46  ;;  %v625_v63 = vrot.slane %v456_v46, 4 }
 0x4d8   :  { %v8287_v47 = vpop.eup %8286 }
 0x4d9   :  { %459 = vrot.lane.b32.xlu0 %v8287_v47, %s8754_s2 }
 0x54b   :  { %v460_v48 = vpop.permute.xlu0 %459 }
 0x54c   :  { %v8875_v49 = vmul.f32 %v8285_v40, %v460_v48 }
 0x54e   :  { %v541_v50 = vrot.slane %v8875_v49, 4 }
 0x550   :  { %542 = vrot.lane.b32.xlu1 %v541_v50, %s8755_s27 }
 0x5c2   :  { %v543_v51 = vpop.permute.xlu1 %542 }
 0x5c3   :  { %7135 = vmatmul.mubr.msk.f32.vlgmr.msra.gmra.mrb[4].mxu1 %vm178_vm2, %v543_v51 }
 0x5c4   :  { %7733 = vmatpush3.bf16.msra.mxu1 %v8835_v5  ;;  %7156 = vmatprep.mubr.msk.f32.mxu1 %vm8752_vm0, %v8753_v1 }
 0x5c5   :  { %7734 = vmatprep.subr.bf16.mxu1 %v8751_v0 }
 0x5c8   :  { %7736 = vmatpush3.bf16.msra.mxu1 %v8840_v10 }
 0x5c9   :  { %7743 = vmatprep.subr.bf16.mxu1 %v8751_v0 }
 0x696   :  { %v612_v53 = vpop.f32.mrb[4].mxu1 }
 0x697   :  { %v616_v54 = vadd.f32 %v612_v53, %v165_v52  ;;  %v7136_v55 = vpop.f32.mrb[5].mxu1 }
 0x699   :  { %8288 = vtanh.f32 %v616_v54  ;;  %v6676_v57 = vmul.f32 -1.442695, %v616_v54 }
 0x69b   :  { %8290 = vpow2.f32 %v6676_v57 }
 0x6a3   :  { %v8289_v56 = vpop.eup %8288 }
 0x6a4   :  { %629 = vrot.lane.b32.xlu0 %v8289_v56, %s8754_s2 }
 0x6a5   :  { %v8291_v58 = vpop.eup %8290 }
 0x6a6   :  { %v620_v59 = vadd.f32 1.0, %v8291_v58 }
 0x6a8   :  { %8292 = vrcp.f32 %v620_v59 }
 0x6b2   :  { %v8293_v60 = vpop.eup %8292 }
 0x6b3   :  { %v627_v2 = vmul.f32 %v8293_v60, %v625_v63 }
 0x716   :  { %v630_v61 = vpop.permute.xlu0 %629 }
 0x717   :  { %v632_v62 = vmul.f32 %v8293_v60, %v630_v61 }
 0x719   :  { %634 = vrot.lane.b32.xlu1 %v632_v62, %s8755_s27 }
 0x78b   :  { %v635_v3 = vpop.permute.xlu1 %634 }
 0x78c   :  { %v637_v4 = vadd.f32 %v635_v3, %v627_v2 }
 0x78e   :  { %8294 = vtanh.f32 %v637_v4  ;;  %v807_v23 = vrot.slane %v637_v4, 4 }
 0x798   :  { %v8295_v6 = vpop.eup %8294 }
 0x799   :  { %640 = vrot.lane.b32.xlu0 %v8295_v6, %s8754_s2 }
 0x80b   :  { %v641_v7 = vpop.permute.xlu0 %640 }
 0x80c   :  { %v8891_v8 = vmul.f32 %v8293_v60, %v641_v7 }
 0x80e   :  { %721 = vrot.lane.b32.xlu1 %v8891_v8, %s8755_s27 }
 0x880   :  { %v722_v9 = vpop.permute.xlu1 %721 }
 0x881   :  { %7157 = vmatmul.mubr.msk.f32.vlgmr.msra.gmra.mrb[6].mxu1 %vm178_vm2, %v722_v9 }
 0x882   :  { %7745 = vmatpush3.bf16.msra.mxu1 %v8835_v5  ;;  %7178 = vmatprep.mubr.msk.f32.mxu1 %vm8752_vm0, %v8753_v1 }
 0x883   :  { %7746 = vmatprep.subr.bf16.mxu1 %v8751_v0 }
 0x886   :  { %7748 = vmatpush3.bf16.msra.mxu1 %v8840_v10 }
 0x887   :  { %7755 = vmatprep.subr.bf16.mxu1 %v8751_v0 }
 0x954   :  { %v791_v11 = vpop.f32.mrb[6].mxu1 }
 0x955   :  { %v796_v13 = vrot.slane %v791_v11, 4  ;;  %v7158_v14 = vpop.f32.mrb[7].mxu1 }
 0x957   :  { %v798_v15 = vadd.f32 %v796_v13, %v165_v52 }
 0x959   :  { %8296 = vtanh.f32 %v798_v15  ;;  %v6679_v17 = vmul.f32 -1.442695, %v798_v15 }
 0x95b   :  { %8298 = vpow2.f32 %v6679_v17 }
 0x963   :  { %v8297_v16 = vpop.eup %8296 }
 0x964   :  { %811 = vrot.lane.b32.xlu0 %v8297_v16, %s8754_s2 }
 0x965   :  { %v8299_v18 = vpop.eup %8298 }
 0x966   :  { %v802_v19 = vadd.f32 1.0, %v8299_v18 }
 0x968   :  { %8300 = vrcp.f32 %v802_v19  ;;  %v175_v19 = vadd.f32 %v8913_v34, %v8855_v12 }
 0x972   :  { %v8301_v20 = vpop.eup %8300 }
 0x973   :  { %v809_v24 = vmul.f32 %v8301_v20, %v807_v23 }
 0x9d6   :  { %v812_v21 = vpop.permute.xlu0 %811 }
 0x9d7   :  { %v814_v22 = vmul.f32 %v8301_v20, %v812_v21 }
 0x9d9   :  { %816 = vrot.lane.b32.xlu1 %v814_v22, %s8755_s27 }
 0xa4b   :  { %v817_v25 = vpop.permute.xlu1 %816 }
 0xa4c   :  { %v819_v26 = vadd.f32 %v817_v25, %v809_v24 }
 0xa4e   :  { %8302 = vtanh.f32 %v819_v26  ;;  %v988_v48 = vrot.slane %v819_v26, 4 }
 0xa58   :  { %v8303_v29 = vpop.eup %8302 }
 0xa59   :  { %822 = vrot.lane.b32.xlu0 %v8303_v29, %s8754_s2 }
 0xacb   :  { %v823_v31 = vpop.permute.xlu0 %822 }
 0xacc   :  { %v8909_v32 = vmul.f32 %v8301_v20, %v823_v31 }
 0xace   :  { %v904_v33 = vrot.slane %v8909_v32, 4 }
 0xad0   :  { %905 = vrot.lane.b32.xlu1 %v904_v33, %s8755_s27 }
 0xb42   :  { %v906_v36 = vpop.permute.xlu1 %905 }
 0xb43   :  { %7179 = vmatmul.mubr.msk.f32.vlgmr.msra.gmra.mrb[8].mxu1 %vm178_vm2, %v906_v36 }
 0xb44   :  { %7757 = vmatpush3.bf16.msra.mxu1 %v8835_v5  ;;  %7200 = vmatprep.mubr.msk.f32.mxu1 %vm8752_vm0, %v8753_v1 }
 0xb45   :  { %7758 = vmatprep.subr.bf16.mxu1 %v8751_v0 }
 0xb48   :  { %7760 = vmatpush3.bf16.msra.mxu1 %v8840_v10 }
 0xb49   :  { %7767 = vmatprep.subr.bf16.mxu1 %v8751_v0 }
 0xc16   :  { %v975_v38 = vpop.f32.mrb[8].mxu1 }
 0xc17   :  { %v979_v39 = vadd.f32 %v975_v38, %v170_v37  ;;  %v7180_v40 = vpop.f32.mrb[9].mxu1 }
 0xc19   :  { %8304 = vtanh.f32 %v979_v39  ;;  %v6682_v42 = vmul.f32 -1.442695, %v979_v39 }
 0xc1b   :  { %8306 = vpow2.f32 %v6682_v42  ;;  %v65_v42 = vld [vmem:[#allocation6 + $0x30] sm:$0xff] }
 0xc23   :  { %v8305_v41 = vpop.eup %8304 }
 0xc24   :  { %992 = vrot.lane.b32.xlu0 %v8305_v41, %s8754_s2 }
 0xc25   :  { %v8307_v43 = vpop.eup %8306 }
 0xc26   :  { %v983_v44 = vadd.f32 1.0, %v8307_v43  ;;  %v66_v43 = vld [vmem:[#allocation6 + $0x38] sm:$0xff] }
 0xc28   :  { %8308 = vrcp.f32 %v983_v44  ;;  %v8961_v44 = vpack.c.bf16 %v66_v43, %v65_v42 }
 0xc2a   :  { %7703 = vmatpush3.bf16.msra.mxu0 %v8961_v44 }
 0xc2b   :  { %7704 = vmatprep.subr.bf16.mxu0 %v8751_v0 }
 0xc32   :  { %v8309_v45 = vpop.eup %8308 }
 0xc33   :  { %v990_v50 = vmul.f32 %v8309_v45, %v988_v48  ;;  %v67_v48 = vld [vmem:[#allocation6 + $0x40] sm:$0xff] }
 0xc96   :  { %v993_v46 = vpop.permute.xlu0 %992 }
 0xc97   :  { %v995_v47 = vmul.f32 %v8309_v45, %v993_v46 }
 0xc99   :  { %997 = vrot.lane.b32.xlu1 %v995_v47, %s8755_s27 }
 0xd0b   :  { %v998_v51 = vpop.permute.xlu1 %997 }
 0xd0c   :  { %v1000_v52 = vadd.f32 %v998_v51, %v990_v50  ;;  %v68_v50 = vld [vmem:[#allocation6 + $0x48] sm:$0xff] }
 0xd0d   :  { %v8965_v51 = vpack.c.bf16 %v68_v50, %v67_v48 }
 0xd0e   :  { %8310 = vtanh.f32 %v1000_v52  ;;  %v1170_v7 = vrot.slane %v1000_v52, 4 }
 0xd0f   :  { %7706 = vmatpush3.bf16.msra.mxu0 %v8965_v51 }
 0xd10   :  { %7713 = vmatprep.subr.bf16.mxu0 %v8751_v0 }
 0xd18   :  { %v8311_v53 = vpop.eup %8310 }
 0xd19   :  { %1003 = vrot.lane.b32.xlu0 %v8311_v53, %s8754_s2 }
 0xd8b   :  { %v1004_v54 = vpop.permute.xlu0 %1003 }
 0xd8c   :  { %v8926_v55 = vmul.f32 %v8309_v45, %v1004_v54 }
 0xd8e   :  { %1084 = vrot.lane.b32.xlu1 %v8926_v55, %s8755_s27 }
 0xe00   :  { %v1085_v56 = vpop.permute.xlu1 %1084 }
 0xe01   :  { %7201 = vmatmul.mubr.msk.f32.vlgmr.msra.gmra.mrb[10].mxu1 %vm178_vm2, %v1085_v56  ;;  %v277_v56 = vmax.f32 %v8861_v30, 0.0  ;;  %v463_v30 = vmax.f32 %v8875_v49, 0.0 }
 0xe02   :  { %7769 = vmatpush3.bf16.msra.mxu1 %v8835_v5  ;;  %7222 = vmatprep.mubr.msk.f32.mxu1 %vm8752_vm0, %v8753_v1 }
 0xe03   :  { %7770 = vmatprep.subr.bf16.mxu1 %v8751_v0 }
 0xe06   :  { %7772 = vmatpush3.bf16.msra.mxu1 %v8840_v10 }
 0xe07   :  { %7779 = vmatprep.subr.bf16.mxu1 %v8751_v0 }
 0xed4   :  { %v1154_v57 = vpop.f32.mrb[10].mxu1 }
 0xed5   :  { %v1159_v58 = vrot.slane %v1154_v57, 4  ;;  %v7202_v59 = vpop.f32.mrb[11].mxu1  ;;  %v644_v57 = vmax.f32 %v8891_v8, 0.0 }
 0xed7   :  { %v1161_v60 = vadd.f32 %v1159_v58, %v170_v37  ;;  %v1007_v58 = vmax.f32 %v8926_v55, 0.0  ;;  %v826_v55 = vmax.f32 %v8909_v32, 0.0 }
 0xed9   :  { %8312 = vtanh.f32 %v1161_v60  ;;  %v6685_v62 = vmul.f32 -1.442695, %v1161_v60 }
 0xedb   :  { %8314 = vpow2.f32 %v6685_v62 }
 0xee3   :  { %v8313_v61 = vpop.eup %8312 }
 0xee4   :  { %1174 = vrot.lane.b32.xlu0 %v8313_v61, %s8754_s2 }
 0xee5   :  { %v8315_v63 = vpop.eup %8314 }
 0xee6   :  { %v1165_v2 = vadd.f32 1.0, %v8315_v63 }
 0xee8   :  { %8316 = vrcp.f32 %v1165_v2 }
 0xef2   :  { %v8317_v3 = vpop.eup %8316 }
 0xef3   :  { %v1172_v9 = vmul.f32 %v8317_v3, %v1170_v7 }
 0xf56   :  { %v1175_v4 = vpop.permute.xlu0 %1174 }
 0xf57   :  { %v1177_v6 = vmul.f32 %v8317_v3, %v1175_v4 }
 0xf59   :  { %1179 = vrot.lane.b32.xlu1 %v1177_v6, %s8755_s27  ;;  %v828_v6 = vrot.slane %v826_v55, 4 }
 0xfcb   :  { %v1180_v11 = vpop.permute.xlu1 %1179 }
 0xfcc   :  { %v1182_v13 = vadd.f32 %v1180_v11, %v1172_v9 }
 0xfce   :  { %8318 = vtanh.f32 %v1182_v13  ;;  %v1351_v28 = vrot.slane %v1182_v13, 4 }
 0xfd8   :  { %v8319_v14 = vpop.eup %8318 }
 0xfd9   :  { %1185 = vrot.lane.b32.xlu0 %v8319_v14, %s8754_s2 }
0x104b   :  { %v1186_v15 = vpop.permute.xlu0 %1185 }
0x104c   :  { %v8940_v16 = vmul.f32 %v8317_v3, %v1186_v15  ;;  %v465_v3 = vrot.slane %v463_v30, 4 }
0x104e   :  { %v1267_v17 = vrot.slane %v8940_v16, 4  ;;  %v1189_v4 = vmax.f32 %v8940_v16, 0.0 }
0x1050   :  { %1268 = vrot.lane.b32.xlu1 %v1267_v17, %s8755_s27  ;;  %v1191_v7 = vrot.slane %v1189_v4, 4 }
0x10c2   :  { %v1269_v18 = vpop.permute.xlu1 %1268 }
0x10c3   :  { %7223 = vmatmul.mubr.msk.f32.vlgmr.msra.gmra.mrb[12].mxu1 %vm178_vm2, %v1269_v18 }
0x10c4   :  { %7781 = vmatpush3.bf16.msra.mxu1 %v8835_v5  ;;  %7244 = vmatprep.mubr.msk.f32.mxu1 %vm8752_vm0, %v8753_v1 }
0x10c5   :  { %7782 = vmatprep.subr.bf16.mxu1 %v8751_v0 }
0x10c8   :  { %7784 = vmatpush3.bf16.msra.mxu1 %v8840_v10 }
0x10c9   :  { %7815 = vmatprep.subr.bf16.mxu1 %v8751_v0 }
0x1196   :  { %v1338_v20 = vpop.f32.mrb[12].mxu1 }
0x1197   :  { %v1342_v21 = vadd.f32 %v1338_v20, %v175_v19  ;;  %v7224_v22 = vpop.f32.mrb[13].mxu1  ;;  %v70_v20 = vld [vmem:[#allocation6 + $0x58] sm:$0xff] }
0x1199   :  { %8320 = vtanh.f32 %v1342_v21  ;;  %v6688_v5 = vmul.f32 -1.442695, %v1342_v21 }
0x119b   :  { %8322 = vpow2.f32 %v6688_v5 }
0x11a3   :  { %v8321_v23 = vpop.eup %8320 }
0x11a4   :  { %1355 = vrot.lane.b32.xlu0 %v8321_v23, %s8754_s2  ;;  %v9046_v23 = vld [vmem:[#allocation6 + $0x60] ss:$0 sm:$0xff] }
0x11a5   :  { %v8323_v24 = vpop.eup %8322 }
0x11a6   :  { %v1346_v25 = vadd.f32 1.0, %v8323_v24 }
0x11a8   :  { %8324 = vrcp.f32 %v1346_v25 }
0x11b2   :  { %v8325_v26 = vpop.eup %8324 }
0x11b3   :  { %v1353_v29 = vmul.f32 %v8325_v26, %v1351_v28 }
0x1216   :  { %v1356_v27 = vpop.permute.xlu0 %1355 }
0x1217   :  { %v1358_v10 = vmul.f32 %v8325_v26, %v1356_v27 }
0x1219   :  { %1360 = vrot.lane.b32.xlu1 %v1358_v10, %s8755_s27 }
0x128b   :  { %v1361_v12 = vpop.permute.xlu1 %1360 }
0x128c   :  { %v1363_v31 = vadd.f32 %v1361_v12, %v1353_v29 }
0x128e   :  { %8326 = vtanh.f32 %v1363_v31  ;;  %v1533_v60 = vrot.slane %v1363_v31, 4 }
0x1298   :  { %v8327_v33 = vpop.eup %8326 }
0x1299   :  { %1366 = vrot.lane.b32.xlu0 %v8327_v33, %s8754_s2 }
0x130b   :  { %v1367_v34 = vpop.permute.xlu0 %1366 }
0x130c   :  { %v1369_v35 = vmul.f32 %v8325_v26, %v1367_v34 }
0x130e   :  { %1447 = vrot.lane.b32.xlu1 %v1369_v35, %s8755_s27  ;;  %v1370_v59 = vmax.f32 %v1369_v35, 0.0 }
0x1380   :  { %v1448_v36 = vpop.permute.xlu1 %1447 }
0x1381   :  { %7245 = vmatmul.mubr.msk.f32.vlgmr.msra.gmra.mrb[14].mxu1 %vm178_vm2, %v1448_v36 }
0x1382   :  { %7346 = vmatprep.mubr.msk.f32.mxu1 %vm8752_vm0, %v8753_v1 }
0x1454   :  { %v1517_v37 = vpop.f32.mrb[14].mxu1 }
0x1455   :  { %v1522_v38 = vrot.slane %v1517_v37, 4  ;;  %v7246_v39 = vpop.f32.mrb[15].mxu1 }
0x1457   :  { %v1524_v40 = vadd.f32 %v1522_v38, %v175_v19  ;;  %v69_v19 = vld [vmem:[#allocation6 + $0x50] sm:$0xff] }
0x1458   :  { %v9034_v21 = vpack.c.bf16 %v70_v20, %v69_v19 }
0x1459   :  { %8328 = vtanh.f32 %v1524_v40  ;;  %v6691_v45 = vmul.f32 -1.442695, %v1524_v40 }
0x145b   :  { %8330 = vpow2.f32 %v6691_v45 }
0x1463   :  { %v8329_v41 = vpop.eup %8328 }
0x1464   :  { %1537 = vrot.lane.b32.xlu0 %v8329_v41, %s8754_s2 }
0x1465   :  { %v8331_v46 = vpop.eup %8330 }
0x1466   :  { %v1528_v47 = vadd.f32 1.0, %v8331_v46 }
0x1468   :  { %8332 = vrcp.f32 %v1528_v47 }
0x1472   :  { %v8333_v52 = vpop.eup %8332 }
0x1473   :  { %v1535_v61 = vmul.f32 %v8333_v52, %v1533_v60 }
0x14d6   :  { %v1538_v53 = vpop.permute.xlu0 %1537 }
0x14d7   :  { %v1540_v54 = vmul.f32 %v8333_v52, %v1538_v53 }
0x14d9   :  { %1542 = vrot.lane.b32.xlu1 %v1540_v54, %s8755_s27 }
0x14dd   :  { %283 = vrot.lane.b32.xlu1 %v277_v56, %s8755_s27 }
0x14e1   :  { %646 = vrot.lane.b32.xlu1 %v644_v57, %s8755_s27 }
0x14e5   :  { %1009 = vrot.lane.b32.xlu1 %v1007_v58, %s8755_s27 }
0x14e9   :  { %1372 = vrot.lane.b32.xlu1 %v1370_v59, %s8755_s27 }
0x154b   :  { %v1543_v62 = vpop.permute.xlu1 %1542 }
0x154c   :  { %v1545_v63 = vadd.f32 %v1543_v62, %v1535_v61 }
0x154e   :  { %8334 = vtanh.f32 %v1545_v63 }
0x154f   :  { %v284_v2 = vpop.permute.xlu1 %283 }
0x1550   :  { %7102 = vmatmul.mubr.msk.f32.vlgmr.msra.gmra.mrb[4].mxu0 %vm178_vm2, %v284_v2 }
0x1551   :  { %7715 = vmatpush3.bf16.msra.mxu0 %v8961_v44  ;;  %7123 = vmatprep.mubr.msk.f32.mxu0 %vm8752_vm0, %v8753_v1 }
0x1552   :  { %7716 = vmatprep.subr.bf16.mxu0 %v8751_v0 }
0x1553   :  { %v647_v32 = vpop.permute.xlu1 %646 }
0x1555   :  { %7718 = vmatpush3.bf16.msra.mxu0 %v8965_v51 }
0x1556   :  { %7725 = vmatprep.subr.bf16.mxu0 %v8751_v0 }
0x1557   :  { %v1010_v16 = vpop.permute.xlu1 %1009 }
0x1558   :  { %v8335_v8 = vpop.eup %8334 }
0x1559   :  { %1548 = vrot.lane.b32.xlu0 %v8335_v8, %s8754_s2 }
0x155b   :  { %v1373_v18 = vpop.permute.xlu1 %1372 }
0x155d   :  { %466 = vrot.lane.b32.xlu0 %v465_v3, %s8755_s27 }
0x1561   :  { %829 = vrot.lane.b32.xlu0 %v828_v6, %s8755_s27 }
0x1565   :  { %1192 = vrot.lane.b32.xlu0 %v1191_v7, %s8755_s27 }
0x15cb   :  { %v1549_v9 = vpop.permute.xlu0 %1548 }
0x15cc   :  { %v1551_v11 = vmul.f32 %v8333_v52, %v1549_v9 }
0x15ce   :  { %v1552_v13 = vmax.f32 %v1551_v11, 0.0 }
0x15cf   :  { %v467_v49 = vpop.permute.xlu0 %466 }
0x15d0   :  { %v1554_v14 = vrot.slane %v1552_v13, 4  ;;  %7124 = vmatmul.mubr.msk.f32.vlgmr.msra.gmra.mrb[6].mxu0 %vm178_vm2, %v467_v49 }
0x15d1   :  { %7727 = vmatpush3.bf16.msra.mxu0 %v8961_v44  ;;  %7145 = vmatprep.mubr.msk.f32.mxu0 %vm8752_vm0, %v8753_v1 }
0x15d2   :  { %1555 = vrot.lane.b32.xlu0 %v1554_v14, %s8755_s27  ;;  %7728 = vmatprep.subr.bf16.mxu0 %v8751_v0 }
0x15d3   :  { %v830_v15 = vpop.permute.xlu0 %829 }
0x15d5   :  { %7730 = vmatpush3.bf16.msra.mxu0 %v8965_v51 }
0x15d6   :  { %7737 = vmatprep.subr.bf16.mxu0 %v8751_v0 }
0x15d7   :  { %v1193_v17 = vpop.permute.xlu0 %1192 }
0x15d8   :  { %7146 = vmatmul.mubr.msk.f32.vlgmr.msra.gmra.mrb[8].mxu0 %vm178_vm2, %v647_v32 }
0x15d9   :  { %7739 = vmatpush3.bf16.msra.mxu0 %v8961_v44  ;;  %7167 = vmatprep.mubr.msk.f32.mxu0 %vm8752_vm0, %v8753_v1 }
0x15da   :  { %7740 = vmatprep.subr.bf16.mxu0 %v8751_v0 }
0x15dd   :  { %7742 = vmatpush3.bf16.msra.mxu0 %v8965_v51 }
0x15de   :  { %7749 = vmatprep.subr.bf16.mxu0 %v8751_v0 }
0x15e0   :  { %7168 = vmatmul.mubr.msk.f32.vlgmr.msra.gmra.mrb[10].mxu0 %vm178_vm2, %v830_v15 }
0x15e1   :  { %7751 = vmatpush3.bf16.msra.mxu0 %v8961_v44  ;;  %7189 = vmatprep.mubr.msk.f32.mxu0 %vm8752_vm0, %v8753_v1 }
0x15e2   :  { %7752 = vmatprep.subr.bf16.mxu0 %v8751_v0 }
0x15e5   :  { %7754 = vmatpush3.bf16.msra.mxu0 %v8965_v51 }
0x15e6   :  { %7761 = vmatprep.subr.bf16.mxu0 %v8751_v0 }
0x15e8   :  { %7190 = vmatmul.mubr.msk.f32.vlgmr.msra.gmra.mrb[12].mxu0 %vm178_vm2, %v1010_v16 }
0x15e9   :  { %7763 = vmatpush3.bf16.msra.mxu0 %v8961_v44  ;;  %7211 = vmatprep.mubr.msk.f32.mxu0 %vm8752_vm0, %v8753_v1 }
0x15ea   :  { %7764 = vmatprep.subr.bf16.mxu0 %v8751_v0 }
0x15ed   :  { %7766 = vmatpush3.bf16.msra.mxu0 %v8965_v51 }
0x15ee   :  { %7773 = vmatprep.subr.bf16.mxu0 %v8751_v0 }
0x15f0   :  { %7212 = vmatmul.mubr.msk.f32.vlgmr.msra.gmra.mrb[14].mxu0 %vm178_vm2, %v1193_v17 }
0x15f1   :  { %7775 = vmatpush3.bf16.msra.mxu0 %v8961_v44  ;;  %7233 = vmatprep.mubr.msk.f32.mxu0 %vm8752_vm0, %v8753_v1 }
0x15f2   :  { %7776 = vmatprep.subr.bf16.mxu0 %v8751_v0 }
0x15f5   :  { %7778 = vmatpush3.bf16.msra.mxu0 %v8965_v51 }
0x15f6   :  { %7785 = vmatprep.subr.bf16.mxu0 %v8751_v0 }
0x15f8   :  { %7234 = vmatmul.mubr.msk.f32.vlgmr.msra.gmra.mrb[16].mxu0 %vm178_vm2, %v1373_v18 }
0x15f9   :  { %7787 = vmatpush3.bf16.msra.mxu0 %v8961_v44  ;;  %7255 = vmatprep.mubr.msk.f32.mxu0 %vm8752_vm0, %v8753_v1 }
0x15fa   :  { %7788 = vmatprep.subr.bf16.mxu0 %v8751_v0 }
0x15fd   :  { %7790 = vmatpush3.bf16.msra.mxu0 %v8965_v51 }
0x15fe   :  { %7791 = vmatprep.subr.bf16.mxu0 %v8751_v0 }
0x1644   :  { %v1556_v22 = vpop.permute.xlu0 %1555 }
0x1645   :  { %7256 = vmatmul.mubr.msk.f32.vlgmr.msra.gmra.mrb[18].mxu0 %vm178_vm2, %v1556_v22 }
0x1646   :  { %7793 = vmatpush3.bf16.msra.mxu0 %v9034_v21  ;;  %7262 = vmatprep.mubr.msk.f32.mxu0 %vm8752_vm0, %v8753_v1 }
0x1647   :  { %7794 = vmatprep.subr.bf16.mxu0 %v8751_v0 }
0x1649   :  { %7263 = vmatmul.mubr.f32.vlgmr.msra.gmra.mrb[4].mxu0 %v8753_v1 }
0x164a   :  { %7796 = vmatpush3.bf16.msra.mxu0 %v9034_v21  ;;  %7269 = vmatprep.mubr.msk.f32.mxu0 %vm8752_vm0, %v8753_v1 }
0x164b   :  { %7797 = vmatprep.subr.bf16.mxu0 %v8751_v0 }
0x171c   :  { %v1698_v5 = vpop.f32.mrb[4].mxu0 }
0x171d   :  { %v8215_v24 = vadd.f32 %v9046_v23, %v1698_v5  ;;  %v7264_v25 = vpop.f32.mrb[5].mxu0 }
0x171f   :  { %8336 = vtanh.f32 %v8215_v24  ;;  %v6693_v27 = vmul.f32 -1.442695, %v8215_v24 }
0x1721   :  { %8338 = vpow2.f32 %v6693_v27 }
0x1729   :  { %v8337_v26 = vpop.eup %8336 }
0x172a   :  { %1712 = vrot.lane.b32.xlu1 %v8337_v26, %s8756_s28 }
0x172b   :  { %v8339_v10 = vpop.eup %8338 }
0x172c   :  { %v1706_v28 = vadd.f32 1.0, %v8339_v10 }
0x172e   :  { %8340 = vrcp.f32 %v1706_v28 }
0x1738   :  { %v8341_v29 = vpop.eup %8340 }
0x1739   :  { %v1710_v33 = vmul.f32 0.0, %v8341_v29 }
0x179c   :  { %v1713_v12 = vpop.permute.xlu1 %1712 }
0x179d   :  { %v1715_v31 = vmul.f32 %v8341_v29, %v1713_v12 }
0x179f   :  { %1717 = vrot.lane.b32.xlu0 %v1715_v31, %s8750_s18 }
0x1811   :  { %v1718_v34 = vpop.permute.xlu0 %1717 }
0x1812   :  { %v1720_v35 = vadd.f32 %v1718_v34, %v1710_v33 }
0x1814   :  { %8342 = vtanh.f32 %v1720_v35 }
0x181e   :  { %v8343_v36 = vpop.eup %8342 }
0x181f   :  { %1723 = vrot.lane.b32.xlu1 %v8343_v36, %s8755_s27 }
0x1891   :  { %v1724_v37 = vpop.permute.xlu1 %1723 }
0x1892   :  { %v1726_v38 = vmul.f32 %v8341_v29, %v1724_v37 }
0x1894   :  { %1728 = vrot.lane.b32.xlu0 %v1726_v38, %s8757_s29 }
0x1906   :  { %v1729_v39 = vpop.permute.xlu0 %1728 }
0x1907   :  { %1732 = vst.msk [vmem:[#allocation2] sm:$0xf] %vm1731_vm3, %v1729_v39  ;;  %7270 = vmatmul.mubr.msk.f32.vlgmr.msra.gmra.mrb[6].mxu0 %vm1629_vm4, %v1729_v39 }
0x1908   :  { %7799 = vmatpush3.bf16.msra.mxu0 %v9034_v21  ;;  %7276 = vmatprep.mubr.msk.f32.mxu0 %vm8752_vm0, %v8753_v1 }
0x1909   :  { %7800 = vmatprep.subr.bf16.mxu0 %v8751_v0 }
0x19da   :  { %v1801_v40 = vpop.f32.mrb[6].mxu0 }
0x19db   :  { %v8216_v41 = vadd.f32 %v9046_v23, %v1801_v40  ;;  %v7271_v42 = vpop.f32.mrb[7].mxu0 }
0x19dd   :  { %8344 = vtanh.f32 %v8216_v41  ;;  %v6695_v44 = vmul.f32 -1.442695, %v8216_v41 }
0x19df   :  { %8346 = vpow2.f32 %v6695_v44 }
0x19e7   :  { %v8345_v43 = vpop.eup %8344 }
0x19e8   :  { %1815 = vrot.lane.b32.xlu1 %v8345_v43, %s8756_s28 }
0x19e9   :  { %v8347_v45 = vpop.eup %8346 }
0x19ea   :  { %v1809_v46 = vadd.f32 1.0, %v8347_v45 }
0x19ec   :  { %8348 = vrcp.f32 %v1809_v46 }
0x19f6   :  { %v8349_v47 = vpop.eup %8348 }
0x19f7   :  { %v1813_v51 = vmul.f32 %v8349_v47, %v1720_v35 }
0x1a5a   :  { %v1816_v48 = vpop.permute.xlu1 %1815 }
0x1a5b   :  { %v1818_v50 = vmul.f32 %v8349_v47, %v1816_v48 }
0x1a5d   :  { %1820 = vrot.lane.b32.xlu0 %v1818_v50, %s8750_s18 }
0x1acf   :  { %v1821_v52 = vpop.permute.xlu0 %1820 }
0x1ad0   :  { %v1823_v53 = vadd.f32 %v1821_v52, %v1813_v51 }
0x1ad2   :  { %8350 = vtanh.f32 %v1823_v53 }
0x1adc   :  { %v8351_v54 = vpop.eup %8350 }
0x1add   :  { %1826 = vrot.lane.b32.xlu1 %v8351_v54, %s8755_s27 }
0x1b4f   :  { %v1827_v56 = vpop.permute.xlu1 %1826 }
0x1b50   :  { %v9063_v57 = vmul.f32 %v8349_v47, %v1827_v56 }
0x1b52   :  { %1836 = vrot.lane.b32.xlu0 %v9063_v57, %s8757_s29 }
0x1bc4   :  { %v1837_v58 = vpop.permute.xlu0 %1836 }
0x1bc5   :  { %7277 = vmatmul.mubr.msk.f32.vlgmr.msra.gmra.mrb[8].mxu0 %vm1629_vm4, %v1837_v58 }
0x1bc6   :  { %7802 = vmatpush3.bf16.msra.mxu0 %v9034_v21  ;;  %7283 = vmatprep.mubr.msk.f32.mxu0 %vm8752_vm0, %v8753_v1 }
0x1bc7   :  { %7803 = vmatprep.subr.bf16.mxu0 %v8751_v0 }
0x1c98   :  { %v1906_v59 = vpop.f32.mrb[8].mxu0 }
0x1c99   :  { %v8217_v60 = vadd.f32 %v9046_v23, %v1906_v59  ;;  %v7278_v61 = vpop.f32.mrb[9].mxu0 }
0x1c9b   :  { %8352 = vtanh.f32 %v8217_v60  ;;  %v6697_v63 = vmul.f32 -1.442695, %v8217_v60 }
0x1c9d   :  { %8354 = vpow2.f32 %v6697_v63 }
0x1ca5   :  { %v8353_v62 = vpop.eup %8352 }
0x1ca6   :  { %1920 = vrot.lane.b32.xlu1 %v8353_v62, %s8756_s28 }
0x1ca7   :  { %v8355_v2 = vpop.eup %8354 }
0x1ca8   :  { %v1914_v30 = vadd.f32 1.0, %v8355_v2 }
0x1caa   :  { %8356 = vrcp.f32 %v1914_v30 }
0x1cb4   :  { %v8357_v8 = vpop.eup %8356 }
0x1cb5   :  { %v1918_v4 = vmul.f32 %v8357_v8, %v1823_v53 }
0x1d18   :  { %v1921_v55 = vpop.permute.xlu1 %1920 }
0x1d19   :  { %v1923_v3 = vmul.f32 %v8357_v8, %v1921_v55 }
0x1d1b   :  { %1925 = vrot.lane.b32.xlu0 %v1923_v3, %s8750_s18 }
0x1d8d   :  { %v1926_v6 = vpop.permute.xlu0 %1925 }
0x1d8e   :  { %v1928_v7 = vadd.f32 %v1926_v6, %v1918_v4 }
0x1d90   :  { %8358 = vtanh.f32 %v1928_v7 }
0x1d9a   :  { %v8359_v9 = vpop.eup %8358 }
0x1d9b   :  { %1931 = vrot.lane.b32.xlu1 %v8359_v9, %s8755_s27 }
0x1e0d   :  { %v1932_v11 = vpop.permute.xlu1 %1931 }
0x1e0e   :  { %v9076_v13 = vmul.f32 %v8357_v8, %v1932_v11 }
0x1e10   :  { %1941 = vrot.lane.b32.xlu0 %v9076_v13, %s8757_s29 }
0x1e82   :  { %v1942_v49 = vpop.permute.xlu0 %1941 }
0x1e83   :  { %7284 = vmatmul.mubr.msk.f32.vlgmr.msra.gmra.mrb[10].mxu0 %vm1629_vm4, %v1942_v49 }
0x1e84   :  { %7805 = vmatpush3.bf16.msra.mxu0 %v9034_v21  ;;  %7290 = vmatprep.mubr.msk.f32.mxu0 %vm8752_vm0, %v8753_v1 }
0x1e85   :  { %7806 = vmatprep.subr.bf16.mxu0 %v8751_v0 }
0x1f56   :  { %v2011_v14 = vpop.f32.mrb[10].mxu0 }
0x1f57   :  { %v8218_v32 = vadd.f32 %v9046_v23, %v2011_v14  ;;  %v7285_v15 = vpop.f32.mrb[11].mxu0 }
0x1f59   :  { %8360 = vtanh.f32 %v8218_v32  ;;  %v6699_v17 = vmul.f32 -1.442695, %v8218_v32 }
0x1f5b   :  { %8362 = vpow2.f32 %v6699_v17 }
0x1f63   :  { %v8361_v16 = vpop.eup %8360 }
0x1f64   :  { %2025 = vrot.lane.b32.xlu1 %v8361_v16, %s8756_s28 }
0x1f65   :  { %v8363_v18 = vpop.eup %8362 }
0x1f66   :  { %v2019_v19 = vadd.f32 1.0, %v8363_v18 }
0x1f68   :  { %8364 = vrcp.f32 %v2019_v19 }
0x1f72   :  { %v8365_v20 = vpop.eup %8364 }
0x1f73   :  { %v2023_v24 = vmul.f32 %v8365_v20, %v1928_v7 }
0x1fd6   :  { %v2026_v22 = vpop.permute.xlu1 %2025 }
0x1fd7   :  { %v2028_v5 = vmul.f32 %v8365_v20, %v2026_v22 }
0x1fd9   :  { %2030 = vrot.lane.b32.xlu0 %v2028_v5, %s8750_s18 }
0x204b   :  { %v2031_v25 = vpop.permute.xlu0 %2030 }
0x204c   :  { %v2033_v26 = vadd.f32 %v2031_v25, %v2023_v24 }
0x204e   :  { %8366 = vtanh.f32 %v2033_v26 }
0x2058   :  { %v8367_v27 = vpop.eup %8366 }
0x2059   :  { %2036 = vrot.lane.b32.xlu1 %v8367_v27, %s8755_s27 }
0x20cb   :  { %v2037_v10 = vpop.permute.xlu1 %2036 }
0x20cc   :  { %v9089_v28 = vmul.f32 %v8365_v20, %v2037_v10 }
0x20ce   :  { %2043 = vrot.lane.b32.xlu0 %v9089_v28, %s8757_s29 }
0x2140   :  { %v2044_v29 = vpop.permute.xlu0 %2043 }
0x2141   :  { %7291 = vmatmul.mubr.msk.f32.vlgmr.msra.gmra.mrb[12].mxu0 %vm1629_vm4, %v2044_v29 }
0x2142   :  { %7808 = vmatpush3.bf16.msra.mxu0 %v9034_v21  ;;  %7297 = vmatprep.mubr.msk.f32.mxu0 %vm8752_vm0, %v8753_v1 }
0x2143   :  { %7809 = vmatprep.subr.bf16.mxu0 %v8751_v0 }
0x2214   :  { %v2113_v12 = vpop.f32.mrb[12].mxu0 }
0x2215   :  { %v8219_v31 = vadd.f32 %v9046_v23, %v2113_v12  ;;  %v7292_v33 = vpop.f32.mrb[13].mxu0 }
0x2217   :  { %8368 = vtanh.f32 %v8219_v31  ;;  %v6701_v35 = vmul.f32 -1.442695, %v8219_v31 }
0x2219   :  { %8370 = vpow2.f32 %v6701_v35 }
0x2221   :  { %v8369_v34 = vpop.eup %8368 }
0x2222   :  { %2127 = vrot.lane.b32.xlu1 %v8369_v34, %s8756_s28 }
0x2223   :  { %v8371_v36 = vpop.eup %8370 }
0x2224   :  { %v2121_v37 = vadd.f32 1.0, %v8371_v36 }
0x2226   :  { %8372 = vrcp.f32 %v2121_v37  ;;  %v2464_v37 = vld [vmem:[#allocation6 + $0x68] sm:$0xff] }
0x2230   :  { %v8373_v38 = vpop.eup %8372 }
0x2231   :  { %v2125_v41 = vmul.f32 %v8373_v38, %v2033_v26 }
0x2294   :  { %v2128_v39 = vpop.permute.xlu1 %2127 }
0x2295   :  { %v2130_v40 = vmul.f32 %v8373_v38, %v2128_v39  ;;  %v2466_v39 = vld [vmem:[#allocation6 + $0x78] sm:$0xff] }
0x2297   :  { %2132 = vrot.lane.b32.xlu0 %v2130_v40, %s8750_s18 }
0x2309   :  { %v2133_v42 = vpop.permute.xlu0 %2132 }
0x230a   :  { %v2135_v43 = vadd.f32 %v2133_v42, %v2125_v41  ;;  %v2467_v41 = vld [vmem:[#allocation6 + $0x80] sm:$0xff] }
0x230b   :  { %v7819_v42 = vpack.c.bf16 %v2467_v41, %v2466_v39 }
0x230c   :  { %8374 = vtanh.f32 %v2135_v43 }
0x2316   :  { %v8375_v44 = vpop.eup %8374 }
0x2317   :  { %2138 = vrot.lane.b32.xlu1 %v8375_v44, %s8755_s27  ;;  %v2469_v44 = vld [vmem:[#allocation6 + $0x90] sm:$0xff] }
0x2389   :  { %v2139_v45 = vpop.permute.xlu1 %2138 }
0x238a   :  { %v9102_v46 = vmul.f32 %v8373_v38, %v2139_v45  ;;  %v2465_v38 = vld [vmem:[#allocation6 + $0x70] sm:$0xff] }
0x238b   :  { %v7816_v40 = vpack.c.bf16 %v2465_v38, %v2464_v37  ;;  %v6709_v37 = vld [vmem:[#allocation6 + $0x130] ss:$0 sm:$0xff] }
0x238c   :  { %2148 = vrot.lane.b32.xlu0 %v9102_v46, %s8757_s29 }
0x238d   :  { %7817 = vmatpush3.bf16.msra.mxu1 %v7816_v40 }
0x238e   :  { %7818 = vmatprep.subr.bf16.mxu1 %v8751_v0 }
0x2391   :  { %7820 = vmatpush3.bf16.msra.mxu1 %v7819_v42  ;;  %v2701_v42 = vlaneseq }
0x2392   :  { %7821 = vmatprep.subr.bf16.mxu1 %v8751_v0 }
0x23fe   :  { %v2149_v47 = vpop.permute.xlu0 %2148 }
0x23ff   :  { %7298 = vmatmul.mubr.msk.f32.vlgmr.msra.gmra.mrb[14].mxu0 %vm1629_vm4, %v2149_v47  ;;  %v2471_v47 = vld [vmem:[#allocation6 + $0xa0] sm:$0xff] }
0x2400   :  { %7811 = vmatpush3.bf16.msra.mxu0 %v9034_v21  ;;  %7304 = vmatprep.mubr.msk.f32.mxu0 %vm8752_vm0, %v8753_v1 }
0x2401   :  { %7812 = vmatprep.subr.bf16.mxu0 %v8751_v0 }
0x24d2   :  { %v2218_v48 = vpop.f32.mrb[14].mxu0 }
0x24d3   :  { %v8220_v50 = vadd.f32 %v9046_v23, %v2218_v48  ;;  %v7299_v51 = vpop.f32.mrb[15].mxu0 }
0x24d4   :  { %v2473_v51 = vld [vmem:[#allocation6 + $0xb0] sm:$0xff] }
0x24d5   :  { %8376 = vtanh.f32 %v8220_v50  ;;  %v6703_v53 = vmul.f32 -1.442695, %v8220_v50  ;;  %v2472_v50 = vld [vmem:[#allocation6 + $0xa8] sm:$0xff] }
0x24d7   :  { %8378 = vpow2.f32 %v6703_v53  ;;  %v2474_v53 = vld [vmem:[#allocation6 + $0xb8] sm:$0xff] }
0x24df   :  { %v8377_v52 = vpop.eup %8376 }
0x24e0   :  { %2232 = vrot.lane.b32.xlu1 %v8377_v52, %s8756_s28  ;;  %v7828_v52 = vpack.c.bf16 %v2473_v51, %v2472_v50 }
0x24e1   :  { %v8379_v54 = vpop.eup %8378 }
0x24e2   :  { %v2226_v56 = vadd.f32 1.0, %v8379_v54  ;;  %v2475_v54 = vld [vmem:[#allocation6 + $0xc0] sm:$0xff] }
0x24e4   :  { %8380 = vrcp.f32 %v2226_v56  ;;  %v7831_v56 = vpack.c.bf16 %v2475_v54, %v2474_v53 }
0x24ee   :  { %v8381_v58 = vpop.eup %8380 }
0x24ef   :  { %v2230_v61 = vmul.f32 %v8381_v58, %v2135_v43  ;;  %v2468_v43 = vld [vmem:[#allocation6 + $0x88] sm:$0xff] }
0x24f0   :  { %v7822_v45 = vpack.c.bf16 %v2469_v44, %v2468_v43  ;;  %v2699_v44 = vld [vmem:[#allocation8 + $0x40] ss:$8 sm:$0x3] }
0x24f2   :  { %7823 = vmatpush3.bf16.msra.mxu1 %v7822_v45 }
0x24f3   :  { %7824 = vmatprep.subr.bf16.mxu1 %v8751_v0 }
0x2552   :  { %v2233_v59 = vpop.permute.xlu1 %2232 }
0x2553   :  { %v2235_v60 = vmul.f32 %v8381_v58, %v2233_v59 }
0x2555   :  { %2237 = vrot.lane.b32.xlu0 %v2235_v60, %s8750_s18  ;;  %v2478_v60 = vld [vmem:[#allocation6 + $0xd8] sm:$0xff] }
0x25c7   :  { %v2238_v62 = vpop.permute.xlu0 %2237 }
0x25c8   :  { %v2240_v63 = vadd.f32 %v2238_v62, %v2230_v61  ;;  %v2479_v61 = vld [vmem:[#allocation6 + $0xe0] sm:$0xff] }
0x25c9   :  { %v7837_v62 = vpack.c.bf16 %v2479_v61, %v2478_v60 }
0x25ca   :  { %8382 = vtanh.f32 %v2240_v63 }
0x25d4   :  { %v8383_v2 = vpop.eup %8382 }
0x25d5   :  { %2243 = vrot.lane.b32.xlu1 %v8383_v2, %s8755_s27 }
0x2647   :  { %v2244_v30 = vpop.permute.xlu1 %2243 }
0x2648   :  { %v9115_v8 = vmul.f32 %v8381_v58, %v2244_v30  ;;  %v2477_v58 = vld [vmem:[#allocation6 + $0xd0] sm:$0xff] }
0x264a   :  { %2253 = vrot.lane.b32.xlu0 %v9115_v8, %s8757_s29 }
0x26bc   :  { %v2254_v55 = vpop.permute.xlu0 %2253 }
0x26bd   :  { %7305 = vmatmul.mubr.msk.f32.vlgmr.msra.gmra.mrb[16].mxu0 %vm1629_vm4, %v2254_v55 }
0x26be   :  { %7814 = vmatpush3.bf16.msra.mxu0 %v9034_v21  ;;  %7311 = vmatprep.mubr.msk.f32.mxu0 %vm8752_vm0, %v8753_v1 }
0x2790   :  { %v2323_v3 = vpop.f32.mrb[16].mxu0 }
0x2791   :  { %v8221_v4 = vadd.f32 %v9046_v23, %v2323_v3  ;;  %v7306_v6 = vpop.f32.mrb[17].mxu0 }
0x2792   :  { %v2556_v6 = vld [vmem:[#allocation6 + $0xf0] sm:$0xff] }
0x2793   :  { %8384 = vtanh.f32 %v8221_v4  ;;  %v6705_v9 = vmul.f32 -1.442695, %v8221_v4 }
0x2795   :  { %8386 = vpow2.f32 %v6705_v9 }
0x279d   :  { %v8385_v7 = vpop.eup %8384 }
0x279e   :  { %2337 = vrot.lane.b32.xlu1 %v8385_v7, %s8756_s28  ;;  %v2557_v7 = vld [vmem:[#allocation6 + $0xf8] sm:$0xff] }
0x279f   :  { %v8387_v11 = vpop.eup %8386  ;;  %v7840_v9 = vpack.c.bf16 %v2557_v7, %v2556_v6  ;;  %v2658_v6 = vld [vmem:[#allocation8 + $0x78] sm:$0xff]  ;;  %v2660_v7 = vld [vmem:[#allocation8 + $0x88] sm:$0xff] }
0x27a0   :  { %v2331_v49 = vadd.f32 1.0, %v8387_v11  ;;  %v2558_v11 = vld [vmem:[#allocation6 + $0x100] sm:$0xff] }
0x27a2   :  { %8388 = vrcp.f32 %v2331_v49  ;;  %v2559_v49 = vld [vmem:[#allocation6 + $0x108] sm:$0xff] }
0x27ac   :  { %v8389_v14 = vpop.eup %8388 }
0x27ad   :  { %v2335_v21 = vmul.f32 %v8389_v14, %v2240_v63 }
0x2810   :  { %v2338_v32 = vpop.permute.xlu1 %2337 }
0x2811   :  { %v2340_v15 = vmul.f32 %v8389_v14, %v2338_v32  ;;  %v7843_v32 = vpack.c.bf16 %v2559_v49, %v2558_v11  ;;  %v9180_v11 = vpack.c.bf16 %v2660_v7, %v2658_v6  ;;  %v2657_v49 = vld [vmem:[#allocation8 + $0x70] sm:$0xff] }
0x2813   :  { %2342 = vrot.lane.b32.xlu0 %v2340_v15, %s8750_s18  ;;  %v2561_v15 = vld [vmem:[#allocation6 + $0x118] sm:$0xff] }
0x2885   :  { %v2343_v16 = vpop.permute.xlu0 %2342 }
0x2886   :  { %v2345_v17 = vadd.f32 %v2343_v16, %v2335_v21  ;;  %v2562_v16 = vld [vmem:[#allocation6 + $0x120] sm:$0xff] }
0x2888   :  { %8390 = vtanh.f32 %v2345_v17 }
0x2892   :  { %v8391_v18 = vpop.eup %8390 }
0x2893   :  { %2348 = vrot.lane.b32.xlu1 %v8391_v18, %s8755_s27 }
0x2905   :  { %v2349_v19 = vpop.permute.xlu1 %2348 }
0x2906   :  { %v2351_v20 = vmul.f32 %v8389_v14, %v2349_v19  ;;  %v2691_v19 = vld [vmem:[#allocation8 + $0x8] sm:$0xff] }
0x2908   :  { %2358 = vrot.lane.b32.xlu0 %v2351_v20, %s8757_s29 }
0x297a   :  { %v2359_v22 = vpop.permute.xlu0 %2358 }
0x297b   :  { %7312 = vmatmul.mubr.msk.f32.vlgmr.msra.gmra.mrb[18].mxu0 %vm1629_vm4, %v2359_v22  ;;  %v2690_v22 = vld [vmem:[#allocation8] sm:$0xff] }
0x297c   :  { %2778 = vmatprep.mubr.f32.mxu0 %v8753_v1 }
0x2a4e   :  { %v2428_v5 = vpop.f32.mrb[18].mxu0 }
0x2a4f   :  { %v8222_v24 = vadd.f32 %v9046_v23, %v2428_v5  ;;  %v7313_v25 = vpop.f32.mrb[19].mxu0 }
0x2a51   :  { %8392 = vtanh.f32 %v8222_v24  ;;  %v6707_v27 = vmul.f32 -1.442695, %v8222_v24  ;;  %v2692_v24 = vld [vmem:[#allocation8 + $0x10] sm:$0xff] }
0x2a52   :  { %v7853_v25 = vpack.c.bf16 %v2692_v24, %v2690_v22  ;;  %v2678_v24 = vld [vmem:[#allocation8 + $0x110] ss:$8 sm:$0x3] }
0x2a53   :  { %8394 = vpow2.f32 %v6707_v27 }
0x2a5b   :  { %v8393_v26 = vpop.eup %8392 }
0x2a5c   :  { %2442 = vrot.lane.b32.xlu1 %v8393_v26, %s8756_s28  ;;  %v6708_v26 = vld [vmem:[#allocation6 + $0xe8] ss:$0 sm:$0xff] }
0x2a5d   :  { %v8395_v10 = vpop.eup %8394 }
0x2a5e   :  { %v2436_v29 = vadd.f32 1.0, %v8395_v10 }
0x2a60   :  { %8396 = vrcp.f32 %v2436_v29 }
0x2a6a   :  { %v8397_v12 = vpop.eup %8396 }
0x2a6b   :  { %v2440_v23 = vmul.f32 %v8397_v12, %v2345_v17  ;;  %v2563_v17 = vld [vmem:[#allocation6 + $0x128] sm:$0xff] }
0x2a6c   :  { %v7849_v18 = vpack.c.bf16 %v2563_v17, %v2562_v16  ;;  %v2646_v16 = vld [vmem:[#allocation6 + $0x150] sm:$0xff]  ;;  %v2647_v17 = vld [vmem:[#allocation6 + $0x158] sm:$0xff] }
0x2ace   :  { %v2443_v31 = vpop.permute.xlu1 %2442 }
0x2acf   :  { %v2445_v33 = vmul.f32 %v8397_v12, %v2443_v31  ;;  %v2695_v31 = vld [vmem:[#allocation8 + $0x28] sm:$0xff] }
0x2ad1   :  { %2447 = vrot.lane.b32.xlu0 %v2445_v33, %s8750_s18  ;;  %v2697_v33 = vld [vmem:[#allocation8 + $0x38] sm:$0xff] }
0x2ad5   :  { %1831 = vrot.lane.b32.xlu0 %v9063_v57, %s8756_s28 }
0x2ad9   :  { %2143 = vrot.lane.b32.xlu0 %v9102_v46, %s8750_s18  ;;  %v2470_v46 = vld [vmem:[#allocation6 + $0x98] sm:$0xff] }
0x2ada   :  { %v7825_v48 = vpack.c.bf16 %v2471_v47, %v2470_v46 }
0x2adc   :  { %7826 = vmatpush3.bf16.msra.mxu1 %v7825_v48 }
0x2add   :  { %2353 = vrot.lane.b32.xlu0 %v2351_v20, %s8758_s30  ;;  %7827 = vmatprep.subr.bf16.mxu1 %v8751_v0  ;;  %v2693_v20 = vld [vmem:[#allocation8 + $0x18] sm:$0xff] }
0x2ade   :  { %v7851_v5 = vpack.c.bf16 %v2693_v20, %v2691_v19  ;;  %v2648_v19 = vld [vmem:[#allocation6 + $0x160] sm:$0xff]  ;;  %v2649_v20 = vld [vmem:[#allocation6 + $0x168] sm:$0xff] }
0x2ae0   :  { %7829 = vmatpush3.bf16.msra.mxu1 %v7828_v52  ;;  %7852 = vmatprep.subr.bf16.mxu0 %v7851_v5  ;;  %v9195_v5 = vpack.c.bf16 %v2649_v20, %v2648_v19  ;;  %v2651_v19 = vld [vmem:[#allocation6 + $0x140] sm:$0xff]  ;;  %v2687_v20 = vld [vmem:[#allocation6 + $0x1b0] sm:$0xff] }
0x2ae1   :  { %7830 = vmatprep.subr.bf16.mxu1 %v8751_v0  ;;  %7854 = vmatpush1.bf16.msra.mxu0 %v7853_v25 }
0x2ae4   :  { %7832 = vmatpush3.bf16.msra.mxu1 %v7831_v56 }
0x2ae5   :  { %7833 = vmatprep.subr.bf16.mxu1 %v8751_v0 }
0x2b43   :  { %v2448_v34 = vpop.permute.xlu0 %2447 }
0x2b44   :  { %v2450_v35 = vadd.f32 %v2448_v34, %v2440_v23  ;;  %v7855_v23 = vpack.c.bf16 %v2697_v33, %v2695_v31  ;;  %v2694_v34 = vld [vmem:[#allocation8 + $0x20] sm:$0xff] }
0x2b46   :  { %8398 = vtanh.f32 %v2450_v35  ;;  %v2696_v35 = vld [vmem:[#allocation8 + $0x30] sm:$0xff]  ;;  %7856 = vmatprep.subr.bf16.mxu0 %v7855_v23 }
0x2b47   :  { %v1832_v36 = vpop.permute.xlu0 %1831 }
0x2b48   :  { %1835 = vst.msk [vmem:[#allocation2] sm:$0xf] %vm1834_vm5, %v1832_v36  ;;  %v7857_v36 = vpack.c.bf16 %v2696_v35, %v2694_v34 }
0x2b4a   :  { %7858 = vmatpush1.bf16.msra.mxu0 %v7857_v36 }
0x2b4b   :  { %v2144_v30 = vpop.permute.xlu0 %2143 }
0x2b4f   :  { %v2354_v3 = vpop.permute.xlu0 %2353 }
0x2b50   :  { %v8399_v57 = vpop.eup %8398 }
0x2b51   :  { %2453 = vrot.lane.b32.xlu1 %v8399_v57, %s8755_s27  ;;  %v9162_v57 = vshrl.u32 %v2701_v42, 7 }
0x2b53   :  { %v2703_v43 = vsub.s32 0, %v9162_v57  ;;  %v2707_v45 = vsub.s32 1, %v9162_v57  ;;  %v2682_v57 = vld [vmem:[#allocation6 + $0x188] sm:$0xff] }
0x2b55   :  { %1936 = vrot.lane.b32.xlu1 %v9076_v13, %s8759_s5  ;;  %v2476_v13 = vld [vmem:[#allocation6 + $0xc8] sm:$0xff]  ;;  %v2704_v46 = vrot.slane %v2699_v44, %v2703_v43  ;;  %v2708_v47 = vrot.slane %v2699_v44, %v2707_v45  ;;  %v9207_v25 = vrot.slane %v2678_v24, %v2703_v43  ;;  %v9214_v31 = vrot.slane %v2678_v24, %v2707_v45  ;;  %v2683_v44 = vld [vmem:[#allocation6 + $0x190] sm:$0xff]  ;;  %v2684_v45 = vld [vmem:[#allocation6 + $0x198] sm:$0xff] }
0x2b56   :  { %v7834_v59 = vpack.c.bf16 %v2477_v58, %v2476_v13  ;;  %v2688_v24 = vld [vmem:[#allocation6 + $0x1b8] sm:$0xff] }
0x2b58   :  { %7835 = vmatpush3.bf16.msra.mxu1 %v7834_v59 }
0x2b59   :  { %2248 = vrot.lane.b32.xlu1 %v9115_v8, %s8755_s27  ;;  %7836 = vmatprep.subr.bf16.mxu1 %v8751_v0 }
0x2b5c   :  { %7838 = vmatpush3.bf16.msra.mxu1 %v7837_v62 }
0x2b5d   :  { %7839 = vmatprep.subr.bf16.mxu1 %v8751_v0 }
0x2bc3   :  { %v2454_v63 = vpop.permute.xlu1 %2453 }
0x2bc4   :  { %v2456_v2 = vmul.f32 %v8397_v12, %v2454_v63 }
0x2bc6   :  { %2458 = vrot.lane.b32.xlu1 %v2456_v2, %s8754_s2 }
0x2bc7   :  { %v1937_v8 = vpop.permute.xlu1 %1936 }
0x2bc8   :  { %1940 = vst.msk [vmem:[#allocation2] sm:$0xf] %vm1939_vm6, %v1937_v8  ;;  %v2656_v8 = vld [vmem:[#allocation8 + $0x68] sm:$0xff] }
0x2bc9   :  { %2041 = vst.msk [vmem:[#allocation2] sm:$0xf] %vm2040_vm7, %v9089_v28  ;;  %v2560_v28 = vld [vmem:[#allocation6 + $0x110] sm:$0xff] }
0x2bca   :  { %2147 = vst.msk [vmem:[#allocation2] sm:$0xf] %vm2146_vm8, %v2144_v30  ;;  %v7846_v21 = vpack.c.bf16 %v2561_v15, %v2560_v28  ;;  %v2654_v30 = vld [vmem:[#allocation8 + $0x58] sm:$0xff] }
0x2bcb   :  { %v2249_v55 = vpop.permute.xlu1 %2248 }
0x2bcc   :  { %2252 = vst.msk [vmem:[#allocation2] sm:$0xf] %vm2251_vm9, %v2249_v55  ;;  %v2653_v55 = vld [vmem:[#allocation8 + $0x50] sm:$0xff] }
0x2bcd   :  { %2357 = vst.msk [vmem:[#allocation2] sm:$0xf] %vm2356_vm10, %v2354_v3  ;;  %v9176_v3 = vpack.c.bf16 %v2656_v8, %v2654_v30 }
0x2bcf   :  { %7860 = vmatprep.subr.bf16.mxu0 %v9176_v3 }
0x2c38   :  { %v2459_v4 = vpop.permute.xlu1 %2458 }
0x2c39   :  { %2462 = vst.msk [vmem:[#allocation2] sm:$0xf] %vm2461_vm11, %v2459_v4  ;;  %v2655_v4 = vld [vmem:[#allocation8 + $0x60] sm:$0xff] }
0x2c40   :  { %v2463_v14 = vld [vmem:[#allocation2] sm:$0xf] }
0x2c41   :  { %7347 = vmatmul.mubr.f32.vlgmr.msra.gmra.mrb[16].mxu1 %v2463_v14  ;;  %v2659_v14 = vld [vmem:[#allocation8 + $0x80] sm:$0xff] }
0x2c42   :  { %7841 = vmatpush3.bf16.msra.mxu1 %v7840_v9  ;;  %7365 = vmatprep.mubr.msk.f32.mxu1 %vm8752_vm0, %v8753_v1  ;;  %v9178_v9 = vpack.c.bf16 %v2655_v4, %v2653_v55 }
0x2c43   :  { %7842 = vmatprep.subr.bf16.mxu1 %v8751_v0 }
0x2c46   :  { %7844 = vmatpush3.bf16.msra.mxu1 %v7843_v32  ;;  %v9184_v32 = vpack.c.bf16 %v2659_v14, %v2657_v49 }
0x2c47   :  { %7845 = vmatprep.subr.bf16.mxu1 %v8751_v0 }
0x2c4a   :  { %7847 = vmatpush3.bf16.msra.mxu1 %v7846_v21 }
0x2c4b   :  { %7848 = vmatprep.subr.bf16.mxu1 %v8751_v0 }
0x2c4e   :  { %7850 = vmatpush3.bf16.msra.mxu1 %v7849_v18  ;;  %v9191_v18 = vpack.c.bf16 %v2647_v17, %v2646_v16  ;;  %v2650_v17 = vld [vmem:[#allocation6 + $0x138] sm:$0xff] }
0x2c4f   :  { %7867 = vmatprep.subr.bf16.mxu1 %v8751_v0 }
0x2d14   :  { %v2551_v27 = vpop.f32.mrb[16].mxu1 }
0x2d15   :  { %v2552_v10 = vadd.f32 %v6708_v26, %v2551_v27  ;;  %v7348_v29 = vpop.f32.mrb[17].mxu1 }
0x2d17   :  { %v2555_v12 = vmax.f32 %v2552_v10, 0.0 }
0x2d19   :  { %7366 = vmatmul.mubr.msk.f32.vlgmr.msra.gmra.mrb[18].mxu1 %vm2569_vm12, %v2555_v12 }
0x2d1a   :  { %7384 = vmatprep.mubr.msk.f32.mxu1 %vm8752_vm0, %v8753_v1 }
0x2dec   :  { %v2639_v38 = vpop.f32.mrb[18].mxu1 }
0x2ded   :  { %v2640_v39 = vadd.f32 %v6709_v37, %v2639_v38  ;;  %v7367_v40 = vpop.f32.mrb[19].mxu1 }
0x2dee   :  { %v2680_v40 = vld [vmem:[#allocation6 + $0x178] sm:$0xff] }
0x2def   :  { %v2643_v41 = vmax.f32 %v2640_v39, 0.0  ;;  %v2679_v39 = vld [vmem:[#allocation6 + $0x170] sm:$0xff] }
0x2df0   :  { %v9218_v42 = vpack.c.bf16 %v2680_v40, %v2679_v39 }
0x2df1   :  { %6711 = vmatmul.mubr.msk.f32.vlgmr.msra.gmra.mrb[20].mxu0 %vm178_vm2, %v2643_v41  ;;  %2645 = vst.msk [vmem:[#allocation10] sm:$0xf] %vm2644_vm13, %v2643_v41  ;;  %v2681_v41 = vld [vmem:[#allocation6 + $0x180] sm:$0xff] }
0x2df2   :  { %2893 = vmatprep.mubr.f32.mxu0 %v8753_v1  ;;  %7862 = vmatpush1.bf16.msra.mxu0 %v9178_v9  ;;  %v9221_v43 = vpack.c.bf16 %v2682_v57, %v2681_v41  ;;  %v2665_v41 = vld [vmem:[#allocation8 + $0xb0] sm:$0xff]  ;;  %v2667_v57 = vld [vmem:[#allocation8 + $0xc0] sm:$0xff] }
0x2df3   :  { %7864 = vmatprep.subr.bf16.mxu0 %v9180_v11  ;;  %7869 = vmatpush3.bf16.msra.mxu1 %v9218_v42 }
0x2df4   :  { %7870 = vmatprep.subr.bf16.mxu1 %v8751_v0 }
0x2df6   :  { %7866 = vmatpush1.bf16.msra.mxu0 %v9184_v32 }
0x2df7   :  { %7879 = vmatprep.subr.bf16.mxu0 %v8751_v0  ;;  %7872 = vmatpush3.bf16.msra.mxu1 %v9221_v43 }
0x2df8   :  { %7873 = vmatprep.subr.bf16.mxu1 %v8751_v0 }
0x2ec4   :  { %v2780_v48 = vpop.f32.mrb[20].mxu0 }
0x2ec5   :  { %v2781_v50 = vadd.f32 %v2780_v48, %v2704_v46  ;;  %v2782_v51 = vpop.f32.mrb[21].mxu0  ;;  %v9225_v46 = vpack.c.bf16 %v2684_v45, %v2683_v44  ;;  %v2686_v48 = vld [vmem:[#allocation6 + $0x1a8] sm:$0xff]  ;;  %v2670_v45 = vld [vmem:[#allocation8 + $0xd8] sm:$0xff] }
0x2ec6   :  { %v2783_v52 = vadd.f32 %v2782_v51, %v2708_v47  ;;  %v2685_v47 = vld [vmem:[#allocation6 + $0x1a0] sm:$0xff] }
0x2ec7   :  { %8400 = vtanh.f32 %v2781_v50  ;;  %v6712_v54 = vmul.f32 -1.442695, %v2781_v50  ;;  %7875 = vmatpush3.bf16.msra.mxu1 %v9225_v46  ;;  %v9229_v50 = vpack.c.bf16 %v2686_v48, %v2685_v47  ;;  %v2672_v47 = vld [vmem:[#allocation8 + $0xe8] sm:$0xff]  ;;  %v9272_v48 = vpack.c.bf16 %v2667_v57, %v2665_v41 }
0x2ec8   :  { %2793 = vrot.lane.b32.xlu1 %v2783_v52, %s8755_s27  ;;  %7876 = vmatprep.subr.bf16.mxu1 %v8751_v0 }
0x2ec9   :  { %8402 = vpow2.f32 %v6712_v54 }
0x2ecb   :  { %7878 = vmatpush3.bf16.msra.mxu1 %v9229_v50 }
0x2ecc   :  { %7912 = vmatprep.subr.bf16.mxu1 %v8751_v0 }
0x2ed1   :  { %v8401_v53 = vpop.eup %8400 }
0x2ed2   :  { %2798 = vrot.lane.b32.xlu0 %v8401_v53, %s8754_s2 }
0x2ed3   :  { %v8403_v56 = vpop.eup %8402 }
0x2ed4   :  { %v2788_v13 = vadd.f32 1.0, %v8403_v56 }
0x2ed6   :  { %8404 = vrcp.f32 %v2788_v13 }
0x2ee0   :  { %v8405_v58 = vpop.eup %8404 }
0x2f3a   :  { %v2794_v61 = vpop.permute.xlu1 %2793 }
0x2f3b   :  { %v2796_v62 = vmul.f32 %v8405_v58, %v2794_v61 }
0x2f44   :  { %v2799_v59 = vpop.permute.xlu0 %2798 }
0x2f45   :  { %v2801_v60 = vmul.f32 %v8405_v58, %v2799_v59 }
0x2f47   :  { %2803 = vrot.lane.b32.xlu0 %v2801_v60, %s8755_s27 }
0x2fb9   :  { %v2804_v63 = vpop.permute.xlu0 %2803 }
0x2fba   :  { %v9173_v2 = vadd.f32 %v2804_v63, %v2796_v62  ;;  %v9244_v62 = vld [vmem:[#allocation6 + $0x1c0] ss:$0 sm:$0xff] }
0x2fbc   :  { %8406 = vtanh.f32 %v9173_v2 }
0x2fc6   :  { %v8407_v28 = vpop.eup %8406 }
0x2fc7   :  { %2809 = vrot.lane.b32.xlu1 %v8407_v28, %s8754_s2 }
0x3039   :  { %v2810_v15 = vpop.permute.xlu1 %2809 }
0x303a   :  { %v2812_v21 = vmul.f32 %v8405_v58, %v2810_v15 }
0x303c   :  { %2825 = vrot.lane.b32.xlu0 %v2812_v21, %s8755_s27 }
0x30ae   :  { %v2826_v22 = vpop.permute.xlu0 %2825 }
0x30af   :  { %6713 = vmatmul.mubr.msk.f32.vlgmr.msra.gmra.mrb[22].mxu0 %vm178_vm2, %v2826_v22 }
0x30b0   :  { %7881 = vmatpush3.bf16.msra.mxu0 %v9191_v18  ;;  %7395 = vmatprep.mubr.msk.f32.mxu0 %vm8752_vm0, %v8753_v1 }
0x30b1   :  { %7882 = vmatprep.subr.bf16.mxu0 %v8751_v0 }
0x30b4   :  { %7884 = vmatpush3.bf16.msra.mxu0 %v9195_v5 }
0x30b5   :  { %7885 = vmatprep.subr.bf16.mxu0 %v8751_v0 }
0x30b7   :  { %7396 = vmatmul.mubr.msk.f32.vlgmr.msra.gmra.mrb[24].mxu0 %vm178_vm2, %v2826_v22  ;;  %v9252_v22 = vpack.c.bf16 %v2651_v19, %v2650_v17 }
0x30b8   :  { %7402 = vmatprep.mubr.msk.f32.mxu0 %vm8752_vm0, %v8753_v1 }
0x30b9   :  { %7887 = vmatpush3.bf16.msra.mxu0 %v9252_v22 }
0x3182   :  { %v2895_v26 = vpop.f32.mrb[22].mxu0 }
0x3183   :  { %v2896_v27 = vadd.f32 %v2895_v26, %v9207_v25  ;;  %v2897_v10 = vpop.f32.mrb[23].mxu0  ;;  %v2662_v26 = vld [vmem:[#allocation8 + $0x98] sm:$0xff] }
0x3184   :  { %v2898_v23 = vadd.f32 %v2897_v10, %v9214_v31  ;;  %v9254_v10 = vpack.c.bf16 %v2688_v24, %v2687_v20 }
0x3185   :  { %v6714_v29 = vmul.f32 -1.442695, %v2896_v27  ;;  %v2664_v27 = vld [vmem:[#allocation8 + $0xa8] sm:$0xff] }
0x3186   :  { %v6715_v51 = vmul.f32 -1.442695, %v2898_v23 }
0x3187   :  { %8408 = vpow2.f32 %v6714_v29  ;;  %v9256_v29 = vpack.c.bf16 %v2664_v27, %v2662_v26 }
0x3188   :  { %8410 = vtanh.f32 %v2898_v23 }
0x3189   :  { %7889 = vmatprep.subr.bf16.mxu0 %v9256_v29 }
0x318a   :  { %v9210_v12 = vpop.f32.mrb[24].mxu0 }
0x318b   :  { %v7397_v33 = vpop.f32.mrb[25].mxu0 }
0x3191   :  { %v8409_v34 = vpop.eup %8408 }
0x3192   :  { %v2906_v35 = vadd.f32 1.0, %v8409_v34  ;;  %v8411_v36 = vpop.eup %8410 }
0x3194   :  { %8412 = vrcp.f32 %v2906_v35  ;;  %v2661_v35 = vld [vmem:[#allocation8 + $0x90] sm:$0xff] }
0x3195   :  { %8414 = vpow2.f32 %v6715_v51  ;;  %v9276_v51 = vpack.c.bf16 %v2672_v47, %v2670_v45 }
0x319e   :  { %v8413_v37 = vpop.eup %8412 }
0x319f   :  { %v2914_v38 = vmul.f32 %v8413_v37, %v8411_v36  ;;  %v8415_v52 = vpop.eup %8414  ;;  %v2913_v54 = vmul.f32 0.0, %v8413_v37  ;;  %v2663_v36 = vld [vmem:[#allocation8 + $0xa0] sm:$0xff]  ;;  %v2666_v37 = vld [vmem:[#allocation8 + $0xb8] sm:$0xff] }
0x31a0   :  { %v2907_v53 = vadd.f32 1.0, %v8415_v52  ;;  %v9264_v39 = vpack.c.bf16 %v2663_v36, %v2661_v35  ;;  %v2669_v52 = vld [vmem:[#allocation8 + $0xd0] sm:$0xff] }
0x31a1   :  { %2916 = vrot.lane.b32.xlu1 %v2914_v38, %s8754_s2  ;;  %v2668_v38 = vld [vmem:[#allocation8 + $0xc8] sm:$0xff] }
0x31a2   :  { %8416 = vrcp.f32 %v2907_v53  ;;  %v9266_v40 = vpack.c.bf16 %v2668_v38, %v2666_v37  ;;  %v2671_v53 = vld [vmem:[#allocation8 + $0xe0] sm:$0xff] }
0x31ac   :  { %v8417_v58 = vpop.eup %8416 }
0x3213   :  { %v2917_v56 = vpop.permute.xlu1 %2916 }
0x3214   :  { %v9234_v13 = vadd.f32 %v2917_v56, %v2913_v54  ;;  %v2674_v54 = vld [vmem:[#allocation8 + $0xf8] sm:$0xff]  ;;  %v2676_v56 = vld [vmem:[#allocation8 + $0x108] sm:$0xff] }
0x3216   :  { %8418 = vtanh.f32 %v9234_v13 }
0x3220   :  { %v8419_v59 = vpop.eup %8418 }
0x3221   :  { %v2921_v60 = vmul.f32 %v8419_v59, %v8417_v58  ;;  %v9283_v58 = vpack.c.bf16 %v2671_v53, %v2669_v52  ;;  %v9286_v59 = vpack.c.bf16 %v2676_v56, %v2674_v54 }
0x3223   :  { %2927 = vrot.lane.b32.xlu0 %v2921_v60, %s8754_s2  ;;  %v2673_v60 = vld [vmem:[#allocation8 + $0xf0] sm:$0xff] }
0x3295   :  { %v9238_v61 = vpop.permute.xlu0 %2927 }
0x3296   :  { %7385 = vmatmul.mubr.msk.f32.vlgmr.msra.gmra.mrb[20].mxu1 %vm2569_vm12, %v9238_v61 }
0x3297   :  { %7409 = vmatprep.mubr.msk.f32.mxu1 %vm8752_vm0, %v8753_v1  ;;  %7914 = vmatpush3.bf16.msra.mxu1 %v9254_v10 }
0x3298   :  { %7915 = vmatprep.subr.bf16.mxu1 %v8751_v0 }
0x3369   :  { %v2997_v63 = vpop.f32.mrb[20].mxu1 }
0x336a   :  { %v2998_v30 = vadd.f32 %v9244_v62, %v2997_v63  ;;  %v7386_v8 = vpop.f32.mrb[21].mxu1  ;;  %v2675_v63 = vld [vmem:[#allocation8 + $0x100] sm:$0xff] }
0x336b   :  { %v9307_v8 = vld [vmem:[#allocation6 + $0x148] ss:$0 sm:$0xff] }
0x336c   :  { %8420 = vtanh.f32 %v2998_v30  ;;  %v6718_v4 = vmul.f32 -1.442695, %v2998_v30  ;;  %v9291_v30 = vpack.c.bf16 %v2675_v63, %v2673_v60 }
0x336e   :  { %8422 = vpow2.f32 %v6718_v4 }
0x3376   :  { %v8421_v55 = vpop.eup %8420 }
0x3377   :  { %3010 = vrot.lane.b32.xlu1 %v8421_v55, %s8756_s28 }
0x3378   :  { %v8423_v6 = vpop.eup %8422 }
0x3379   :  { %v3004_v7 = vadd.f32 1.0, %v8423_v6 }
0x337b   :  { %8424 = vrcp.f32 %v3004_v7 }
0x3385   :  { %v8425_v49 = vpop.eup %8424 }
0x3386   :  { %v3008_v15 = vmul.f32 0.0, %v8425_v49 }
0x33e9   :  { %v3011_v14 = vpop.permute.xlu1 %3010 }
0x33ea   :  { %v3013_v28 = vmul.f32 %v8425_v49, %v3011_v14 }
0x33ec   :  { %3015 = vrot.lane.b32.xlu0 %v3013_v28, %s8750_s18 }
0x345e   :  { %v3016_v21 = vpop.permute.xlu0 %3015 }
0x345f   :  { %v9249_v16 = vadd.f32 %v3016_v21, %v3008_v15 }
0x3461   :  { %8426 = vtanh.f32 %v9249_v16 }
0x346b   :  { %v8427_v33 = vpop.eup %8426 }
0x346c   :  { %3021 = vrot.lane.b32.xlu1 %v8427_v33, %s8755_s27 }
0x34de   :  { %v3022_v23 = vpop.permute.xlu1 %3021 }
0x34df   :  { %v3024_v34 = vmul.f32 %v8425_v49, %v3022_v23 }
0x34e1   :  { %3026 = vrot.lane.b32.xlu0 %v3024_v34, %s8757_s29 }
0x3553   :  { %v3027_v44 = vpop.permute.xlu0 %3026 }
0x3554   :  { %3029 = vst.msk [vmem:[#allocation9] sm:$0xf] %vm1731_vm3, %v3027_v44  ;;  %7403 = vmatmul.mubr.msk.f32.vlgmr.msra.gmra.mrb[26].mxu0 %vm1629_vm4, %v3027_v44  ;;  %7410 = vmatmul.mubr.msk.f32.vlgmr.msra.gmra.mrb[22].mxu1 %vm1629_vm4, %v3027_v44 }
0x3555   :  { %7891 = vmatpush1.bf16.msra.mxu0 %v9264_v39  ;;  %3265 = vmatprep.mubr.f32.mxu0 %v8753_v1 }
0x3556   :  { %7893 = vmatprep.subr.bf16.mxu0 %v9266_v40  ;;  %7917 = vmatpush3.bf16.msra.mxu1 %v9218_v42 }
0x3557   :  { %7918 = vmatprep.subr.bf16.mxu1 %v8751_v0  ;;  %7428 = vmatprep.mubr.msk.f32.mxu1 %vm8752_vm0, %v8753_v1 }
0x3559   :  { %7895 = vmatpush1.bf16.msra.mxu0 %v9272_v48 }
0x355a   :  { %7897 = vmatprep.subr.bf16.mxu0 %v9276_v51  ;;  %7920 = vmatpush3.bf16.msra.mxu1 %v9221_v43 }
0x355b   :  { %7921 = vmatprep.subr.bf16.mxu1 %v8751_v0 }
0x355d   :  { %7899 = vmatpush1.bf16.msra.mxu0 %v9283_v58 }
0x355e   :  { %7901 = vmatprep.subr.bf16.mxu0 %v9286_v59  ;;  %7923 = vmatpush3.bf16.msra.mxu1 %v9225_v46 }
0x355f   :  { %7924 = vmatprep.subr.bf16.mxu1 %v8751_v0 }
0x3561   :  { %7903 = vmatpush1.bf16.msra.mxu0 %v9291_v30 }
0x3562   :  { %7905 = vmatprep.subr.bf16.mxu0 %v9176_v3  ;;  %7926 = vmatpush3.bf16.msra.mxu1 %v9229_v50 }
0x3563   :  { %7927 = vmatprep.subr.bf16.mxu1 %v8751_v0 }
0x3564   :  { %6723 = vmatmul.mubr.msk.f32.vlgmr.msra.gmra.mrb[28].mxu0 %vm2569_vm12, %v9238_v61 }
0x3565   :  { %7907 = vmatpush1.bf16.msra.mxu0 %v9178_v9  ;;  %3341 = vmatprep.mubr.f32.mxu0 %v8753_v1 }
0x3566   :  { %7909 = vmatprep.subr.bf16.mxu0 %v9180_v11 }
0x3569   :  { %7911 = vmatpush1.bf16.msra.mxu0 %v9184_v32 }
0x356a   :  { %7933 = vmatprep.subr.bf16.mxu0 %v8751_v0 }
0x3627   :  { %v3168_v55 = vpop.f32.mrb[26].mxu0  ;;  %v9309_v4 = vpop.f32.mrb[22].mxu1 }
0x3628   :  { %v3169_v6 = vadd.f32 %v3168_v55, %v9210_v12  ;;  %v7404_v7 = vpop.f32.mrb[27].mxu0  ;;  %v7411_v49 = vpop.f32.mrb[23].mxu1 }
0x362a   :  { %v3176_v61 = vadd.f32 %v9307_v8, %v3169_v6 }
0x362c   :  { %8428 = vtanh.f32 %v3176_v61  ;;  %v6722_v28 = vmul.f32 -1.442695, %v3176_v61 }
0x362e   :  { %8430 = vpow2.f32 %v6722_v28 }
0x3636   :  { %v8429_v14 = vpop.eup %8428 }
0x3637   :  { %3186 = vrot.lane.b32.xlu1 %v8429_v14, %s8754_s2 }
0x3638   :  { %v8431_v15 = vpop.eup %8430 }
0x3639   :  { %v3180_v21 = vadd.f32 1.0, %v8431_v15 }
0x363b   :  { %8432 = vrcp.f32 %v3180_v21 }
0x3645   :  { %v8433_v17 = vpop.eup %8432 }
0x3646   :  { %v3184_v12 = vmul.f32 %v8433_v17, %v9173_v2 }
0x36a9   :  { %v3187_v19 = vpop.permute.xlu1 %3186 }
0x36aa   :  { %v3189_v20 = vmul.f32 %v8433_v17, %v3187_v19 }
0x36ac   :  { %3191 = vrot.lane.b32.xlu0 %v3189_v20, %s8755_s27 }
0x371e   :  { %v3192_v24 = vpop.permute.xlu0 %3191 }
0x371f   :  { %v9316_v26 = vadd.f32 %v3192_v24, %v3184_v12 }
0x3721   :  { %8434 = vtanh.f32 %v9316_v26 }
0x372b   :  { %v8435_v27 = vpop.eup %8434 }
0x372c   :  { %3197 = vrot.lane.b32.xlu1 %v8435_v27, %s8754_s2 }
0x379e   :  { %v3198_v33 = vpop.permute.xlu1 %3197 }
0x379f   :  { %v3200_v23 = vmul.f32 %v8433_v17, %v3198_v33 }
0x37a1   :  { %3273 = vrot.lane.b32.xlu0 %v3200_v23, %s8755_s27 }
0x3813   :  { %v3274_v34 = vpop.permute.xlu0 %3273 }
0x3814   :  { %6724 = vmatmul.mubr.msk.f32.vlgmr.msra.gmra.mrb[28].mxu0 %vm178_vm2, %v3274_v34 }
0x3815   :  { %7935 = vmatpush3.bf16.msra.mxu0 %v9252_v22  ;;  %7446 = vmatprep.mubr.msk.f32.mxu0 %vm8752_vm0, %v8753_v1 }
0x3816   :  { %7937 = vmatprep.subr.bf16.mxu0 %v9256_v29 }
0x38e7   :  { %v3343_v2 = vpop.f32.mrb[28].mxu0 }
0x38e8   :  { %v3348_v35 = vadd.f32 %v3343_v2, %v9207_v25  ;;  %v3345_v36 = vpop.f32.mrb[29].mxu0 }
0x38e9   :  { %v3349_v38 = vadd.f32 %v3345_v36, %v9214_v31 }
0x38ea   :  { %v6725_v37 = vmul.f32 -1.442695, %v3348_v35 }
0x38eb   :  { %v6726_v52 = vmul.f32 -1.442695, %v3349_v38 }
0x38ec   :  { %8436 = vpow2.f32 %v6725_v37 }
0x38ed   :  { %8438 = vtanh.f32 %v3349_v38 }
0x38f6   :  { %v8437_v41 = vpop.eup %8436 }
0x38f7   :  { %v3356_v57 = vadd.f32 1.0, %v8437_v41  ;;  %v8439_v44 = vpop.eup %8438 }
0x38f9   :  { %8440 = vrcp.f32 %v3356_v57 }
0x38fa   :  { %8442 = vpow2.f32 %v6726_v52 }
0x3903   :  { %v8441_v45 = vpop.eup %8440 }
0x3904   :  { %v3364_v47 = vmul.f32 %v8441_v45, %v8439_v44  ;;  %v8443_v53 = vpop.eup %8442  ;;  %v3363_v56 = vmul.f32 %v8441_v45, %v9234_v13 }
0x3905   :  { %v3357_v54 = vadd.f32 1.0, %v8443_v53 }
0x3906   :  { %3366 = vrot.lane.b32.xlu1 %v3364_v47, %s8754_s2 }
0x3907   :  { %8444 = vrcp.f32 %v3357_v54 }
0x3911   :  { %v8445_v55 = vpop.eup %8444 }
0x3978   :  { %v3367_v60 = vpop.permute.xlu1 %3366 }
0x3979   :  { %v9330_v63 = vadd.f32 %v3367_v60, %v3363_v56 }
0x397b   :  { %8446 = vtanh.f32 %v9330_v63 }
0x3985   :  { %v8447_v6 = vpop.eup %8446 }
0x3986   :  { %v3371_v7 = vmul.f32 %v8447_v6, %v8445_v55 }
0x3988   :  { %3443 = vrot.lane.b32.xlu0 %v3371_v7, %s8754_s2 }
0x39fa   :  { %v3444_v49 = vpop.permute.xlu0 %3443 }
0x39fb   :  { %7429 = vmatmul.mubr.msk.f32.vlgmr.msra.gmra.mrb[24].mxu1 %vm2569_vm12, %v3444_v49 }
0x39fc   :  { %7929 = vmatpush3.bf16.msra.mxu1 %v9191_v18  ;;  %7439 = vmatprep.mubr.msk.f32.mxu1 %vm8752_vm0, %v8753_v1 }
0x39fd   :  { %7930 = vmatprep.subr.bf16.mxu1 %v8751_v0 }
0x3a00   :  { %7932 = vmatpush3.bf16.msra.mxu1 %v9195_v5 }
0x3a01   :  { %7960 = vmatprep.subr.bf16.mxu1 %v8751_v0 }
0x3a03   :  { %7440 = vmatmul.mubr.msk.f32.vlgmr.msra.gmra.mrb[26].mxu1 %vm178_vm2, %v3274_v34 }
0x3a04   :  { %7962 = vmatpush3.bf16.msra.mxu1 %v9254_v10  ;;  %7453 = vmatprep.mubr.msk.f32.mxu1 %vm8752_vm0, %v8753_v1 }
0x3a05   :  { %7963 = vmatprep.subr.bf16.mxu1 %v8751_v0 }
0x3ace   :  { %v3513_v13 = vpop.f32.mrb[24].mxu1 }
0x3acf   :  { %v3514_v61 = vadd.f32 %v3513_v13, %v9309_v4  ;;  %v7430_v14 = vpop.f32.mrb[25].mxu1 }
0x3ad1   :  { %v3517_v28 = vadd.f32 %v9244_v62, %v3514_v61 }
0x3ad3   :  { %8448 = vtanh.f32 %v3517_v28  ;;  %v6729_v19 = vmul.f32 -1.442695, %v3517_v28 }
0x3ad5   :  { %8450 = vpow2.f32 %v6729_v19 }
0x3ad6   :  { %v3614_v15 = vpop.f32.mrb[26].mxu1 }
0x3ad7   :  { %v7441_v21 = vpop.f32.mrb[27].mxu1 }
0x3add   :  { %v8449_v17 = vpop.eup %8448 }
0x3ade   :  { %3527 = vrot.lane.b32.xlu1 %v8449_v17, %s8756_s28 }
0x3adf   :  { %v8451_v20 = vpop.eup %8450 }
0x3ae0   :  { %v3521_v12 = vadd.f32 1.0, %v8451_v20 }
0x3ae2   :  { %8452 = vrcp.f32 %v3521_v12 }
0x3aec   :  { %v8453_v24 = vpop.eup %8452 }
0x3aed   :  { %v3525_v4 = vmul.f32 %v8453_v24, %v9249_v16 }
0x3b50   :  { %v3528_v27 = vpop.permute.xlu1 %3527 }
0x3b51   :  { %v3530_v33 = vmul.f32 %v8453_v24, %v3528_v27 }
0x3b53   :  { %3532 = vrot.lane.b32.xlu0 %v3530_v33, %s8750_s18 }
0x3bc5   :  { %v3533_v23 = vpop.permute.xlu0 %3532 }
0x3bc6   :  { %v9351_v34 = vadd.f32 %v3533_v23, %v3525_v4 }
0x3bc8   :  { %8454 = vtanh.f32 %v9351_v34 }
0x3bd2   :  { %v8455_v2 = vpop.eup %8454 }
0x3bd3   :  { %3538 = vrot.lane.b32.xlu1 %v8455_v2, %s8755_s27 }
0x3c45   :  { %v3539_v35 = vpop.permute.xlu1 %3538 }
0x3c46   :  { %v3541_v36 = vmul.f32 %v8453_v24, %v3539_v35 }
0x3c48   :  { %3543 = vrot.lane.b32.xlu0 %v3541_v36, %s8757_s29 }
0x3cba   :  { %v3544_v37 = vpop.permute.xlu0 %3543 }
0x3cbb   :  { %3547 = vst.msk [vmem:[#allocation9 + $0x4] sm:$0xf] %vm1731_vm3, %v3544_v37  ;;  %7447 = vmatmul.mubr.msk.f32.vlgmr.msra.gmra.mrb[30].mxu0 %vm1629_vm4, %v3544_v37  ;;  %7454 = vmatmul.mubr.msk.f32.vlgmr.msra.gmra.mrb[28].mxu1 %vm1629_vm4, %v3544_v37 }
0x3cbc   :  { %7939 = vmatpush1.bf16.msra.mxu0 %v9264_v39  ;;  %3779 = vmatprep.mubr.f32.mxu0 %v8753_v1 }
0x3cbd   :  { %7941 = vmatprep.subr.bf16.mxu0 %v9266_v40  ;;  %7965 = vmatpush3.bf16.msra.mxu1 %v9218_v42 }
0x3cbe   :  { %7966 = vmatprep.subr.bf16.mxu1 %v8751_v0  ;;  %7472 = vmatprep.mubr.msk.f32.mxu1 %vm8752_vm0, %v8753_v1 }
0x3cc0   :  { %7943 = vmatpush1.bf16.msra.mxu0 %v9272_v48 }
0x3cc1   :  { %7945 = vmatprep.subr.bf16.mxu0 %v9276_v51  ;;  %7968 = vmatpush3.bf16.msra.mxu1 %v9221_v43 }
0x3cc2   :  { %7969 = vmatprep.subr.bf16.mxu1 %v8751_v0 }
0x3cc4   :  { %7947 = vmatpush1.bf16.msra.mxu0 %v9283_v58 }
0x3cc5   :  { %7949 = vmatprep.subr.bf16.mxu0 %v9286_v59  ;;  %7971 = vmatpush3.bf16.msra.mxu1 %v9225_v46 }
0x3cc6   :  { %7972 = vmatprep.subr.bf16.mxu1 %v8751_v0 }
0x3cc8   :  { %7951 = vmatpush1.bf16.msra.mxu0 %v9291_v30 }
0x3cc9   :  { %7953 = vmatprep.subr.bf16.mxu0 %v9176_v3  ;;  %7974 = vmatpush3.bf16.msra.mxu1 %v9229_v50 }
0x3cca   :  { %7975 = vmatprep.subr.bf16.mxu1 %v8751_v0 }
0x3ccb   :  { %6733 = vmatmul.mubr.msk.f32.vlgmr.msra.gmra.mrb[32].mxu0 %vm2569_vm12, %v3444_v49 }
0x3ccc   :  { %7955 = vmatpush1.bf16.msra.mxu0 %v9178_v9  ;;  %3855 = vmatprep.mubr.f32.mxu0 %v8753_v1 }
0x3ccd   :  { %7957 = vmatprep.subr.bf16.mxu0 %v9180_v11 }
0x3cd0   :  { %7959 = vmatpush1.bf16.msra.mxu0 %v9184_v32 }
0x3cd1   :  { %7981 = vmatprep.subr.bf16.mxu0 %v8751_v0 }
0x3d8e   :  { %v3686_v16 = vpop.f32.mrb[30].mxu0  ;;  %v9384_v38 = vpop.f32.mrb[28].mxu1 }
0x3d8f   :  { %v3687_v41 = vadd.f32 %v3686_v16, %v3614_v15  ;;  %v7448_v57 = vpop.f32.mrb[31].mxu0  ;;  %v7455_v44 = vpop.f32.mrb[29].mxu1 }
0x3d91   :  { %v3690_v45 = vadd.f32 %v9307_v8, %v3687_v41 }
0x3d93   :  { %8456 = vtanh.f32 %v3690_v45  ;;  %v6732_v52 = vmul.f32 -1.442695, %v3690_v45 }
0x3d95   :  { %8458 = vpow2.f32 %v6732_v52 }
0x3d9d   :  { %v8457_v47 = vpop.eup %8456 }
0x3d9e   :  { %3700 = vrot.lane.b32.xlu1 %v8457_v47, %s8754_s2 }
0x3d9f   :  { %v8459_v53 = vpop.eup %8458 }
0x3da0   :  { %v3694_v54 = vadd.f32 1.0, %v8459_v53 }
0x3da2   :  { %8460 = vrcp.f32 %v3694_v54 }
0x3dac   :  { %v8461_v56 = vpop.eup %8460 }
0x3dad   :  { %v3698_v6 = vmul.f32 %v8461_v56, %v9316_v26 }
0x3e10   :  { %v3701_v60 = vpop.permute.xlu1 %3700 }
0x3e11   :  { %v3703_v55 = vmul.f32 %v8461_v56, %v3701_v60 }
0x3e13   :  { %3705 = vrot.lane.b32.xlu0 %v3703_v55, %s8755_s27 }
0x3e85   :  { %v3706_v7 = vpop.permute.xlu0 %3705 }
0x3e86   :  { %v9390_v49 = vadd.f32 %v3706_v7, %v3698_v6 }
0x3e88   :  { %8462 = vtanh.f32 %v9390_v49 }
0x3e92   :  { %v8463_v13 = vpop.eup %8462 }
0x3e93   :  { %3711 = vrot.lane.b32.xlu1 %v8463_v13, %s8754_s2 }
0x3f05   :  { %v3712_v61 = vpop.permute.xlu1 %3711 }
0x3f06   :  { %v3714_v14 = vmul.f32 %v8461_v56, %v3712_v61 }
0x3f08   :  { %3787 = vrot.lane.b32.xlu0 %v3714_v14, %s8755_s27 }
0x3f7a   :  { %v3788_v28 = vpop.permute.xlu0 %3787 }
0x3f7b   :  { %6734 = vmatmul.mubr.msk.f32.vlgmr.msra.gmra.mrb[32].mxu0 %vm178_vm2, %v3788_v28 }
0x3f7c   :  { %7983 = vmatpush3.bf16.msra.mxu0 %v9252_v22  ;;  %7490 = vmatprep.mubr.msk.f32.mxu0 %vm8752_vm0, %v8753_v1 }
0x3f7d   :  { %7985 = vmatprep.subr.bf16.mxu0 %v9256_v29 }
0x404e   :  { %v3857_v26 = vpop.f32.mrb[32].mxu0 }
0x404f   :  { %v3862_v15 = vadd.f32 %v3857_v26, %v9207_v25  ;;  %v3859_v21 = vpop.f32.mrb[33].mxu0 }
0x4050   :  { %v3863_v19 = vadd.f32 %v3859_v21, %v9214_v31 }
0x4051   :  { %v6735_v17 = vmul.f32 -1.442695, %v3862_v15 }
0x4052   :  { %v6736_v4 = vmul.f32 -1.442695, %v3863_v19 }
0x4053   :  { %8464 = vpow2.f32 %v6735_v17 }
0x4054   :  { %8466 = vtanh.f32 %v3863_v19 }
0x405d   :  { %v8465_v20 = vpop.eup %8464 }
0x405e   :  { %v3870_v12 = vadd.f32 1.0, %v8465_v20  ;;  %v8467_v24 = vpop.eup %8466 }
0x4060   :  { %8468 = vrcp.f32 %v3870_v12 }
0x4061   :  { %8470 = vpow2.f32 %v6736_v4 }
0x406a   :  { %v8469_v27 = vpop.eup %8468 }
0x406b   :  { %v3878_v33 = vmul.f32 %v8469_v27, %v8467_v24  ;;  %v8471_v23 = vpop.eup %8470  ;;  %v3877_v35 = vmul.f32 %v8469_v27, %v9330_v63 }
0x406c   :  { %v3871_v2 = vadd.f32 1.0, %v8471_v23 }
0x406d   :  { %3880 = vrot.lane.b32.xlu1 %v3878_v33, %s8754_s2 }
0x406e   :  { %8472 = vrcp.f32 %v3871_v2 }
0x4078   :  { %v8473_v16 = vpop.eup %8472 }
0x40df   :  { %v3881_v36 = vpop.permute.xlu1 %3880 }
0x40e0   :  { %v9404_v37 = vadd.f32 %v3881_v36, %v3877_v35 }
0x40e2   :  { %8474 = vtanh.f32 %v9404_v37 }
0x40ec   :  { %v8475_v41 = vpop.eup %8474 }
0x40ed   :  { %v3885_v57 = vmul.f32 %v8475_v41, %v8473_v16 }
0x40ef   :  { %3957 = vrot.lane.b32.xlu0 %v3885_v57, %s8754_s2 }
0x4161   :  { %v3958_v44 = vpop.permute.xlu0 %3957 }
0x4162   :  { %7473 = vmatmul.mubr.msk.f32.vlgmr.msra.gmra.mrb[30].mxu1 %vm2569_vm12, %v3958_v44 }
0x4163   :  { %7977 = vmatpush3.bf16.msra.mxu1 %v9191_v18  ;;  %7483 = vmatprep.mubr.msk.f32.mxu1 %vm8752_vm0, %v8753_v1 }
0x4164   :  { %7978 = vmatprep.subr.bf16.mxu1 %v8751_v0 }
0x4167   :  { %7980 = vmatpush3.bf16.msra.mxu1 %v9195_v5 }
0x4168   :  { %8008 = vmatprep.subr.bf16.mxu1 %v8751_v0 }
0x416a   :  { %7484 = vmatmul.mubr.msk.f32.vlgmr.msra.gmra.mrb[32].mxu1 %vm178_vm2, %v3788_v28 }
0x416b   :  { %8010 = vmatpush3.bf16.msra.mxu1 %v9254_v10  ;;  %7497 = vmatprep.mubr.msk.f32.mxu1 %vm8752_vm0, %v8753_v1 }
0x416c   :  { %8011 = vmatprep.subr.bf16.mxu1 %v8751_v0 }
0x4235   :  { %v4027_v63 = vpop.f32.mrb[30].mxu1 }
0x4236   :  { %v4028_v45 = vadd.f32 %v4027_v63, %v9384_v38  ;;  %v7474_v47 = vpop.f32.mrb[31].mxu1 }
0x4238   :  { %v4031_v52 = vadd.f32 %v9244_v62, %v4028_v45 }
0x423a   :  { %8476 = vtanh.f32 %v4031_v52  ;;  %v6739_v60 = vmul.f32 -1.442695, %v4031_v52 }
0x423c   :  { %8478 = vpow2.f32 %v6739_v60 }
0x423d   :  { %v4128_v53 = vpop.f32.mrb[32].mxu1 }
0x423e   :  { %v7485_v54 = vpop.f32.mrb[33].mxu1 }
0x4244   :  { %v8477_v56 = vpop.eup %8476 }
0x4245   :  { %4041 = vrot.lane.b32.xlu1 %v8477_v56, %s8756_s28 }
0x4246   :  { %v8479_v55 = vpop.eup %8478 }
0x4247   :  { %v4035_v6 = vadd.f32 1.0, %v8479_v55 }
0x4249   :  { %8480 = vrcp.f32 %v4035_v6 }
0x4253   :  { %v8481_v7 = vpop.eup %8480 }
0x4254   :  { %v4039_v38 = vmul.f32 %v8481_v7, %v9351_v34 }
0x42b7   :  { %v4042_v13 = vpop.permute.xlu1 %4041 }
0x42b8   :  { %v4044_v61 = vmul.f32 %v8481_v7, %v4042_v13 }
0x42ba   :  { %4046 = vrot.lane.b32.xlu0 %v4044_v61, %s8750_s18 }
0x432c   :  { %v4047_v14 = vpop.permute.xlu0 %4046 }
0x432d   :  { %v9425_v28 = vadd.f32 %v4047_v14, %v4039_v38 }
0x432f   :  { %8482 = vtanh.f32 %v9425_v28 }
0x4339   :  { %v8483_v26 = vpop.eup %8482 }
0x433a   :  { %4052 = vrot.lane.b32.xlu1 %v8483_v26, %s8755_s27 }
0x43ac   :  { %v4053_v15 = vpop.permute.xlu1 %4052 }
0x43ad   :  { %v4055_v21 = vmul.f32 %v8481_v7, %v4053_v15 }
0x43af   :  { %4057 = vrot.lane.b32.xlu0 %v4055_v21, %s8757_s29 }
0x4421   :  { %v4058_v17 = vpop.permute.xlu0 %4057 }
0x4422   :  { %4061 = vst.msk [vmem:[#allocation9 + $0x8] sm:$0xf] %vm1731_vm3, %v4058_v17  ;;  %7491 = vmatmul.mubr.msk.f32.vlgmr.msra.gmra.mrb[34].mxu0 %vm1629_vm4, %v4058_v17  ;;  %7498 = vmatmul.mubr.msk.f32.vlgmr.msra.gmra.mrb[34].mxu1 %vm1629_vm4, %v4058_v17 }
0x4423   :  { %7987 = vmatpush1.bf16.msra.mxu0 %v9264_v39  ;;  %4293 = vmatprep.mubr.f32.mxu0 %v8753_v1 }
0x4424   :  { %7989 = vmatprep.subr.bf16.mxu0 %v9266_v40  ;;  %8013 = vmatpush3.bf16.msra.mxu1 %v9218_v42 }
0x4425   :  { %8014 = vmatprep.subr.bf16.mxu1 %v8751_v0  ;;  %7516 = vmatprep.mubr.msk.f32.mxu1 %vm8752_vm0, %v8753_v1 }
0x4427   :  { %7991 = vmatpush1.bf16.msra.mxu0 %v9272_v48 }
0x4428   :  { %7993 = vmatprep.subr.bf16.mxu0 %v9276_v51  ;;  %8016 = vmatpush3.bf16.msra.mxu1 %v9221_v43 }
0x4429   :  { %8017 = vmatprep.subr.bf16.mxu1 %v8751_v0 }
0x442b   :  { %7995 = vmatpush1.bf16.msra.mxu0 %v9283_v58 }
0x442c   :  { %7997 = vmatprep.subr.bf16.mxu0 %v9286_v59  ;;  %8019 = vmatpush3.bf16.msra.mxu1 %v9225_v46 }
0x442d   :  { %8020 = vmatprep.subr.bf16.mxu1 %v8751_v0 }
0x442f   :  { %7999 = vmatpush1.bf16.msra.mxu0 %v9291_v30 }
0x4430   :  { %8001 = vmatprep.subr.bf16.mxu0 %v9176_v3  ;;  %8022 = vmatpush3.bf16.msra.mxu1 %v9229_v50 }
0x4431   :  { %8023 = vmatprep.subr.bf16.mxu1 %v8751_v0 }
0x4432   :  { %6743 = vmatmul.mubr.msk.f32.vlgmr.msra.gmra.mrb[36].mxu0 %vm2569_vm12, %v3958_v44 }
0x4433   :  { %8003 = vmatpush1.bf16.msra.mxu0 %v9178_v9  ;;  %4369 = vmatprep.mubr.f32.mxu0 %v8753_v1 }
0x4434   :  { %8005 = vmatprep.subr.bf16.mxu0 %v9180_v11 }
0x4437   :  { %8007 = vmatpush1.bf16.msra.mxu0 %v9184_v32 }
0x4438   :  { %8029 = vmatprep.subr.bf16.mxu0 %v8751_v0 }
0x44f5   :  { %v4200_v34 = vpop.f32.mrb[34].mxu0  ;;  %v9458_v19 = vpop.f32.mrb[34].mxu1 }
0x44f6   :  { %v4201_v20 = vadd.f32 %v4200_v34, %v4128_v53  ;;  %v7492_v12 = vpop.f32.mrb[35].mxu0  ;;  %v7499_v24 = vpop.f32.mrb[35].mxu1 }
0x44f8   :  { %v4204_v27 = vadd.f32 %v9307_v8, %v4201_v20 }
0x44fa   :  { %8484 = vtanh.f32 %v4204_v27  ;;  %v6742_v4 = vmul.f32 -1.442695, %v4204_v27 }
0x44fc   :  { %8486 = vpow2.f32 %v6742_v4 }
0x4504   :  { %v8485_v33 = vpop.eup %8484 }
0x4505   :  { %4214 = vrot.lane.b32.xlu1 %v8485_v33, %s8754_s2 }
0x4506   :  { %v8487_v23 = vpop.eup %8486 }
0x4507   :  { %v4208_v2 = vadd.f32 1.0, %v8487_v23 }
0x4509   :  { %8488 = vrcp.f32 %v4208_v2 }
0x4513   :  { %v8489_v35 = vpop.eup %8488 }
0x4514   :  { %v4212_v41 = vmul.f32 %v8489_v35, %v9390_v49 }
0x4577   :  { %v4215_v36 = vpop.permute.xlu1 %4214 }
0x4578   :  { %v4217_v16 = vmul.f32 %v8489_v35, %v4215_v36 }
0x457a   :  { %4219 = vrot.lane.b32.xlu0 %v4217_v16, %s8755_s27 }
0x45ec   :  { %v4220_v57 = vpop.permute.xlu0 %4219 }
0x45ed   :  { %v9464_v44 = vadd.f32 %v4220_v57, %v4212_v41 }
0x45ef   :  { %8490 = vtanh.f32 %v9464_v44 }
0x45f9   :  { %v8491_v63 = vpop.eup %8490 }
0x45fa   :  { %4225 = vrot.lane.b32.xlu1 %v8491_v63, %s8754_s2 }
0x466c   :  { %v4226_v45 = vpop.permute.xlu1 %4225 }
0x466d   :  { %v4228_v47 = vmul.f32 %v8489_v35, %v4226_v45 }
0x466f   :  { %4301 = vrot.lane.b32.xlu0 %v4228_v47, %s8755_s27 }
0x46e1   :  { %v4302_v52 = vpop.permute.xlu0 %4301 }
0x46e2   :  { %6744 = vmatmul.mubr.msk.f32.vlgmr.msra.gmra.mrb[36].mxu0 %vm178_vm2, %v4302_v52 }
0x46e3   :  { %8031 = vmatpush3.bf16.msra.mxu0 %v9252_v22  ;;  %7534 = vmatprep.mubr.msk.f32.mxu0 %vm8752_vm0, %v8753_v1 }
0x46e4   :  { %8033 = vmatprep.subr.bf16.mxu0 %v9256_v29 }
0x47b5   :  { %v4371_v49 = vpop.f32.mrb[36].mxu0 }
0x47b6   :  { %v4376_v53 = vadd.f32 %v4371_v49, %v9207_v25  ;;  %v4373_v54 = vpop.f32.mrb[37].mxu0 }
0x47b7   :  { %v4377_v60 = vadd.f32 %v4373_v54, %v9214_v31 }
0x47b8   :  { %v6745_v56 = vmul.f32 -1.442695, %v4376_v53 }
0x47b9   :  { %v6746_v38 = vmul.f32 -1.442695, %v4377_v60 }
0x47ba   :  { %8492 = vpow2.f32 %v6745_v56 }
0x47bb   :  { %8494 = vtanh.f32 %v4377_v60 }
0x47c4   :  { %v8493_v55 = vpop.eup %8492 }
0x47c5   :  { %v4384_v6 = vadd.f32 1.0, %v8493_v55  ;;  %v8495_v7 = vpop.eup %8494 }
0x47c7   :  { %8496 = vrcp.f32 %v4384_v6 }
0x47c8   :  { %8498 = vpow2.f32 %v6746_v38 }
0x47d1   :  { %v8497_v13 = vpop.eup %8496 }
0x47d2   :  { %v4392_v61 = vmul.f32 %v8497_v13, %v8495_v7  ;;  %v8499_v14 = vpop.eup %8498  ;;  %v4391_v15 = vmul.f32 %v8497_v13, %v9404_v37 }
0x47d3   :  { %v4385_v26 = vadd.f32 1.0, %v8499_v14 }
0x47d4   :  { %4394 = vrot.lane.b32.xlu1 %v4392_v61, %s8754_s2 }
0x47d5   :  { %8500 = vrcp.f32 %v4385_v26 }
0x47df   :  { %v8501_v34 = vpop.eup %8500 }
0x4846   :  { %v4395_v21 = vpop.permute.xlu1 %4394 }
0x4847   :  { %v9478_v17 = vadd.f32 %v4395_v21, %v4391_v15 }
0x4849   :  { %8502 = vtanh.f32 %v9478_v17 }
0x4853   :  { %v8503_v20 = vpop.eup %8502 }
0x4854   :  { %v4399_v12 = vmul.f32 %v8503_v20, %v8501_v34 }
0x4856   :  { %4471 = vrot.lane.b32.xlu0 %v4399_v12, %s8754_s2 }
0x48c8   :  { %v4472_v24 = vpop.permute.xlu0 %4471 }
0x48c9   :  { %7517 = vmatmul.mubr.msk.f32.vlgmr.msra.gmra.mrb[36].mxu1 %vm2569_vm12, %v4472_v24 }
0x48ca   :  { %8025 = vmatpush3.bf16.msra.mxu1 %v9191_v18  ;;  %7527 = vmatprep.mubr.msk.f32.mxu1 %vm8752_vm0, %v8753_v1 }
0x48cb   :  { %8026 = vmatprep.subr.bf16.mxu1 %v8751_v0 }
0x48ce   :  { %8028 = vmatpush3.bf16.msra.mxu1 %v9195_v5 }
0x48cf   :  { %8056 = vmatprep.subr.bf16.mxu1 %v8751_v0 }
0x48d1   :  { %7528 = vmatmul.mubr.msk.f32.vlgmr.msra.gmra.mrb[38].mxu1 %vm178_vm2, %v4302_v52 }
0x48d2   :  { %8058 = vmatpush3.bf16.msra.mxu1 %v9254_v10  ;;  %7541 = vmatprep.mubr.msk.f32.mxu1 %vm8752_vm0, %v8753_v1 }
0x48d3   :  { %8059 = vmatprep.subr.bf16.mxu1 %v8751_v0 }
0x499c   :  { %v4541_v37 = vpop.f32.mrb[36].mxu1 }
0x499d   :  { %v4542_v27 = vadd.f32 %v4541_v37, %v9458_v19  ;;  %v7518_v33 = vpop.f32.mrb[37].mxu1 }
0x499f   :  { %v4545_v4 = vadd.f32 %v9244_v62, %v4542_v27 }
0x49a1   :  { %8504 = vtanh.f32 %v4545_v4  ;;  %v6749_v36 = vmul.f32 -1.442695, %v4545_v4 }
0x49a3   :  { %8506 = vpow2.f32 %v6749_v36 }
0x49a4   :  { %v4642_v23 = vpop.f32.mrb[38].mxu1 }
0x49a5   :  { %v7529_v2 = vpop.f32.mrb[39].mxu1 }
0x49ab   :  { %v8505_v35 = vpop.eup %8504 }
0x49ac   :  { %4555 = vrot.lane.b32.xlu1 %v8505_v35, %s8756_s28 }
0x49ad   :  { %v8507_v16 = vpop.eup %8506 }
0x49ae   :  { %v4549_v41 = vadd.f32 1.0, %v8507_v16 }
0x49b0   :  { %8508 = vrcp.f32 %v4549_v41 }
0x49ba   :  { %v8509_v57 = vpop.eup %8508 }
0x49bb   :  { %v4553_v19 = vmul.f32 %v8509_v57, %v9425_v28 }
0x4a1e   :  { %v4556_v63 = vpop.permute.xlu1 %4555 }
0x4a1f   :  { %v4558_v45 = vmul.f32 %v8509_v57, %v4556_v63 }
0x4a21   :  { %4560 = vrot.lane.b32.xlu0 %v4558_v45, %s8750_s18 }
0x4a93   :  { %v4561_v47 = vpop.permute.xlu0 %4560 }
0x4a94   :  { %v9499_v62 = vadd.f32 %v4561_v47, %v4553_v19 }
0x4a96   :  { %8510 = vtanh.f32 %v9499_v62 }
0x4aa0   :  { %v8511_v52 = vpop.eup %8510 }
0x4aa1   :  { %4566 = vrot.lane.b32.xlu1 %v8511_v52, %s8755_s27 }
0x4b13   :  { %v4567_v49 = vpop.permute.xlu1 %4566 }
0x4b14   :  { %v4569_v53 = vmul.f32 %v8509_v57, %v4567_v49 }
0x4b16   :  { %4571 = vrot.lane.b32.xlu0 %v4569_v53, %s8757_s29 }
0x4b88   :  { %v4572_v54 = vpop.permute.xlu0 %4571 }
0x4b89   :  { %4575 = vst.msk [vmem:[#allocation9 + $0xc] sm:$0xf] %vm1731_vm3, %v4572_v54  ;;  %7535 = vmatmul.mubr.msk.f32.vlgmr.msra.gmra.mrb[38].mxu0 %vm1629_vm4, %v4572_v54  ;;  %7542 = vmatmul.mubr.msk.f32.vlgmr.msra.gmra.mrb[40].mxu1 %vm1629_vm4, %v4572_v54 }
0x4b8a   :  { %8035 = vmatpush1.bf16.msra.mxu0 %v9264_v39  ;;  %4807 = vmatprep.mubr.f32.mxu0 %v8753_v1 }
0x4b8b   :  { %8037 = vmatprep.subr.bf16.mxu0 %v9266_v40  ;;  %8061 = vmatpush3.bf16.msra.mxu1 %v9218_v42 }
0x4b8c   :  { %8062 = vmatprep.subr.bf16.mxu1 %v8751_v0  ;;  %7560 = vmatprep.mubr.msk.f32.mxu1 %vm8752_vm0, %v8753_v1 }
0x4b8e   :  { %8039 = vmatpush1.bf16.msra.mxu0 %v9272_v48 }
0x4b8f   :  { %8041 = vmatprep.subr.bf16.mxu0 %v9276_v51  ;;  %8064 = vmatpush3.bf16.msra.mxu1 %v9221_v43 }
0x4b90   :  { %8065 = vmatprep.subr.bf16.mxu1 %v8751_v0 }
0x4b92   :  { %8043 = vmatpush1.bf16.msra.mxu0 %v9283_v58 }
0x4b93   :  { %8045 = vmatprep.subr.bf16.mxu0 %v9286_v59  ;;  %8067 = vmatpush3.bf16.msra.mxu1 %v9225_v46 }
0x4b94   :  { %8068 = vmatprep.subr.bf16.mxu1 %v8751_v0 }
0x4b96   :  { %8047 = vmatpush1.bf16.msra.mxu0 %v9291_v30 }
0x4b97   :  { %8049 = vmatprep.subr.bf16.mxu0 %v9176_v3  ;;  %8070 = vmatpush3.bf16.msra.mxu1 %v9229_v50 }
0x4b98   :  { %8071 = vmatprep.subr.bf16.mxu1 %v8751_v0 }
0x4b99   :  { %6753 = vmatmul.mubr.msk.f32.vlgmr.msra.gmra.mrb[40].mxu0 %vm2569_vm12, %v4472_v24 }
0x4b9a   :  { %8051 = vmatpush1.bf16.msra.mxu0 %v9178_v9  ;;  %4883 = vmatprep.mubr.f32.mxu0 %v8753_v1 }
0x4b9b   :  { %8053 = vmatprep.subr.bf16.mxu0 %v9180_v11 }
0x4b9e   :  { %8055 = vmatpush1.bf16.msra.mxu0 %v9184_v32 }
0x4b9f   :  { %8077 = vmatprep.subr.bf16.mxu0 %v8751_v0 }
0x4c5c   :  { %v4714_v28 = vpop.f32.mrb[38].mxu0  ;;  %v9532_v56 = vpop.f32.mrb[40].mxu1 }
0x4c5d   :  { %v4715_v60 = vadd.f32 %v4714_v28, %v4642_v23  ;;  %v7536_v55 = vpop.f32.mrb[39].mxu0  ;;  %v7543_v6 = vpop.f32.mrb[41].mxu1 }
0x4c5f   :  { %v4718_v7 = vadd.f32 %v9307_v8, %v4715_v60 }
0x4c61   :  { %8512 = vtanh.f32 %v4718_v7  ;;  %v6752_v61 = vmul.f32 -1.442695, %v4718_v7 }
0x4c63   :  { %8514 = vpow2.f32 %v6752_v61 }
0x4c6b   :  { %v8513_v13 = vpop.eup %8512 }
0x4c6c   :  { %4728 = vrot.lane.b32.xlu1 %v8513_v13, %s8754_s2  ;;  %v9569_v13 = vld [vmem:[#allocation6 + $0x1c0] ss:$0 sm:$0xff] }
0x4c6d   :  { %v8515_v38 = vpop.eup %8514 }
0x4c6e   :  { %v4722_v14 = vadd.f32 1.0, %v8515_v38 }
0x4c70   :  { %8516 = vrcp.f32 %v4722_v14 }
0x4c7a   :  { %v8517_v26 = vpop.eup %8516 }
0x4c7b   :  { %v4726_v34 = vmul.f32 %v8517_v26, %v9464_v44 }
0x4cde   :  { %v4729_v15 = vpop.permute.xlu1 %4728 }
0x4cdf   :  { %v4731_v21 = vmul.f32 %v8517_v26, %v4729_v15 }
0x4ce1   :  { %4733 = vrot.lane.b32.xlu0 %v4731_v21, %s8755_s27 }
0x4d53   :  { %v4734_v20 = vpop.permute.xlu0 %4733 }
0x4d54   :  { %v9538_v12 = vadd.f32 %v4734_v20, %v4726_v34 }
0x4d56   :  { %8518 = vtanh.f32 %v9538_v12 }
0x4d60   :  { %v8519_v24 = vpop.eup %8518 }
0x4d61   :  { %4739 = vrot.lane.b32.xlu1 %v8519_v24, %s8754_s2 }
0x4dd3   :  { %v4740_v37 = vpop.permute.xlu1 %4739 }
0x4dd4   :  { %v4742_v27 = vmul.f32 %v8517_v26, %v4740_v37 }
0x4dd6   :  { %4815 = vrot.lane.b32.xlu0 %v4742_v27, %s8755_s27 }
0x4e48   :  { %v4816_v33 = vpop.permute.xlu0 %4815 }
0x4e49   :  { %6754 = vmatmul.mubr.msk.f32.vlgmr.msra.gmra.mrb[40].mxu0 %vm178_vm2, %v4816_v33 }
0x4e4a   :  { %8079 = vmatpush3.bf16.msra.mxu0 %v9252_v22  ;;  %7578 = vmatprep.mubr.msk.f32.mxu0 %vm8752_vm0, %v8753_v1 }
0x4e4b   :  { %8081 = vmatprep.subr.bf16.mxu0 %v9256_v29 }
0x4f1c   :  { %v4885_v44 = vpop.f32.mrb[40].mxu0 }
0x4f1d   :  { %v4890_v4 = vadd.f32 %v4885_v44, %v9207_v25  ;;  %v4887_v23 = vpop.f32.mrb[41].mxu0 }
0x4f1e   :  { %v4891_v35 = vadd.f32 %v4887_v23, %v9214_v31 }
0x4f1f   :  { %v6755_v2 = vmul.f32 -1.442695, %v4890_v4 }
0x4f20   :  { %v6756_v45 = vmul.f32 -1.442695, %v4891_v35 }
0x4f21   :  { %8520 = vpow2.f32 %v6755_v2 }
0x4f22   :  { %8522 = vtanh.f32 %v4891_v35 }
0x4f2b   :  { %v8521_v36 = vpop.eup %8520 }
0x4f2c   :  { %v4898_v16 = vadd.f32 1.0, %v8521_v36  ;;  %v8523_v41 = vpop.eup %8522 }
0x4f2e   :  { %8524 = vrcp.f32 %v4898_v16 }
0x4f2f   :  { %8526 = vpow2.f32 %v6756_v45 }
0x4f38   :  { %v8525_v57 = vpop.eup %8524 }
0x4f39   :  { %v4906_v63 = vmul.f32 %v8525_v57, %v8523_v41  ;;  %v8527_v19 = vpop.eup %8526  ;;  %v4905_v52 = vmul.f32 %v8525_v57, %v9478_v17 }
0x4f3a   :  { %v4899_v47 = vadd.f32 1.0, %v8527_v19 }
0x4f3b   :  { %4908 = vrot.lane.b32.xlu1 %v4906_v63, %s8754_s2 }
0x4f3c   :  { %8528 = vrcp.f32 %v4899_v47 }
0x4f46   :  { %v8529_v54 = vpop.eup %8528 }
0x4fad   :  { %v4909_v49 = vpop.permute.xlu1 %4908 }
0x4fae   :  { %v9552_v53 = vadd.f32 %v4909_v49, %v4905_v52 }
0x4fb0   :  { %8530 = vtanh.f32 %v9552_v53 }
0x4fba   :  { %v8531_v28 = vpop.eup %8530 }
0x4fbb   :  { %v4913_v60 = vmul.f32 %v8531_v28, %v8529_v54 }
0x4fbd   :  { %4985 = vrot.lane.b32.xlu0 %v4913_v60, %s8754_s2 }
0x502f   :  { %v4986_v55 = vpop.permute.xlu0 %4985 }
0x5030   :  { %7561 = vmatmul.mubr.msk.f32.vlgmr.msra.gmra.mrb[42].mxu1 %vm2569_vm12, %v4986_v55 }
0x5031   :  { %8073 = vmatpush3.bf16.msra.mxu1 %v9191_v18  ;;  %7571 = vmatprep.mubr.msk.f32.mxu1 %vm8752_vm0, %v8753_v1 }
0x5032   :  { %8074 = vmatprep.subr.bf16.mxu1 %v8751_v0 }
0x5035   :  { %8076 = vmatpush3.bf16.msra.mxu1 %v9195_v5 }
0x5036   :  { %8104 = vmatprep.subr.bf16.mxu1 %v8751_v0 }
0x5038   :  { %7572 = vmatmul.mubr.msk.f32.vlgmr.msra.gmra.mrb[44].mxu1 %vm178_vm2, %v4816_v33 }
0x5039   :  { %8106 = vmatpush3.bf16.msra.mxu1 %v9254_v10  ;;  %7585 = vmatprep.mubr.msk.f32.mxu1 %vm8752_vm0, %v8753_v1 }
0x503a   :  { %8107 = vmatprep.subr.bf16.mxu1 %v8751_v0 }
0x5103   :  { %v5055_v17 = vpop.f32.mrb[42].mxu1 }
0x5104   :  { %v5056_v6 = vadd.f32 %v5055_v17, %v9532_v56  ;;  %v7562_v7 = vpop.f32.mrb[43].mxu1 }
0x5106   :  { %v5059_v61 = vadd.f32 %v9569_v13, %v5056_v6 }
0x5108   :  { %8532 = vtanh.f32 %v5059_v61  ;;  %v6759_v15 = vmul.f32 -1.442695, %v5059_v61 }
0x510a   :  { %8534 = vpow2.f32 %v6759_v15 }
0x510b   :  { %v5156_v38 = vpop.f32.mrb[44].mxu1 }
0x510c   :  { %v7573_v14 = vpop.f32.mrb[45].mxu1 }
0x5112   :  { %v8533_v26 = vpop.eup %8532 }
0x5113   :  { %5069 = vrot.lane.b32.xlu1 %v8533_v26, %s8756_s28 }
0x5114   :  { %v8535_v21 = vpop.eup %8534 }
0x5115   :  { %v5063_v34 = vadd.f32 1.0, %v8535_v21 }
0x5117   :  { %8536 = vrcp.f32 %v5063_v34 }
0x5121   :  { %v8537_v20 = vpop.eup %8536 }
0x5122   :  { %v5067_v56 = vmul.f32 %v8537_v20, %v9499_v62 }
0x5185   :  { %v5070_v24 = vpop.permute.xlu1 %5069 }
0x5186   :  { %v5072_v37 = vmul.f32 %v8537_v20, %v5070_v24 }
0x5188   :  { %5074 = vrot.lane.b32.xlu0 %v5072_v37, %s8750_s18 }
0x51fa   :  { %v5075_v27 = vpop.permute.xlu0 %5074 }
0x51fb   :  { %v9575_v33 = vadd.f32 %v5075_v27, %v5067_v56 }
0x51fd   :  { %8538 = vtanh.f32 %v9575_v33 }
0x5207   :  { %v8539_v44 = vpop.eup %8538 }
0x5208   :  { %5080 = vrot.lane.b32.xlu1 %v8539_v44, %s8755_s27 }
0x527a   :  { %v5081_v4 = vpop.permute.xlu1 %5080 }
0x527b   :  { %v5083_v23 = vmul.f32 %v8537_v20, %v5081_v4 }
0x527d   :  { %5085 = vrot.lane.b32.xlu0 %v5083_v23, %s8757_s29 }
0x52ef   :  { %v5086_v2 = vpop.permute.xlu0 %5085 }
0x52f0   :  { %5089 = vst.msk [vmem:[#allocation9 + $0x10] sm:$0xf] %vm1731_vm3, %v5086_v2  ;;  %7579 = vmatmul.mubr.msk.f32.vlgmr.msra.gmra.mrb[42].mxu0 %vm1629_vm4, %v5086_v2  ;;  %7586 = vmatmul.mubr.msk.f32.vlgmr.msra.gmra.mrb[46].mxu1 %vm1629_vm4, %v5086_v2 }
0x52f1   :  { %8083 = vmatpush1.bf16.msra.mxu0 %v9264_v39  ;;  %5321 = vmatprep.mubr.f32.mxu0 %v8753_v1 }
0x52f2   :  { %8085 = vmatprep.subr.bf16.mxu0 %v9266_v40  ;;  %8109 = vmatpush3.bf16.msra.mxu1 %v9218_v42 }
0x52f3   :  { %8110 = vmatprep.subr.bf16.mxu1 %v8751_v0  ;;  %7604 = vmatprep.mubr.msk.f32.mxu1 %vm8752_vm0, %v8753_v1 }
0x52f5   :  { %8087 = vmatpush1.bf16.msra.mxu0 %v9272_v48 }
0x52f6   :  { %8089 = vmatprep.subr.bf16.mxu0 %v9276_v51  ;;  %8112 = vmatpush3.bf16.msra.mxu1 %v9221_v43 }
0x52f7   :  { %8113 = vmatprep.subr.bf16.mxu1 %v8751_v0 }
0x52f9   :  { %8091 = vmatpush1.bf16.msra.mxu0 %v9283_v58 }
0x52fa   :  { %8093 = vmatprep.subr.bf16.mxu0 %v9286_v59  ;;  %8115 = vmatpush3.bf16.msra.mxu1 %v9225_v46 }
0x52fb   :  { %8116 = vmatprep.subr.bf16.mxu1 %v8751_v0 }
0x52fd   :  { %8095 = vmatpush1.bf16.msra.mxu0 %v9291_v30 }
0x52fe   :  { %8097 = vmatprep.subr.bf16.mxu0 %v9176_v3  ;;  %8118 = vmatpush3.bf16.msra.mxu1 %v9229_v50 }
0x52ff   :  { %8119 = vmatprep.subr.bf16.mxu1 %v8751_v0 }
0x5300   :  { %6763 = vmatmul.mubr.msk.f32.vlgmr.msra.gmra.mrb[44].mxu0 %vm2569_vm12, %v4986_v55 }
0x5301   :  { %8099 = vmatpush1.bf16.msra.mxu0 %v9178_v9  ;;  %5397 = vmatprep.mubr.f32.mxu0 %v8753_v1 }
0x5302   :  { %8101 = vmatprep.subr.bf16.mxu0 %v9180_v11 }
0x5305   :  { %8103 = vmatpush1.bf16.msra.mxu0 %v9184_v32 }
0x5306   :  { %8125 = vmatprep.subr.bf16.mxu0 %v8751_v0 }
0x53c3   :  { %v5228_v62 = vpop.f32.mrb[42].mxu0  ;;  %v9608_v35 = vpop.f32.mrb[46].mxu1 }
0x53c4   :  { %v5229_v36 = vadd.f32 %v5228_v62, %v5156_v38  ;;  %v7580_v16 = vpop.f32.mrb[43].mxu0  ;;  %v7587_v41 = vpop.f32.mrb[47].mxu1 }
0x53c6   :  { %v5232_v57 = vadd.f32 %v9307_v8, %v5229_v36 }
0x53c8   :  { %8540 = vtanh.f32 %v5232_v57  ;;  %v6762_v45 = vmul.f32 -1.442695, %v5232_v57 }
0x53ca   :  { %8542 = vpow2.f32 %v6762_v45 }
0x53d2   :  { %v8541_v63 = vpop.eup %8540 }
0x53d3   :  { %5242 = vrot.lane.b32.xlu1 %v8541_v63, %s8754_s2 }
0x53d4   :  { %v8543_v19 = vpop.eup %8542 }
0x53d5   :  { %v5236_v47 = vadd.f32 1.0, %v8543_v19 }
0x53d7   :  { %8544 = vrcp.f32 %v5236_v47 }
0x53e1   :  { %v8545_v52 = vpop.eup %8544 }
0x53e2   :  { %v5240_v28 = vmul.f32 %v8545_v52, %v9538_v12 }
0x5445   :  { %v5243_v49 = vpop.permute.xlu1 %5242 }
0x5446   :  { %v5245_v54 = vmul.f32 %v8545_v52, %v5243_v49 }
0x5448   :  { %5247 = vrot.lane.b32.xlu0 %v5245_v54, %s8755_s27 }
0x54ba   :  { %v5248_v60 = vpop.permute.xlu0 %5247 }
0x54bb   :  { %v9614_v55 = vadd.f32 %v5248_v60, %v5240_v28 }
0x54bd   :  { %8546 = vtanh.f32 %v9614_v55 }
0x54c7   :  { %v8547_v8 = vpop.eup %8546 }
0x54c8   :  { %5253 = vrot.lane.b32.xlu1 %v8547_v8, %s8754_s2 }
0x553a   :  { %v5254_v17 = vpop.permute.xlu1 %5253 }
0x553b   :  { %v5256_v6 = vmul.f32 %v8545_v52, %v5254_v17 }
0x553d   :  { %5329 = vrot.lane.b32.xlu0 %v5256_v6, %s8755_s27 }
0x55af   :  { %v5330_v7 = vpop.permute.xlu0 %5329 }
0x55b0   :  { %6764 = vmatmul.mubr.msk.f32.vlgmr.msra.gmra.mrb[44].mxu0 %vm178_vm2, %v5330_v7 }
0x55b1   :  { %8127 = vmatpush3.bf16.msra.mxu0 %v9252_v22  ;;  %7622 = vmatprep.mubr.msk.f32.mxu0 %vm8752_vm0, %v8753_v1 }
0x55b2   :  { %8129 = vmatprep.subr.bf16.mxu0 %v9256_v29 }
0x5683   :  { %v5399_v12 = vpop.f32.mrb[44].mxu0 }
0x5684   :  { %v5404_v61 = vadd.f32 %v5399_v12, %v9207_v25  ;;  %v5401_v38 = vpop.f32.mrb[45].mxu0 }
0x5685   :  { %v5405_v26 = vadd.f32 %v5401_v38, %v9214_v31 }
0x5686   :  { %v6765_v14 = vmul.f32 -1.442695, %v5404_v61 }
0x5687   :  { %v6766_v37 = vmul.f32 -1.442695, %v5405_v26 }
0x5688   :  { %8548 = vpow2.f32 %v6765_v14 }
0x5689   :  { %8550 = vtanh.f32 %v5405_v26 }
0x5692   :  { %v8549_v15 = vpop.eup %8548 }
0x5693   :  { %v5412_v21 = vadd.f32 1.0, %v8549_v15  ;;  %v8551_v34 = vpop.eup %8550 }
0x5695   :  { %8552 = vrcp.f32 %v5412_v21 }
0x5696   :  { %8554 = vpow2.f32 %v6766_v37 }
0x569f   :  { %v8553_v20 = vpop.eup %8552 }
0x56a0   :  { %v5420_v24 = vmul.f32 %v8553_v20, %v8551_v34  ;;  %v8555_v56 = vpop.eup %8554  ;;  %v5419_v44 = vmul.f32 %v8553_v20, %v9552_v53  ;;  %v9684_v34 = vld [vmem:[#allocation6 + $0x148] ss:$0 sm:$0xff] }
0x56a1   :  { %v5413_v27 = vadd.f32 1.0, %v8555_v56 }
0x56a2   :  { %5422 = vrot.lane.b32.xlu1 %v5420_v24, %s8754_s2 }
0x56a3   :  { %8556 = vrcp.f32 %v5413_v27 }
0x56ad   :  { %v8557_v2 = vpop.eup %8556 }
0x5714   :  { %v5423_v4 = vpop.permute.xlu1 %5422 }
0x5715   :  { %v9628_v23 = vadd.f32 %v5423_v4, %v5419_v44 }
0x5717   :  { %8558 = vtanh.f32 %v9628_v23 }
0x5721   :  { %v8559_v62 = vpop.eup %8558 }
0x5722   :  { %v5427_v36 = vmul.f32 %v8559_v62, %v8557_v2 }
0x5724   :  { %5499 = vrot.lane.b32.xlu0 %v5427_v36, %s8754_s2 }
0x5796   :  { %v5500_v16 = vpop.permute.xlu0 %5499 }
0x5797   :  { %7605 = vmatmul.mubr.msk.f32.vlgmr.msra.gmra.mrb[48].mxu1 %vm2569_vm12, %v5500_v16 }
0x5798   :  { %8121 = vmatpush3.bf16.msra.mxu1 %v9191_v18  ;;  %7615 = vmatprep.mubr.msk.f32.mxu1 %vm8752_vm0, %v8753_v1 }
0x5799   :  { %8122 = vmatprep.subr.bf16.mxu1 %v8751_v0 }
0x579c   :  { %8124 = vmatpush3.bf16.msra.mxu1 %v9195_v5 }
0x579d   :  { %8152 = vmatprep.subr.bf16.mxu1 %v8751_v0 }
0x579f   :  { %7616 = vmatmul.mubr.msk.f32.vlgmr.msra.gmra.mrb[50].mxu1 %vm178_vm2, %v5330_v7 }
0x57a0   :  { %8154 = vmatpush3.bf16.msra.mxu1 %v9254_v10  ;;  %7629 = vmatprep.mubr.msk.f32.mxu1 %vm8752_vm0, %v8753_v1 }
0x57a1   :  { %8155 = vmatprep.subr.bf16.mxu1 %v8751_v0 }
0x586a   :  { %v5569_v53 = vpop.f32.mrb[48].mxu1 }
0x586b   :  { %v5570_v41 = vadd.f32 %v5569_v53, %v9608_v35  ;;  %v7606_v57 = vpop.f32.mrb[49].mxu1 }
0x586d   :  { %v5573_v63 = vadd.f32 %v9569_v13, %v5570_v41 }
0x586f   :  { %8560 = vtanh.f32 %v5573_v63  ;;  %v6769_v52 = vmul.f32 -1.442695, %v5573_v63 }
0x5871   :  { %8562 = vpow2.f32 %v6769_v52 }
0x5872   :  { %v5670_v45 = vpop.f32.mrb[50].mxu1 }
0x5873   :  { %v7617_v19 = vpop.f32.mrb[51].mxu1 }
0x5879   :  { %v8561_v47 = vpop.eup %8560 }
0x587a   :  { %5583 = vrot.lane.b32.xlu1 %v8561_v47, %s8756_s28 }
0x587b   :  { %v8563_v49 = vpop.eup %8562 }
0x587c   :  { %v5577_v54 = vadd.f32 1.0, %v8563_v49 }
0x587e   :  { %8564 = vrcp.f32 %v5577_v54 }
0x5888   :  { %v8565_v28 = vpop.eup %8564 }
0x5889   :  { %v5581_v35 = vmul.f32 %v8565_v28, %v9575_v33 }
0x58ec   :  { %v5584_v60 = vpop.permute.xlu1 %5583 }
0x58ed   :  { %v5586_v8 = vmul.f32 %v8565_v28, %v5584_v60 }
0x58ef   :  { %5588 = vrot.lane.b32.xlu0 %v5586_v8, %s8750_s18 }
0x5961   :  { %v5589_v17 = vpop.permute.xlu0 %5588 }
0x5962   :  { %v9649_v6 = vadd.f32 %v5589_v17, %v5581_v35 }
0x5964   :  { %8566 = vtanh.f32 %v9649_v6 }
0x596e   :  { %v8567_v7 = vpop.eup %8566 }
0x596f   :  { %5594 = vrot.lane.b32.xlu1 %v8567_v7, %s8755_s27 }
0x59e1   :  { %v5595_v12 = vpop.permute.xlu1 %5594 }
0x59e2   :  { %v5597_v61 = vmul.f32 %v8565_v28, %v5595_v12 }
0x59e4   :  { %5599 = vrot.lane.b32.xlu0 %v5597_v61, %s8757_s29 }
0x5a56   :  { %v5600_v38 = vpop.permute.xlu0 %5599 }
0x5a57   :  { %5603 = vst.msk [vmem:[#allocation9 + $0x14] sm:$0xf] %vm1731_vm3, %v5600_v38  ;;  %7623 = vmatmul.mubr.msk.f32.vlgmr.msra.gmra.mrb[46].mxu0 %vm1629_vm4, %v5600_v38  ;;  %7630 = vmatmul.mubr.msk.f32.vlgmr.msra.gmra.mrb[52].mxu1 %vm1629_vm4, %v5600_v38 }
0x5a58   :  { %8131 = vmatpush1.bf16.msra.mxu0 %v9264_v39  ;;  %5835 = vmatprep.mubr.f32.mxu0 %v8753_v1 }
0x5a59   :  { %8133 = vmatprep.subr.bf16.mxu0 %v9266_v40  ;;  %8157 = vmatpush3.bf16.msra.mxu1 %v9218_v42 }
0x5a5a   :  { %8158 = vmatprep.subr.bf16.mxu1 %v8751_v0  ;;  %7648 = vmatprep.mubr.msk.f32.mxu1 %vm8752_vm0, %v8753_v1 }
0x5a5c   :  { %8135 = vmatpush1.bf16.msra.mxu0 %v9272_v48 }
0x5a5d   :  { %8137 = vmatprep.subr.bf16.mxu0 %v9276_v51  ;;  %8160 = vmatpush3.bf16.msra.mxu1 %v9221_v43 }
0x5a5e   :  { %8161 = vmatprep.subr.bf16.mxu1 %v8751_v0 }
0x5a60   :  { %8139 = vmatpush1.bf16.msra.mxu0 %v9283_v58 }
0x5a61   :  { %8141 = vmatprep.subr.bf16.mxu0 %v9286_v59  ;;  %8163 = vmatpush3.bf16.msra.mxu1 %v9225_v46 }
0x5a62   :  { %8164 = vmatprep.subr.bf16.mxu1 %v8751_v0 }
0x5a64   :  { %8143 = vmatpush1.bf16.msra.mxu0 %v9291_v30 }
0x5a65   :  { %8145 = vmatprep.subr.bf16.mxu0 %v9176_v3  ;;  %8166 = vmatpush3.bf16.msra.mxu1 %v9229_v50 }
0x5a66   :  { %8167 = vmatprep.subr.bf16.mxu1 %v8751_v0 }
0x5a67   :  { %6773 = vmatmul.mubr.msk.f32.vlgmr.msra.gmra.mrb[48].mxu0 %vm2569_vm12, %v5500_v16 }
0x5a68   :  { %8147 = vmatpush1.bf16.msra.mxu0 %v9178_v9  ;;  %5911 = vmatprep.mubr.f32.mxu0 %v8753_v1 }
0x5a69   :  { %8149 = vmatprep.subr.bf16.mxu0 %v9180_v11 }
0x5a6c   :  { %8151 = vmatpush1.bf16.msra.mxu0 %v9184_v32 }
0x5a6d   :  { %8173 = vmatprep.subr.bf16.mxu0 %v8751_v0 }
0x5b2a   :  { %v5742_v33 = vpop.f32.mrb[46].mxu0  ;;  %v9682_v14 = vpop.f32.mrb[52].mxu1 }
0x5b2b   :  { %v5743_v26 = vadd.f32 %v5742_v33, %v5670_v45  ;;  %v7624_v15 = vpop.f32.mrb[47].mxu0  ;;  %v7631_v21 = vpop.f32.mrb[53].mxu1 }
0x5b2d   :  { %v5746_v20 = vadd.f32 %v9684_v34, %v5743_v26 }
0x5b2f   :  { %8568 = vtanh.f32 %v5746_v20  ;;  %v6772_v37 = vmul.f32 -1.442695, %v5746_v20 }
0x5b31   :  { %8570 = vpow2.f32 %v6772_v37 }
0x5b39   :  { %v8569_v24 = vpop.eup %8568 }
0x5b3a   :  { %5756 = vrot.lane.b32.xlu1 %v8569_v24, %s8754_s2 }
0x5b3b   :  { %v8571_v56 = vpop.eup %8570 }
0x5b3c   :  { %v5750_v27 = vadd.f32 1.0, %v8571_v56 }
0x5b3e   :  { %8572 = vrcp.f32 %v5750_v27 }
0x5b48   :  { %v8573_v44 = vpop.eup %8572 }
0x5b49   :  { %v5754_v62 = vmul.f32 %v8573_v44, %v9614_v55 }
0x5bac   :  { %v5757_v4 = vpop.permute.xlu1 %5756 }
0x5bad   :  { %v5759_v2 = vmul.f32 %v8573_v44, %v5757_v4 }
0x5baf   :  { %5761 = vrot.lane.b32.xlu0 %v5759_v2, %s8755_s27 }
0x5c21   :  { %v5762_v36 = vpop.permute.xlu0 %5761 }
0x5c22   :  { %v9690_v16 = vadd.f32 %v5762_v36, %v5754_v62 }
0x5c24   :  { %8574 = vtanh.f32 %v9690_v16 }
0x5c2e   :  { %v8575_v53 = vpop.eup %8574 }
0x5c2f   :  { %5767 = vrot.lane.b32.xlu1 %v8575_v53, %s8754_s2 }
0x5ca1   :  { %v5768_v41 = vpop.permute.xlu1 %5767 }
0x5ca2   :  { %v5770_v57 = vmul.f32 %v8573_v44, %v5768_v41 }
0x5ca4   :  { %5843 = vrot.lane.b32.xlu0 %v5770_v57, %s8755_s27 }
0x5d16   :  { %v5844_v63 = vpop.permute.xlu0 %5843 }
0x5d17   :  { %6774 = vmatmul.mubr.msk.f32.vlgmr.msra.gmra.mrb[48].mxu0 %vm178_vm2, %v5844_v63 }
0x5d18   :  { %8175 = vmatpush3.bf16.msra.mxu0 %v9252_v22  ;;  %7666 = vmatprep.mubr.msk.f32.mxu0 %vm8752_vm0, %v8753_v1 }
0x5d19   :  { %8177 = vmatprep.subr.bf16.mxu0 %v9256_v29 }
0x5dea   :  { %v5913_v55 = vpop.f32.mrb[48].mxu0 }
0x5deb   :  { %v5918_v45 = vadd.f32 %v5913_v55, %v9207_v25  ;;  %v5915_v19 = vpop.f32.mrb[49].mxu0 }
0x5dec   :  { %v5919_v52 = vadd.f32 %v5915_v19, %v9214_v31 }
0x5ded   :  { %v6775_v47 = vmul.f32 -1.442695, %v5918_v45 }
0x5dee   :  { %v6776_v8 = vmul.f32 -1.442695, %v5919_v52 }
0x5def   :  { %8576 = vpow2.f32 %v6775_v47 }
0x5df0   :  { %8578 = vtanh.f32 %v5919_v52 }
0x5df9   :  { %v8577_v49 = vpop.eup %8576 }
0x5dfa   :  { %v5926_v54 = vadd.f32 1.0, %v8577_v49  ;;  %v8579_v28 = vpop.eup %8578 }
0x5dfc   :  { %8580 = vrcp.f32 %v5926_v54 }
0x5dfd   :  { %8582 = vpow2.f32 %v6776_v8 }
0x5e06   :  { %v8581_v60 = vpop.eup %8580 }
0x5e07   :  { %v5934_v22 = vmul.f32 %v8581_v60, %v8579_v28  ;;  %v8583_v29 = vpop.eup %8582  ;;  %v5933_v17 = vmul.f32 %v8581_v60, %v9628_v23 }
0x5e08   :  { %v5927_v35 = vadd.f32 1.0, %v8583_v29 }
0x5e09   :  { %5936 = vrot.lane.b32.xlu1 %v5934_v22, %s8754_s2 }
0x5e0a   :  { %8584 = vrcp.f32 %v5927_v35 }
0x5e14   :  { %v8585_v61 = vpop.eup %8584 }
0x5e7b   :  { %v5937_v7 = vpop.permute.xlu1 %5936 }
0x5e7c   :  { %v9704_v12 = vadd.f32 %v5937_v7, %v5933_v17 }
0x5e7e   :  { %8586 = vtanh.f32 %v9704_v12 }
0x5e88   :  { %v8587_v38 = vpop.eup %8586 }
0x5e89   :  { %v5941_v33 = vmul.f32 %v8587_v38, %v8585_v61 }
0x5e8b   :  { %6013 = vrot.lane.b32.xlu0 %v5941_v33, %s8754_s2 }
0x5efd   :  { %v6014_v26 = vpop.permute.xlu0 %6013 }
0x5efe   :  { %7649 = vmatmul.mubr.msk.f32.vlgmr.msra.gmra.mrb[54].mxu1 %vm2569_vm12, %v6014_v26 }
0x5eff   :  { %8169 = vmatpush3.bf16.msra.mxu1 %v9191_v18  ;;  %7659 = vmatprep.mubr.msk.f32.mxu1 %vm8752_vm0, %v8753_v1 }
0x5f00   :  { %8170 = vmatprep.subr.bf16.mxu1 %v8751_v0 }
0x5f03   :  { %8172 = vmatpush3.bf16.msra.mxu1 %v9195_v5 }
0x5f04   :  { %8200 = vmatprep.subr.bf16.mxu1 %v8751_v0 }
0x5f06   :  { %7660 = vmatmul.mubr.msk.f32.vlgmr.msra.gmra.mrb[56].mxu1 %vm178_vm2, %v5844_v63 }
0x5f07   :  { %8202 = vmatpush3.bf16.msra.mxu1 %v9254_v10  ;;  %7673 = vmatprep.mubr.msk.f32.mxu1 %vm8752_vm0, %v8753_v1 }
0x5f08   :  { %8203 = vmatprep.subr.bf16.mxu1 %v8751_v0 }
0x5fd1   :  { %v6083_v23 = vpop.f32.mrb[54].mxu1 }
0x5fd2   :  { %v6084_v18 = vadd.f32 %v6083_v23, %v9682_v14  ;;  %v7650_v15 = vpop.f32.mrb[55].mxu1 }
0x5fd4   :  { %v6087_v21 = vadd.f32 %v9569_v13, %v6084_v18 }
0x5fd6   :  { %8588 = vtanh.f32 %v6087_v21  ;;  %v6779_v37 = vmul.f32 -1.442695, %v6087_v21 }
0x5fd8   :  { %8590 = vpow2.f32 %v6779_v37 }
0x5fd9   :  { %v6184_v20 = vpop.f32.mrb[56].mxu1 }
0x5fda   :  { %v7661_v5 = vpop.f32.mrb[57].mxu1 }
0x5fe0   :  { %v8589_v24 = vpop.eup %8588 }
0x5fe1   :  { %6097 = vrot.lane.b32.xlu1 %v8589_v24, %s8756_s28 }
0x5fe2   :  { %v8591_v10 = vpop.eup %8590 }
0x5fe3   :  { %v6091_v56 = vadd.f32 1.0, %v8591_v10 }
0x5fe5   :  { %8592 = vrcp.f32 %v6091_v56 }
0x5fef   :  { %v8593_v27 = vpop.eup %8592 }
0x5ff0   :  { %v6095_v14 = vmul.f32 %v8593_v27, %v9649_v6 }
0x6053   :  { %v6098_v44 = vpop.permute.xlu1 %6097 }
0x6054   :  { %v6100_v4 = vmul.f32 %v8593_v27, %v6098_v44 }
0x6056   :  { %6102 = vrot.lane.b32.xlu0 %v6100_v4, %s8750_s18 }
0x60c8   :  { %v6103_v2 = vpop.permute.xlu0 %6102 }
0x60c9   :  { %v9725_v62 = vadd.f32 %v6103_v2, %v6095_v14 }
0x60cb   :  { %8594 = vtanh.f32 %v9725_v62 }
0x60d5   :  { %v8595_v36 = vpop.eup %8594 }
0x60d6   :  { %6108 = vrot.lane.b32.xlu1 %v8595_v36, %s8755_s27 }
0x6148   :  { %v6109_v53 = vpop.permute.xlu1 %6108 }
0x6149   :  { %v6111_v41 = vmul.f32 %v8593_v27, %v6109_v53 }
0x614b   :  { %6113 = vrot.lane.b32.xlu0 %v6111_v41, %s8757_s29 }
0x61bd   :  { %v6114_v57 = vpop.permute.xlu0 %6113 }
0x61be   :  { %6117 = vst.msk [vmem:[#allocation9 + $0x18] sm:$0xf] %vm1731_vm3, %v6114_v57  ;;  %7667 = vmatmul.mubr.msk.f32.vlgmr.msra.gmra.mrb[50].mxu0 %vm1629_vm4, %v6114_v57  ;;  %7674 = vmatmul.mubr.msk.f32.vlgmr.msra.gmra.mrb[58].mxu1 %vm1629_vm4, %v6114_v57 }
0x61bf   :  { %8179 = vmatpush1.bf16.msra.mxu0 %v9264_v39  ;;  %6349 = vmatprep.mubr.f32.mxu0 %v8753_v1 }
0x61c0   :  { %8181 = vmatprep.subr.bf16.mxu0 %v9266_v40  ;;  %8205 = vmatpush3.bf16.msra.mxu1 %v9218_v42 }
0x61c1   :  { %8206 = vmatprep.subr.bf16.mxu1 %v8751_v0  ;;  %7692 = vmatprep.mubr.msk.f32.mxu1 %vm8752_vm0, %v8753_v1 }
0x61c3   :  { %8183 = vmatpush1.bf16.msra.mxu0 %v9272_v48 }
0x61c4   :  { %8185 = vmatprep.subr.bf16.mxu0 %v9276_v51  ;;  %8208 = vmatpush3.bf16.msra.mxu1 %v9221_v43 }
0x61c5   :  { %8209 = vmatprep.subr.bf16.mxu1 %v8751_v0 }
0x61c7   :  { %8187 = vmatpush1.bf16.msra.mxu0 %v9283_v58 }
0x61c8   :  { %8189 = vmatprep.subr.bf16.mxu0 %v9286_v59  ;;  %8211 = vmatpush3.bf16.msra.mxu1 %v9225_v46 }
0x61c9   :  { %8212 = vmatprep.subr.bf16.mxu1 %v8751_v0 }
0x61cb   :  { %8191 = vmatpush1.bf16.msra.mxu0 %v9291_v30 }
0x61cc   :  { %8193 = vmatprep.subr.bf16.mxu0 %v9176_v3  ;;  %8214 = vmatpush3.bf16.msra.mxu1 %v9229_v50 }
0x61ce   :  { %6783 = vmatmul.mubr.msk.f32.vlgmr.msra.gmra.mrb[52].mxu0 %vm2569_vm12, %v6014_v26 }
0x61cf   :  { %8195 = vmatpush1.bf16.msra.mxu0 %v9178_v9  ;;  %6425 = vmatprep.mubr.f32.mxu0 %v8753_v1 }
0x61d0   :  { %8197 = vmatprep.subr.bf16.mxu0 %v9180_v11 }
0x61d3   :  { %8199 = vmatpush1.bf16.msra.mxu0 %v9184_v32 }
0x6291   :  { %v6256_v42 = vpop.f32.mrb[50].mxu0  ;;  %v6522_v43 = vpop.f32.mrb[58].mxu1 }
0x6292   :  { %v6257_v46 = vadd.f32 %v6256_v42, %v6184_v20  ;;  %v7668_v0 = vpop.f32.mrb[51].mxu0  ;;  %v7675_v39 = vpop.f32.mrb[59].mxu1 }
0x6294   :  { %v6260_v40 = vadd.f32 %v9684_v34, %v6257_v46 }
0x6296   :  { %8596 = vtanh.f32 %v6260_v40  ;;  %v6782_v50 = vmul.f32 -1.442695, %v6260_v40 }
0x6298   :  { %8598 = vpow2.f32 %v6782_v50 }
0x62a0   :  { %v8597_v3 = vpop.eup %8596 }
0x62a1   :  { %6270 = vrot.lane.b32.xlu1 %v8597_v3, %s8754_s2 }
0x62a2   :  { %v8599_v9 = vpop.eup %8598 }
0x62a3   :  { %v6264_v48 = vadd.f32 1.0, %v8599_v9 }
0x62a5   :  { %8600 = vrcp.f32 %v6264_v48 }
0x62af   :  { %v8601_v1 = vpop.eup %8600 }
0x62b0   :  { %v6268_v32 = vmul.f32 %v8601_v1, %v9690_v16 }
0x6313   :  { %v6271_v11 = vpop.permute.xlu1 %6270 }
0x6314   :  { %v6273_v51 = vmul.f32 %v8601_v1, %v6271_v11 }
0x6316   :  { %6275 = vrot.lane.b32.xlu0 %v6273_v51, %s8755_s27 }
0x6388   :  { %v6276_v58 = vpop.permute.xlu0 %6275 }
0x6389   :  { %v6278_v59 = vadd.f32 %v6276_v58, %v6268_v32 }
0x638b   :  { %8602 = vtanh.f32 %v6278_v59 }
0x6395   :  { %v8603_v30 = vpop.eup %8602 }
0x6396   :  { %6281 = vrot.lane.b32.xlu1 %v8603_v30, %s8754_s2 }
0x6408   :  { %v6282_v6 = vpop.permute.xlu1 %6281 }
0x6409   :  { %v6284_v34 = vmul.f32 %v8601_v1, %v6282_v6 }
0x640b   :  { %6357 = vrot.lane.b32.xlu0 %v6284_v34, %s8755_s27 }
0x647d   :  { %v6358_v63 = vpop.permute.xlu0 %6357 }
0x647e   :  { %6784 = vmatmul.mubr.msk.f32.vlgmr.msra.gmra.mrb[52].mxu0 %vm178_vm2, %v6358_v63 }
0x6551   :  { %v6427_v55 = vpop.f32.mrb[52].mxu0 }
0x6552   :  { %v6432_v45 = vadd.f32 %v6427_v55, %v9207_v25  ;;  %v6429_v19 = vpop.f32.mrb[53].mxu0 }
0x6553   :  { %v6433_v16 = vadd.f32 %v6429_v19, %v9214_v31 }
0x6554   :  { %v6785_v47 = vmul.f32 -1.442695, %v6432_v45 }
0x6555   :  { %v6786_v22 = vmul.f32 -1.442695, %v6433_v16 }
0x6556   :  { %8604 = vpow2.f32 %v6785_v47 }
0x6557   :  { %8606 = vtanh.f32 %v6433_v16 }
0x6560   :  { %v8605_v52 = vpop.eup %8604 }
0x6561   :  { %v6440_v49 = vadd.f32 1.0, %v8605_v52  ;;  %v8607_v54 = vpop.eup %8606 }
0x6563   :  { %8608 = vrcp.f32 %v6440_v49 }
0x6564   :  { %8610 = vpow2.f32 %v6786_v22 }
0x656d   :  { %v8609_v28 = vpop.eup %8608 }
0x656e   :  { %v6448_v60 = vmul.f32 %v8609_v28, %v8607_v54  ;;  %v8611_v8 = vpop.eup %8610  ;;  %v6447_v25 = vmul.f32 %v8609_v28, %v9704_v12 }
0x656f   :  { %v6441_v29 = vadd.f32 1.0, %v8611_v8 }
0x6570   :  { %6450 = vrot.lane.b32.xlu1 %v6448_v60, %s8754_s2 }
0x6571   :  { %8612 = vrcp.f32 %v6441_v29 }
0x657b   :  { %v8613_v31 = vpop.eup %8612 }
0x65e2   :  { %v6451_v35 = vpop.permute.xlu1 %6450 }
0x65e3   :  { %v6453_v17 = vadd.f32 %v6451_v35, %v6447_v25 }
0x65e5   :  { %8614 = vtanh.f32 %v6453_v17 }
0x65ef   :  { %v8615_v7 = vpop.eup %8614 }
0x65f0   :  { %v6455_v61 = vmul.f32 %v8615_v7, %v8613_v31 }
0x65f2   :  { %6527 = vrot.lane.b32.xlu0 %v6455_v61, %s8754_s2 }
0x6664   :  { %v6528_v38 = vpop.permute.xlu0 %6527 }
0x6665   :  { %7693 = vmatmul.mubr.msk.f32.vlgmr.msra.gmra.mrb[60].mxu1 %vm2569_vm12, %v6528_v38 }
0x6738   :  { %v6597_v33 = vpop.f32.mrb[60].mxu1 }
0x6739   :  { %v6598_v26 = vadd.f32 %v6597_v33, %v6522_v43  ;;  %v7694_v23 = vpop.f32.mrb[61].mxu1 }
0x673b   :  { %v6601_v18 = vadd.f32 %v9569_v13, %v6598_v26 }
0x673d   :  { %8616 = vtanh.f32 %v6601_v18  ;;  %v6789_v12 = vmul.f32 -1.442695, %v6601_v18 }
0x673f   :  { %8618 = vpow2.f32 %v6789_v12 }
0x6747   :  { %v8617_v15 = vpop.eup %8616 }
0x6748   :  { %6611 = vrot.lane.b32.xlu1 %v8617_v15, %s8756_s28 }
0x6749   :  { %v8619_v21 = vpop.eup %8618 }
0x674a   :  { %v6605_v20 = vadd.f32 1.0, %v8619_v21 }
0x674c   :  { %8620 = vrcp.f32 %v6605_v20 }
0x6756   :  { %v8621_v5 = vpop.eup %8620 }
0x6757   :  { %v6609_v10 = vmul.f32 %v8621_v5, %v9725_v62 }
0x67ba   :  { %v6612_v24 = vpop.permute.xlu1 %6611 }
0x67bb   :  { %v6614_v37 = vmul.f32 %v8621_v5, %v6612_v24 }
0x67bd   :  { %6616 = vrot.lane.b32.xlu0 %v6614_v37, %s8750_s18 }
0x682f   :  { %v6617_v56 = vpop.permute.xlu0 %6616 }
0x6830   :  { %v6619_v27 = vadd.f32 %v6617_v56, %v6609_v10 }
0x6832   :  { %8622 = vtanh.f32 %v6619_v27 }
0x683c   :  { %v8623_v13 = vpop.eup %8622 }
0x683d   :  { %6622 = vrot.lane.b32.xlu1 %v8623_v13, %s8755_s27 }
0x683e   :  { %8703 = shalt.err (!%p8700_p0)
}
0x683f   :  { %s8704_s11 = scalar_lea.hbm %s9806_s4, 64 }
0x6840   :  { %p8705_p1 = scmp.ne.s32.totalorder %s9806_s4, %s8704_s11  ;;  %p8708_p2 = scmp.lt.u32.totalorder %s8704_s11, %s9806_s4 }
0x6842   :  { %p8710_p3 = pnand %p8708_p2, %p8705_p1 }
0x6844   :  { %8713 = shalt.err (!%p8710_p3)
}
0x6845   :  { %6653 = dma.vmem_to_hbm [thread:$0]  %s6651_s7, 64, %s9806_s4, [#allocation11]  }
0x6846   :  { %s8761_s17 = smov [#allocation9]  }
0x6847   :  { %s6637_s19 = sshll.u32 %s8761_s17, 4  ;;  %s6638_s19 = int_to_ptr.vmem [resolvable:$true] %s6637_s19 }
0x6848   :  { %s8714_s20 = scalar_lea.vmem %s6638_s19, 512  ;;  %p8719_p5 = scmp.lt.s32.totalorder %s6638_s19, %s6638_s19 }
0x6849   :  { %p8715_p4 = scmp.ne.s32.totalorder %s6638_s19, %s8714_s20  ;;  %p8720_p6 = scmp.lt.s32.totalorder %s8714_s20, %s8714_s20 }
0x684b   :  { %p8721_p7 = por %p8720_p6, %p8719_p5 }
0x684d   :  { %p8722_p8 = pnand %p8721_p7, %p8715_p4 }
0x68af   :  { %v6623_v44 = vpop.permute.xlu1 %6622 }
0x68b0   :  { %v6625_v4 = vmul.f32 %v8621_v5, %v6623_v44 }
0x68b2   :  { %6627 = vrot.lane.b32.xlu0 %v6625_v4, %s8757_s29 }
0x6924   :  { %v6628_v14 = vpop.permute.xlu0 %6627 }
0x6925   :  { %6631 = vst.msk [vmem:[#allocation9 + $0x1c] sm:$0xf] %vm1731_vm3, %v6628_v14 }
0x6926   :  { %8725 = shalt.err (!%p8722_p8)
}
0x6927   :  { %s8726_s4 = scalar_lea.hbm %s9805_s3, 512 }
0x6928   :  { %p8727_p9 = scmp.ne.s32.totalorder %s9805_s3, %s8726_s4  ;;  %p8730_p10 = scmp.lt.u32.totalorder %s8726_s4, %s9805_s3 }
0x692a   :  { %p8732_p11 = pnand %p8730_p10, %p8727_p9 }
0x692c   :  { %8735 = shalt.err (!%p8732_p11)
}
0x692d   :  { %s8762_s25 = smov 4  }
0x692e   :  { %6643 = dma.vmem_to_hbm [thread:$0]  %s6638_s19, 512, %s9805_s3, [#allocation5], %s8754_s2, %s8754_s2, %s8762_s25  }
0x692f   :  { %8740 = dma.done.wait [#allocation5], 512  }
0x6930   :  { %8741 = vsyncadd [#allocation5], 4294966784 }
0x6931   :  { %8742 = dma.done.wait [#allocation11], 64  }
0x6932   :  { %8743 = vsyncadd [#allocation11], 4294967232 }
0x6933   :  { %6660 = vsyncpa [#allocation4], 1 }
0x6934   :  { %6661 = vsyncpa [#allocation7], 1 }
0x6935   :  { %6662 = vsyncpa [#allocation5], 1 }
0x6936   :  { %6663 = vsyncpa [#allocation11], 1 }

</bundles_post_ra>
